<compile_context>
chip_gen: v7x
topology: tpu7x:2x2x1
jax: 0.10.0
libtpu: 0.0.40
codegen_flags: <defaults>
</compile_context>

<pallas_src>
import numpy as np
import jax
import jax.numpy as jnp
from jax.experimental import pallas as pl
from jax.experimental.pallas import tpu as pltpu

# ----------------------------- small model config -----------------------------
IMG = 16          # img_size
PATCH = 8         # patch_size
IN_CHANS = 3
FRAMES = 4        # all_frames
TUBELET = 2
EMBED = 32        # embed_dim
DEPTH = 2
HEADS = 4
MLP_RATIO = 4.0
NUM_CLASSES = 10
NUM_TOKENS = 2    # prompt_config.NUM_TOKENS
BATCH = 2

HEAD_DIM = EMBED // HEADS
SCALE = HEAD_DIM ** (-0.5)
L = (IMG // PATCH) * (IMG // PATCH) * (FRAMES // TUBELET)   # num_patches = 8
N = NUM_TOKENS + L                                          # per-block seq len = 10
MLP_HIDDEN = int(EMBED * MLP_RATIO)                         # 128
PATCH_K = IN_CHANS * TUBELET * PATCH * PATCH                # 384
LN_EPS = 1e-5
HEAD_PAD = 128                                              # lane-dense head output slab

BLOCK_KEYS = ("ln1_w", "ln1_b", "wqkv", "wo", "bo",
              "ln2_w", "ln2_b", "w1", "b1", "w2", "b2")


# ----------------------------- sinusoid pos table ------------------------------
def get_sinusoid_encoding_table(n_position, d_hid):
    def get_position_angle_vec(position):
        return [position / np.power(10000, 2 * (hid_j // 2) / d_hid) for hid_j in range(d_hid)]
    table = np.array([get_position_angle_vec(pos_i) for pos_i in range(n_position)])
    table[:, 0::2] = np.sin(table[:, 0::2])
    table[:, 1::2] = np.cos(table[:, 1::2])
    return jnp.asarray(table, dtype=jnp.float32)          # (n_position, d_hid)


# ----------------------------- in-kernel helpers -------------------------------
def _layernorm(x, w, b):
    mean = jnp.mean(x, axis=-1, keepdims=True)
    var = jnp.mean((x - mean) ** 2, axis=-1, keepdims=True)
    return (x - mean) * jax.lax.rsqrt(var + LN_EPS) * w + b


def _erf(x):
    # Abramowitz & Stegun 7.1.26 polynomial (|err| < 1.5e-7): exp/mul/add only.
    a1, a2, a3, a4, a5 = 0.254829592, -0.284496736, 1.421413741, -1.453152027, 1.061405429
    pc = 0.3275911
    sign = jnp.where(x >= 0.0, 1.0, -1.0)
    ax = jnp.abs(x)
    t = 1.0 / (1.0 + pc * ax)   # exact divide kept so GELU tracks nn.GELU closely
    poly = ((((a5 * t + a4) * t + a3) * t + a2) * t + a1) * t
    return sign * (1.0 - poly * jnp.exp(-ax * ax))


def _gelu(x):
    # exact (erf-based) GELU, matching nn.GELU() default
    return 0.5 * x * (1.0 + _erf(x * np.float32(1.0 / np.sqrt(2.0))))


def _dotT(a, b):
    # a @ b.T (contract last dims of both) on the MXU — needed for q @ k^T
    return jax.lax.dot_general(a, b, (((1,), (1,)), ((), ())),
                               preferred_element_type=jnp.float32)


# ----------------------------- fused forward kernel ----------------------------
def fused_vit_kernel(*refs):
    patches_ref, prompt_ref, mask_ref, conv_w_ref, pos_ref = refs[:5]
    blk_refs = [refs[5 + d * 11: 5 + (d + 1) * 11] for d in range(DEPTH)]
    fnw_ref, fnb_ref, hw_ref, hb_ref = refs[5 + DEPTH * 11: 9 + DEPTH * 11]
    out_ref = refs[-1]

    prompt = prompt_ref[...]          # (N, E): prompt in rows < NUM_TOKENS, zeros elsewhere
    mask = mask_ref[...]              # (N, E): 0 for prompt rows, 1 for patch rows

    # --- PatchEmbed: Conv3d(stride==kernel) == patch-row matmul; pos embed fused.
    # Prompt rows of `carry` are garbage here; they are masked out before every layer.
    carry = jnp.dot(patches_ref[0], conv_w_ref[...],
                    preferred_element_type=jnp.float32) + pos_ref[...]       # (N, E)

    for d in range(DEPTH):            # static unroll over all layers (fully fused forward)
        ln1w, ln1b, wqkv, wo, bo, ln2w, ln2b, w1, b1, w2, b2 = blk_refs[d]
        wo_m = wo[...]

        # prepend prompt / drop previous prompt rows:  rows<NT <- prompt, rows>=NT <- carry
        x = prompt + mask * carry                                            # (N, E)

        # --- attention branch: x + proj(softmax(q k^T / sqrt(d)) v) ---
        hn = _layernorm(x, ln1w[...], ln1b[...])
        qkv = jnp.dot(hn, wqkv[...], preferred_element_type=jnp.float32)     # (N, 3E) fused QKV
        attn = jnp.zeros((N, EMBED), jnp.float32)
        for hh in range(HEADS):                                              # static head unroll
            lo = hh * HEAD_DIM
            q_h = qkv[:, lo:lo + HEAD_DIM] * np.float32(SCALE)
            k_h = qkv[:, EMBED + lo:EMBED + lo + HEAD_DIM]
            v_h = qkv[:, 2 * EMBED + lo:2 * EMBED + lo + HEAD_DIM]
            s = _dotT(q_h, k_h)                                              # (N, N)
            s = s - jnp.max(s, axis=-1, keepdims=True)
            e = jnp.exp(s)
            p_h = e * pl.reciprocal(jnp.sum(e, axis=-1, keepdims=True), approx=True)
            o_h = jnp.dot(p_h, v_h, preferred_element_type=jnp.float32)      # (N, hd)
            # per-head slice of the (pre-transposed) output projection:
            #   sum_h o_h @ Wo_t[h*hd:(h+1)*hd, :]  ==  concat(heads) @ Wo_t
            attn = attn + jnp.dot(o_h, wo_m[lo:lo + HEAD_DIM, :],
                                  preferred_element_type=jnp.float32)
        x = x + attn + bo[...]

        # --- MLP branch: x + fc2(gelu(fc1(norm2(x)))) ---
        h2 = _layernorm(x, ln2w[...], ln2b[...])
        m1 = _gelu(jnp.dot(h2, w1[...], preferred_element_type=jnp.float32) + b1[...])
        carry = x + jnp.dot(m1, w2[...], preferred_element_type=jnp.float32) + b2[...]

    # --- head: mean over patch rows only (prompt rows masked), fc_norm, linear ---
    pooled = jnp.sum(mask * carry, axis=0, keepdims=True) * np.float32(1.0 / L)   # (1, E)
    pooled = _layernorm(pooled, fnw_ref[...], fnb_ref[...])
    out_ref[0] = jnp.dot(pooled, hw_ref[...],
                         preferred_element_type=jnp.float32) + hb_ref[...]   # (1, HEAD_PAD)


# ----------------------------- pallas_call wrapper ------------------------------
def _full(shape):
    rank = len(shape)
    return pl.BlockSpec(shape, lambda i, _r=rank: (0,) * _r)


def vision_transformer_forward(x, p, params):
    # x: (B, C, T, H, W) video;  p: (1, NUM_TOKENS, EMBED) prompt (cfg.PROMPT.ATTRIBUTE=True)
    B = x.shape[0]
    patches = extract_patches(x)                                        # (B, L, K) glue
    patches = jnp.pad(patches, ((0, 0), (NUM_TOKENS, 0), (0, 0)))       # zero rows = prompt slots
    prompt_full = jnp.pad(p[0], ((0, L), (0, 0)))                       # (N, E) prompt rows + zeros

    inputs = [patches, prompt_full, params["mask"], params["conv_w"], params["pos_bias"]]
    for blk in params["blocks"]:
        inputs += [blk[k] for k in BLOCK_KEYS]
    inputs += [params["fc_norm_w"], params["fc_norm_b"], params["head_w"], params["head_b"]]

    in_specs = [pl.BlockSpec((1, N, PATCH_K), lambda i: (i, 0, 0))]
    in_specs += [_full(a.shape) for a in inputs[1:]]

    out = pl.pallas_call(
        fused_vit_kernel,
        grid=(B,),
        in_specs=in_specs,
        out_specs=pl.BlockSpec((1, 1, HEAD_PAD), lambda i: (i, 0, 0)),
        out_shape=jax.ShapeDtypeStruct((B, 1, HEAD_PAD), jnp.float32),
        compiler_params=pltpu.CompilerParams(dimension_semantics=("parallel",)),
    )(*inputs)
    return out[:, 0, :NUM_CLASSES]                                      # drop lane padding (glue)


# ----------------------------- glue: patch extraction ---------------------------
def extract_patches(x):
    # x: (B, C, T, H, W) -> (B, L, C*ts*ps*ps), matching Conv3d(stride=kernel)
    B, C, T, H, W = x.shape
    Tp, Hp, Wp = T // TUBELET, H // PATCH, W // PATCH
    x = x.reshape(B, C, Tp, TUBELET, Hp, PATCH, Wp, PATCH)
    x = x.transpose(0, 2, 4, 6, 1, 3, 5, 7)              # (B, Tp, Hp, Wp, C, ts, ps, ps)
    return x.reshape(B, Tp * Hp * Wp, C * TUBELET * PATCH * PATCH)


# ----------------------------- parameter init -----------------------------------
def init_params(key):
    def nrm(k, shape, std=0.02):
        return std * jax.random.normal(k, shape, dtype=jnp.float32)

    keys = iter(jax.random.split(key, 4 + DEPTH * 4))
    pos = get_sinusoid_encoding_table(L, EMBED)                        # (L, E)
    conv_b = jnp.zeros((1, EMBED), jnp.float32)
    params = {
        # TODO(synk): PyTorch default kaiming/trunc-normal init replaced by deterministic
        # normal; shapes / forward math identical.  Weights stored PRE-TRANSPOSED for h @ W.
        "conv_w": nrm(next(keys), (PATCH_K, EMBED)),                   # Conv3d kernel as (K, E)
        # pos table + conv bias, padded with zero rows for the prompt slots (masked anyway)
        "pos_bias": jnp.concatenate(
            [jnp.zeros((NUM_TOKENS, EMBED), jnp.float32), pos + conv_b], axis=0),
        # 0 on prompt rows, 1 on patch rows — used for prompt prepend/drop & mean pooling
        "mask": jnp.concatenate(
            [jnp.zeros((NUM_TOKENS, EMBED), jnp.float32),
             jnp.ones((L, EMBED), jnp.float32)], axis=0),
        "fc_norm_w": jnp.ones((1, EMBED), jnp.float32),
        "fc_norm_b": jnp.zeros((1, EMBED), jnp.float32),
        # head weight padded to a lane-dense 128-wide slab (cols >= NUM_CLASSES are zero)
        "head_w": jnp.pad(nrm(next(keys), (EMBED, NUM_CLASSES)),
                          ((0, 0), (0, HEAD_PAD - NUM_CLASSES))),
        "head_b": jnp.zeros((1, HEAD_PAD), jnp.float32),
        "blocks": [],
    }
    for _ in range(DEPTH):
        blk = {
            "ln1_w": jnp.ones((1, EMBED), jnp.float32),
            "ln1_b": jnp.zeros((1, EMBED), jnp.float32),
            "wqkv": nrm(next(keys), (EMBED, 3 * EMBED)),               # fused [Wq|Wk|Wv], (E, 3E)
            "wo": nrm(next(keys), (EMBED, EMBED)),                     # proj.weight^T
            "bo": jnp.zeros((1, EMBED), jnp.float32),
            "ln2_w": jnp.ones((1, EMBED), jnp.float32),
            "ln2_b": jnp.zeros((1, EMBED), jnp.float32),
            "w1": nrm(next(keys), (EMBED, MLP_HIDDEN)),                # fc1.weight^T
            "b1": jnp.zeros((1, MLP_HIDDEN), jnp.float32),
            "w2": nrm(next(keys), (MLP_HIDDEN, EMBED)),                # fc2.weight^T
            "b2": jnp.zeros((1, EMBED), jnp.float32),
        }
        params["blocks"].append(blk)
    return params


# ----------------------------- main ----------------------------------------------
if __name__ == "__main__":
    key = jax.random.PRNGKey(0)
    kx, kp, kw = jax.random.split(key, 3)
    x = jax.random.normal(kx, (BATCH, IN_CHANS, FRAMES, IMG, IMG), dtype=jnp.float32)
    p = 0.02 * jax.random.normal(kp, (1, NUM_TOKENS, EMBED), dtype=jnp.float32)
    params = init_params(kw)

    fwd = jax.jit(vision_transformer_forward)
    out = jax.block_until_ready(fwd(x, p, params))
    assert out.shape == (BATCH, NUM_CLASSES), out.shape
    assert bool(jnp.all(jnp.isfinite(out)))
    print("KERNEL_OK")
</pallas_src>

<mosaic_0001>
module attributes {stable_mosaic.version = 11 : i64} {
  func.func @fused_vit_kernel(%arg0: i32, %arg1: memref<1x10x384xf32, #tpu.memory_space<vmem>>, %arg2: memref<10x32xf32, #tpu.memory_space<vmem>>, %arg3: memref<10x32xf32, #tpu.memory_space<vmem>>, %arg4: memref<384x32xf32, #tpu.memory_space<vmem>>, %arg5: memref<10x32xf32, #tpu.memory_space<vmem>>, %arg6: memref<1x32xf32, #tpu.memory_space<vmem>>, %arg7: memref<1x32xf32, #tpu.memory_space<vmem>>, %arg8: memref<32x96xf32, #tpu.memory_space<vmem>>, %arg9: memref<32x32xf32, #tpu.memory_space<vmem>>, %arg10: memref<1x32xf32, #tpu.memory_space<vmem>>, %arg11: memref<1x32xf32, #tpu.memory_space<vmem>>, %arg12: memref<1x32xf32, #tpu.memory_space<vmem>>, %arg13: memref<32x128xf32, #tpu.memory_space<vmem>>, %arg14: memref<1x128xf32, #tpu.memory_space<vmem>>, %arg15: memref<128x32xf32, #tpu.memory_space<vmem>>, %arg16: memref<1x32xf32, #tpu.memory_space<vmem>>, %arg17: memref<1x32xf32, #tpu.memory_space<vmem>>, %arg18: memref<1x32xf32, #tpu.memory_space<vmem>>, %arg19: memref<32x96xf32, #tpu.memory_space<vmem>>, %arg20: memref<32x32xf32, #tpu.memory_space<vmem>>, %arg21: memref<1x32xf32, #tpu.memory_space<vmem>>, %arg22: memref<1x32xf32, #tpu.memory_space<vmem>>, %arg23: memref<1x32xf32, #tpu.memory_space<vmem>>, %arg24: memref<32x128xf32, #tpu.memory_space<vmem>>, %arg25: memref<1x128xf32, #tpu.memory_space<vmem>>, %arg26: memref<128x32xf32, #tpu.memory_space<vmem>>, %arg27: memref<1x32xf32, #tpu.memory_space<vmem>>, %arg28: memref<1x32xf32, #tpu.memory_space<vmem>>, %arg29: memref<1x32xf32, #tpu.memory_space<vmem>>, %arg30: memref<32x128xf32, #tpu.memory_space<vmem>>, %arg31: memref<1x128xf32, #tpu.memory_space<vmem>>, %arg32: memref<1x1x128xf32, #tpu.memory_space<vmem>>) attributes {dimension_semantics = [#tpu.dimension_semantics<parallel>], iteration_bounds = array<i64: 2>, scalar_prefetch = 0 : i64, scratch_operands = 0 : i64, tpu.core_type = #tpu.core_type<tc>, window_params = [{transform_indices = @transform_0, window_bounds = array<i64: 1, 10, 384>}, {pipeline_mode = #tpu.pipeline_mode<synchronous>, transform_indices = @transform_1, window_bounds = array<i64: 10, 32>}, {pipeline_mode = #tpu.pipeline_mode<synchronous>, transform_indices = @transform_2, window_bounds = array<i64: 10, 32>}, {pipeline_mode = #tpu.pipeline_mode<synchronous>, transform_indices = @transform_3, window_bounds = array<i64: 384, 32>}, {pipeline_mode = #tpu.pipeline_mode<synchronous>, transform_indices = @transform_4, window_bounds = array<i64: 10, 32>}, {pipeline_mode = #tpu.pipeline_mode<synchronous>, transform_indices = @transform_5, window_bounds = array<i64: 1, 32>}, {pipeline_mode = #tpu.pipeline_mode<synchronous>, transform_indices = @transform_6, window_bounds = array<i64: 1, 32>}, {pipeline_mode = #tpu.pipeline_mode<synchronous>, transform_indices = @transform_7, window_bounds = array<i64: 32, 96>}, {pipeline_mode = #tpu.pipeline_mode<synchronous>, transform_indices = @transform_8, window_bounds = array<i64: 32, 32>}, {pipeline_mode = #tpu.pipeline_mode<synchronous>, transform_indices = @transform_9, window_bounds = array<i64: 1, 32>}, {pipeline_mode = #tpu.pipeline_mode<synchronous>, transform_indices = @transform_10, window_bounds = array<i64: 1, 32>}, {pipeline_mode = #tpu.pipeline_mode<synchronous>, transform_indices = @transform_11, window_bounds = array<i64: 1, 32>}, {pipeline_mode = #tpu.pipeline_mode<synchronous>, transform_indices = @transform_12, window_bounds = array<i64: 32, 128>}, {pipeline_mode = #tpu.pipeline_mode<synchronous>, transform_indices = @transform_13, window_bounds = array<i64: 1, 128>}, {pipeline_mode = #tpu.pipeline_mode<synchronous>, transform_indices = @transform_14, window_bounds = array<i64: 128, 32>}, {pipeline_mode = #tpu.pipeline_mode<synchronous>, transform_indices = @transform_15, window_bounds = array<i64: 1, 32>}, {pipeline_mode = #tpu.pipeline_mode<synchronous>, transform_indices = @transform_16, window_bounds = array<i64: 1, 32>}, {pipeline_mode = #tpu.pipeline_mode<synchronous>, transform_indices = @transform_17, window_bounds = array<i64: 1, 32>}, {pipeline_mode = #tpu.pipeline_mode<synchronous>, transform_indices = @transform_18, window_bounds = array<i64: 32, 96>}, {pipeline_mode = #tpu.pipeline_mode<synchronous>, transform_indices = @transform_19, window_bounds = array<i64: 32, 32>}, {pipeline_mode = #tpu.pipeline_mode<synchronous>, transform_indices = @transform_20, window_bounds = array<i64: 1, 32>}, {pipeline_mode = #tpu.pipeline_mode<synchronous>, transform_indices = @transform_21, window_bounds = array<i64: 1, 32>}, {pipeline_mode = #tpu.pipeline_mode<synchronous>, transform_indices = @transform_22, window_bounds = array<i64: 1, 32>}, {pipeline_mode = #tpu.pipeline_mode<synchronous>, transform_indices = @transform_23, window_bounds = array<i64: 32, 128>}, {pipeline_mode = #tpu.pipeline_mode<synchronous>, transform_indices = @transform_24, window_bounds = array<i64: 1, 128>}, {pipeline_mode = #tpu.pipeline_mode<synchronous>, transform_indices = @transform_25, window_bounds = array<i64: 128, 32>}, {pipeline_mode = #tpu.pipeline_mode<synchronous>, transform_indices = @transform_26, window_bounds = array<i64: 1, 32>}, {pipeline_mode = #tpu.pipeline_mode<synchronous>, transform_indices = @transform_27, window_bounds = array<i64: 1, 32>}, {pipeline_mode = #tpu.pipeline_mode<synchronous>, transform_indices = @transform_28, window_bounds = array<i64: 1, 32>}, {pipeline_mode = #tpu.pipeline_mode<synchronous>, transform_indices = @transform_29, window_bounds = array<i64: 32, 128>}, {pipeline_mode = #tpu.pipeline_mode<synchronous>, transform_indices = @transform_30, window_bounds = array<i64: 1, 128>}, {transform_indices = @transform_31, window_bounds = array<i64: 1, 1, 128>}]} {
    %c0 = arith.constant 0 : index
    %c0_0 = arith.constant 0 : index
    %0 = vector.load %arg2[%c0, %c0_0] : memref<10x32xf32, #tpu.memory_space<vmem>>, vector<10x32xf32>
    %c0_1 = arith.constant 0 : index
    %c0_2 = arith.constant 0 : index
    %1 = vector.load %arg3[%c0_1, %c0_2] : memref<10x32xf32, #tpu.memory_space<vmem>>, vector<10x32xf32>
    %c0_3 = arith.constant 0 : index
    %c0_4 = arith.constant 0 : index
    %c0_5 = arith.constant 0 : index
    %2 = vector.load %arg1[%c0_3, %c0_4, %c0_5] : memref<1x10x384xf32, #tpu.memory_space<vmem>>, vector<1x10x384xf32>
    %3 = vector.shape_cast %2 : vector<1x10x384xf32> to vector<10x384xf32>
    %c0_6 = arith.constant 0 : index
    %c0_7 = arith.constant 0 : index
    %4 = vector.load %arg4[%c0_6, %c0_7] : memref<384x32xf32, #tpu.memory_space<vmem>>, vector<384x32xf32>
    %cst = arith.constant dense<0.000000e+00> : vector<10x32xf32>
    %5 = tpu.matmul %3, %4, %cst {dimension_numbers = #tpu.dot_dimension_numbers<[1], [0], [0], [1], [0, 0, 1, 1], [], []>} : vector<10x384xf32>, vector<384x32xf32>, vector<10x32xf32> -> vector<10x32xf32>
    %c0_8 = arith.constant 0 : index
    %c0_9 = arith.constant 0 : index
    %6 = vector.load %arg5[%c0_8, %c0_9] : memref<10x32xf32, #tpu.memory_space<vmem>>, vector<10x32xf32>
    %7 = arith.addf %5, %6 : vector<10x32xf32>
    %c0_10 = arith.constant 0 : index
    %c0_11 = arith.constant 0 : index
    %8 = vector.load %arg9[%c0_10, %c0_11] : memref<32x32xf32, #tpu.memory_space<vmem>>, vector<32x32xf32>
    %9 = arith.mulf %1, %7 : vector<10x32xf32>
    %10 = arith.addf %0, %9 : vector<10x32xf32>
    %c0_12 = arith.constant 0 : index
    %c0_13 = arith.constant 0 : index
    %11 = vector.load %arg6[%c0_12, %c0_13] : memref<1x32xf32, #tpu.memory_space<vmem>>, vector<1x32xf32>
    %c0_14 = arith.constant 0 : index
    %c0_15 = arith.constant 0 : index
    %12 = vector.load %arg7[%c0_14, %c0_15] : memref<1x32xf32, #tpu.memory_space<vmem>>, vector<1x32xf32>
    %cst_16 = arith.constant dense<0.000000e+00> : vector<10xf32>
    %13 = vector.multi_reduction <add>, %10, %cst_16 [1] : vector<10x32xf32> to vector<10xf32>
    %14 = vector.shape_cast %13 : vector<10xf32> to vector<10x1xf32>
    %cst_17 = arith.constant 3.200000e+01 : f32
    %15 = vector.broadcast %cst_17 : f32 to vector<10x1xf32>
    %16 = arith.divf %14, %15 : vector<10x1xf32>
    %17 = vector.broadcast %16 : vector<10x1xf32> to vector<10x32xf32>
    %18 = arith.subf %10, %17 : vector<10x32xf32>
    %19 = arith.mulf %18, %18 : vector<10x32xf32>
    %cst_18 = arith.constant dense<0.000000e+00> : vector<10xf32>
    %20 = vector.multi_reduction <add>, %19, %cst_18 [1] : vector<10x32xf32> to vector<10xf32>
    %21 = vector.shape_cast %20 : vector<10xf32> to vector<10x1xf32>
    %cst_19 = arith.constant 3.200000e+01 : f32
    %22 = vector.broadcast %cst_19 : f32 to vector<10x1xf32>
    %23 = arith.divf %21, %22 : vector<10x1xf32>
    %24 = vector.broadcast %16 : vector<10x1xf32> to vector<10x32xf32>
    %25 = arith.subf %10, %24 : vector<10x32xf32>
    %cst_20 = arith.constant 9.99999974E-6 : f32
    %26 = vector.broadcast %cst_20 : f32 to vector<10x1xf32>
    %27 = arith.addf %23, %26 : vector<10x1xf32>
    %28 = math.rsqrt %27 : vector<10x1xf32>
    %29 = vector.broadcast %28 : vector<10x1xf32> to vector<10x32xf32>
    %30 = arith.mulf %25, %29 : vector<10x32xf32>
    %31 = vector.broadcast %11 : vector<1x32xf32> to vector<10x32xf32>
    %32 = arith.mulf %30, %31 : vector<10x32xf32>
    %33 = vector.broadcast %12 : vector<1x32xf32> to vector<10x32xf32>
    %34 = arith.addf %32, %33 : vector<10x32xf32>
    %c0_21 = arith.constant 0 : index
    %c0_22 = arith.constant 0 : index
    %35 = vector.load %arg8[%c0_21, %c0_22] : memref<32x96xf32, #tpu.memory_space<vmem>>, vector<32x96xf32>
    %cst_23 = arith.constant dense<0.000000e+00> : vector<10x96xf32>
    %36 = tpu.matmul %34, %35, %cst_23 {dimension_numbers = #tpu.dot_dimension_numbers<[1], [0], [0], [1], [0, 0, 1, 1], [], []>} : vector<10x32xf32>, vector<32x96xf32>, vector<10x96xf32> -> vector<10x96xf32>
    %cst_24 = arith.constant 0.000000e+00 : f32
    %37 = vector.broadcast %cst_24 : f32 to vector<10x32xf32>
    %38 = vector.extract_strided_slice %36 {offsets = [0, 0], sizes = [10, 8], strides = [1, 1]} : vector<10x96xf32> to vector<10x8xf32>
    %cst_25 = arith.constant 0.353553385 : f32
    %39 = vector.broadcast %cst_25 : f32 to vector<10x8xf32>
    %40 = arith.mulf %38, %39 : vector<10x8xf32>
    %41 = vector.extract_strided_slice %36 {offsets = [0, 32], sizes = [10, 8], strides = [1, 1]} : vector<10x96xf32> to vector<10x8xf32>
    %42 = vector.extract_strided_slice %36 {offsets = [0, 64], sizes = [10, 8], strides = [1, 1]} : vector<10x96xf32> to vector<10x8xf32>
    %cst_26 = arith.constant dense<0.000000e+00> : vector<10x10xf32>
    %43 = tpu.matmul %40, %41, %cst_26 {dimension_numbers = #tpu.dot_dimension_numbers<[1], [1], [0], [0], [0, 0, 1, 0], [], []>} : vector<10x8xf32>, vector<10x8xf32>, vector<10x10xf32> -> vector<10x10xf32>
    %cst_27 = arith.constant dense<0xFF800000> : vector<10xf32>
    %44 = vector.multi_reduction <maximumf>, %43, %cst_27 [1] : vector<10x10xf32> to vector<10xf32>
    %45 = vector.shape_cast %44 : vector<10xf32> to vector<10x1xf32>
    %46 = vector.broadcast %45 : vector<10x1xf32> to vector<10x10xf32>
    %47 = arith.subf %43, %46 : vector<10x10xf32>
    %48 = math.exp %47 : vector<10x10xf32>
    %cst_28 = arith.constant dense<0.000000e+00> : vector<10xf32>
    %49 = vector.multi_reduction <add>, %48, %cst_28 [1] : vector<10x10xf32> to vector<10xf32>
    %50 = vector.shape_cast %49 : vector<10xf32> to vector<10x1xf32>
    %51 = tpu.reciprocal %50 {approx = true} : vector<10x1xf32> -> vector<10x1xf32>
    %52 = vector.broadcast %51 : vector<10x1xf32> to vector<10x10xf32>
    %53 = arith.mulf %48, %52 : vector<10x10xf32>
    %cst_29 = arith.constant dense<0.000000e+00> : vector<10x8xf32>
    %54 = tpu.matmul %53, %42, %cst_29 {dimension_numbers = #tpu.dot_dimension_numbers<[1], [0], [0], [1], [0, 0, 1, 1], [], []>} : vector<10x10xf32>, vector<10x8xf32>, vector<10x8xf32> -> vector<10x8xf32>
    %55 = vector.extract_strided_slice %8 {offsets = [0, 0], sizes = [8, 32], strides = [1, 1]} : vector<32x32xf32> to vector<8x32xf32>
    %cst_30 = arith.constant dense<0.000000e+00> : vector<10x32xf32>
    %56 = tpu.matmul %54, %55, %cst_30 {dimension_numbers = #tpu.dot_dimension_numbers<[1], [0], [0], [1], [0, 0, 1, 1], [], []>} : vector<10x8xf32>, vector<8x32xf32>, vector<10x32xf32> -> vector<10x32xf32>
    %57 = arith.addf %37, %56 : vector<10x32xf32>
    %58 = vector.extract_strided_slice %36 {offsets = [0, 8], sizes = [10, 8], strides = [1, 1]} : vector<10x96xf32> to vector<10x8xf32>
    %cst_31 = arith.constant 0.353553385 : f32
    %59 = vector.broadcast %cst_31 : f32 to vector<10x8xf32>
    %60 = arith.mulf %58, %59 : vector<10x8xf32>
    %61 = vector.extract_strided_slice %36 {offsets = [0, 40], sizes = [10, 8], strides = [1, 1]} : vector<10x96xf32> to vector<10x8xf32>
    %62 = vector.extract_strided_slice %36 {offsets = [0, 72], sizes = [10, 8], strides = [1, 1]} : vector<10x96xf32> to vector<10x8xf32>
    %cst_32 = arith.constant dense<0.000000e+00> : vector<10x10xf32>
    %63 = tpu.matmul %60, %61, %cst_32 {dimension_numbers = #tpu.dot_dimension_numbers<[1], [1], [0], [0], [0, 0, 1, 0], [], []>} : vector<10x8xf32>, vector<10x8xf32>, vector<10x10xf32> -> vector<10x10xf32>
    %cst_33 = arith.constant dense<0xFF800000> : vector<10xf32>
    %64 = vector.multi_reduction <maximumf>, %63, %cst_33 [1] : vector<10x10xf32> to vector<10xf32>
    %65 = vector.shape_cast %64 : vector<10xf32> to vector<10x1xf32>
    %66 = vector.broadcast %65 : vector<10x1xf32> to vector<10x10xf32>
    %67 = arith.subf %63, %66 : vector<10x10xf32>
    %68 = math.exp %67 : vector<10x10xf32>
    %cst_34 = arith.constant dense<0.000000e+00> : vector<10xf32>
    %69 = vector.multi_reduction <add>, %68, %cst_34 [1] : vector<10x10xf32> to vector<10xf32>
    %70 = vector.shape_cast %69 : vector<10xf32> to vector<10x1xf32>
    %71 = tpu.reciprocal %70 {approx = true} : vector<10x1xf32> -> vector<10x1xf32>
    %72 = vector.broadcast %71 : vector<10x1xf32> to vector<10x10xf32>
    %73 = arith.mulf %68, %72 : vector<10x10xf32>
    %cst_35 = arith.constant dense<0.000000e+00> : vector<10x8xf32>
    %74 = tpu.matmul %73, %62, %cst_35 {dimension_numbers = #tpu.dot_dimension_numbers<[1], [0], [0], [1], [0, 0, 1, 1], [], []>} : vector<10x10xf32>, vector<10x8xf32>, vector<10x8xf32> -> vector<10x8xf32>
    %75 = vector.extract_strided_slice %8 {offsets = [8, 0], sizes = [8, 32], strides = [1, 1]} : vector<32x32xf32> to vector<8x32xf32>
    %cst_36 = arith.constant dense<0.000000e+00> : vector<10x32xf32>
    %76 = tpu.matmul %74, %75, %cst_36 {dimension_numbers = #tpu.dot_dimension_numbers<[1], [0], [0], [1], [0, 0, 1, 1], [], []>} : vector<10x8xf32>, vector<8x32xf32>, vector<10x32xf32> -> vector<10x32xf32>
    %77 = arith.addf %57, %76 : vector<10x32xf32>
    %78 = vector.extract_strided_slice %36 {offsets = [0, 16], sizes = [10, 8], strides = [1, 1]} : vector<10x96xf32> to vector<10x8xf32>
    %cst_37 = arith.constant 0.353553385 : f32
    %79 = vector.broadcast %cst_37 : f32 to vector<10x8xf32>
    %80 = arith.mulf %78, %79 : vector<10x8xf32>
    %81 = vector.extract_strided_slice %36 {offsets = [0, 48], sizes = [10, 8], strides = [1, 1]} : vector<10x96xf32> to vector<10x8xf32>
    %82 = vector.extract_strided_slice %36 {offsets = [0, 80], sizes = [10, 8], strides = [1, 1]} : vector<10x96xf32> to vector<10x8xf32>
    %cst_38 = arith.constant dense<0.000000e+00> : vector<10x10xf32>
    %83 = tpu.matmul %80, %81, %cst_38 {dimension_numbers = #tpu.dot_dimension_numbers<[1], [1], [0], [0], [0, 0, 1, 0], [], []>} : vector<10x8xf32>, vector<10x8xf32>, vector<10x10xf32> -> vector<10x10xf32>
    %cst_39 = arith.constant dense<0xFF800000> : vector<10xf32>
    %84 = vector.multi_reduction <maximumf>, %83, %cst_39 [1] : vector<10x10xf32> to vector<10xf32>
    %85 = vector.shape_cast %84 : vector<10xf32> to vector<10x1xf32>
    %86 = vector.broadcast %85 : vector<10x1xf32> to vector<10x10xf32>
    %87 = arith.subf %83, %86 : vector<10x10xf32>
    %88 = math.exp %87 : vector<10x10xf32>
    %cst_40 = arith.constant dense<0.000000e+00> : vector<10xf32>
    %89 = vector.multi_reduction <add>, %88, %cst_40 [1] : vector<10x10xf32> to vector<10xf32>
    %90 = vector.shape_cast %89 : vector<10xf32> to vector<10x1xf32>
    %91 = tpu.reciprocal %90 {approx = true} : vector<10x1xf32> -> vector<10x1xf32>
    %92 = vector.broadcast %91 : vector<10x1xf32> to vector<10x10xf32>
    %93 = arith.mulf %88, %92 : vector<10x10xf32>
    %cst_41 = arith.constant dense<0.000000e+00> : vector<10x8xf32>
    %94 = tpu.matmul %93, %82, %cst_41 {dimension_numbers = #tpu.dot_dimension_numbers<[1], [0], [0], [1], [0, 0, 1, 1], [], []>} : vector<10x10xf32>, vector<10x8xf32>, vector<10x8xf32> -> vector<10x8xf32>
    %95 = vector.extract_strided_slice %8 {offsets = [16, 0], sizes = [8, 32], strides = [1, 1]} : vector<32x32xf32> to vector<8x32xf32>
    %cst_42 = arith.constant dense<0.000000e+00> : vector<10x32xf32>
    %96 = tpu.matmul %94, %95, %cst_42 {dimension_numbers = #tpu.dot_dimension_numbers<[1], [0], [0], [1], [0, 0, 1, 1], [], []>} : vector<10x8xf32>, vector<8x32xf32>, vector<10x32xf32> -> vector<10x32xf32>
    %97 = arith.addf %77, %96 : vector<10x32xf32>
    %98 = vector.extract_strided_slice %36 {offsets = [0, 24], sizes = [10, 8], strides = [1, 1]} : vector<10x96xf32> to vector<10x8xf32>
    %cst_43 = arith.constant 0.353553385 : f32
    %99 = vector.broadcast %cst_43 : f32 to vector<10x8xf32>
    %100 = arith.mulf %98, %99 : vector<10x8xf32>
    %101 = vector.extract_strided_slice %36 {offsets = [0, 56], sizes = [10, 8], strides = [1, 1]} : vector<10x96xf32> to vector<10x8xf32>
    %102 = vector.extract_strided_slice %36 {offsets = [0, 88], sizes = [10, 8], strides = [1, 1]} : vector<10x96xf32> to vector<10x8xf32>
    %cst_44 = arith.constant dense<0.000000e+00> : vector<10x10xf32>
    %103 = tpu.matmul %100, %101, %cst_44 {dimension_numbers = #tpu.dot_dimension_numbers<[1], [1], [0], [0], [0, 0, 1, 0], [], []>} : vector<10x8xf32>, vector<10x8xf32>, vector<10x10xf32> -> vector<10x10xf32>
    %cst_45 = arith.constant dense<0xFF800000> : vector<10xf32>
    %104 = vector.multi_reduction <maximumf>, %103, %cst_45 [1] : vector<10x10xf32> to vector<10xf32>
    %105 = vector.shape_cast %104 : vector<10xf32> to vector<10x1xf32>
    %106 = vector.broadcast %105 : vector<10x1xf32> to vector<10x10xf32>
    %107 = arith.subf %103, %106 : vector<10x10xf32>
    %108 = math.exp %107 : vector<10x10xf32>
    %cst_46 = arith.constant dense<0.000000e+00> : vector<10xf32>
    %109 = vector.multi_reduction <add>, %108, %cst_46 [1] : vector<10x10xf32> to vector<10xf32>
    %110 = vector.shape_cast %109 : vector<10xf32> to vector<10x1xf32>
    %111 = tpu.reciprocal %110 {approx = true} : vector<10x1xf32> -> vector<10x1xf32>
    %112 = vector.broadcast %111 : vector<10x1xf32> to vector<10x10xf32>
    %113 = arith.mulf %108, %112 : vector<10x10xf32>
    %cst_47 = arith.constant dense<0.000000e+00> : vector<10x8xf32>
    %114 = tpu.matmul %113, %102, %cst_47 {dimension_numbers = #tpu.dot_dimension_numbers<[1], [0], [0], [1], [0, 0, 1, 1], [], []>} : vector<10x10xf32>, vector<10x8xf32>, vector<10x8xf32> -> vector<10x8xf32>
    %115 = vector.extract_strided_slice %8 {offsets = [24, 0], sizes = [8, 32], strides = [1, 1]} : vector<32x32xf32> to vector<8x32xf32>
    %cst_48 = arith.constant dense<0.000000e+00> : vector<10x32xf32>
    %116 = tpu.matmul %114, %115, %cst_48 {dimension_numbers = #tpu.dot_dimension_numbers<[1], [0], [0], [1], [0, 0, 1, 1], [], []>} : vector<10x8xf32>, vector<8x32xf32>, vector<10x32xf32> -> vector<10x32xf32>
    %117 = arith.addf %97, %116 : vector<10x32xf32>
    %118 = arith.addf %10, %117 : vector<10x32xf32>
    %c0_49 = arith.constant 0 : index
    %c0_50 = arith.constant 0 : index
    %119 = vector.load %arg10[%c0_49, %c0_50] : memref<1x32xf32, #tpu.memory_space<vmem>>, vector<1x32xf32>
    %120 = vector.broadcast %119 : vector<1x32xf32> to vector<10x32xf32>
    %121 = arith.addf %118, %120 : vector<10x32xf32>
    %c0_51 = arith.constant 0 : index
    %c0_52 = arith.constant 0 : index
    %122 = vector.load %arg11[%c0_51, %c0_52] : memref<1x32xf32, #tpu.memory_space<vmem>>, vector<1x32xf32>
    %c0_53 = arith.constant 0 : index
    %c0_54 = arith.constant 0 : index
    %123 = vector.load %arg12[%c0_53, %c0_54] : memref<1x32xf32, #tpu.memory_space<vmem>>, vector<1x32xf32>
    %cst_55 = arith.constant dense<0.000000e+00> : vector<10xf32>
    %124 = vector.multi_reduction <add>, %121, %cst_55 [1] : vector<10x32xf32> to vector<10xf32>
    %125 = vector.shape_cast %124 : vector<10xf32> to vector<10x1xf32>
    %cst_56 = arith.constant 3.200000e+01 : f32
    %126 = vector.broadcast %cst_56 : f32 to vector<10x1xf32>
    %127 = arith.divf %125, %126 : vector<10x1xf32>
    %128 = vector.broadcast %127 : vector<10x1xf32> to vector<10x32xf32>
    %129 = arith.subf %121, %128 : vector<10x32xf32>
    %130 = arith.mulf %129, %129 : vector<10x32xf32>
    %cst_57 = arith.constant dense<0.000000e+00> : vector<10xf32>
    %131 = vector.multi_reduction <add>, %130, %cst_57 [1] : vector<10x32xf32> to vector<10xf32>
    %132 = vector.shape_cast %131 : vector<10xf32> to vector<10x1xf32>
    %cst_58 = arith.constant 3.200000e+01 : f32
    %133 = vector.broadcast %cst_58 : f32 to vector<10x1xf32>
    %134 = arith.divf %132, %133 : vector<10x1xf32>
    %135 = vector.broadcast %127 : vector<10x1xf32> to vector<10x32xf32>
    %136 = arith.subf %121, %135 : vector<10x32xf32>
    %cst_59 = arith.constant 9.99999974E-6 : f32
    %137 = vector.broadcast %cst_59 : f32 to vector<10x1xf32>
    %138 = arith.addf %134, %137 : vector<10x1xf32>
    %139 = math.rsqrt %138 : vector<10x1xf32>
    %140 = vector.broadcast %139 : vector<10x1xf32> to vector<10x32xf32>
    %141 = arith.mulf %136, %140 : vector<10x32xf32>
    %142 = vector.broadcast %122 : vector<1x32xf32> to vector<10x32xf32>
    %143 = arith.mulf %141, %142 : vector<10x32xf32>
    %144 = vector.broadcast %123 : vector<1x32xf32> to vector<10x32xf32>
    %145 = arith.addf %143, %144 : vector<10x32xf32>
    %c0_60 = arith.constant 0 : index
    %c0_61 = arith.constant 0 : index
    %146 = vector.load %arg13[%c0_60, %c0_61] : memref<32x128xf32, #tpu.memory_space<vmem>>, vector<32x128xf32>
    %cst_62 = arith.constant dense<0.000000e+00> : vector<10x128xf32>
    %147 = tpu.matmul %145, %146, %cst_62 {dimension_numbers = #tpu.dot_dimension_numbers<[1], [0], [0], [1], [0, 0, 1, 1], [], []>} : vector<10x32xf32>, vector<32x128xf32>, vector<10x128xf32> -> vector<10x128xf32>
    %c0_63 = arith.constant 0 : index
    %c0_64 = arith.constant 0 : index
    %148 = vector.load %arg14[%c0_63, %c0_64] : memref<1x128xf32, #tpu.memory_space<vmem>>, vector<1x128xf32>
    %149 = vector.broadcast %148 : vector<1x128xf32> to vector<10x128xf32>
    %150 = arith.addf %147, %149 : vector<10x128xf32>
    %cst_65 = arith.constant 5.000000e-01 : f32
    %151 = vector.broadcast %cst_65 : f32 to vector<10x128xf32>
    %152 = arith.mulf %151, %150 : vector<10x128xf32>
    %cst_66 = arith.constant 0.707106769 : f32
    %153 = vector.broadcast %cst_66 : f32 to vector<10x128xf32>
    %154 = arith.mulf %150, %153 : vector<10x128xf32>
    %cst_67 = arith.constant 0.000000e+00 : f32
    %155 = vector.broadcast %cst_67 : f32 to vector<10x128xf32>
    %156 = arith.cmpf oge, %154, %155 : vector<10x128xf32>
    %cst_68 = arith.constant 1.000000e+00 : f32
    %cst_69 = arith.constant -1.000000e+00 : f32
    %157 = vector.broadcast %cst_68 : f32 to vector<10x128xf32>
    %158 = vector.broadcast %cst_69 : f32 to vector<10x128xf32>
    %159 = arith.select %156, %157, %158 : vector<10x128xi1>, vector<10x128xf32>
    %160 = math.absf %154 : vector<10x128xf32>
    %cst_70 = arith.constant 0.327591091 : f32
    %161 = vector.broadcast %cst_70 : f32 to vector<10x128xf32>
    %162 = arith.mulf %161, %160 : vector<10x128xf32>
    %cst_71 = arith.constant 1.000000e+00 : f32
    %163 = vector.broadcast %cst_71 : f32 to vector<10x128xf32>
    %164 = arith.addf %163, %162 : vector<10x128xf32>
    %cst_72 = arith.constant 1.000000e+00 : f32
    %165 = vector.broadcast %cst_72 : f32 to vector<10x128xf32>
    %166 = arith.divf %165, %164 : vector<10x128xf32>
    %cst_73 = arith.constant 1.06140542 : f32
    %167 = vector.broadcast %cst_73 : f32 to vector<10x128xf32>
    %168 = arith.mulf %167, %166 : vector<10x128xf32>
    %cst_74 = arith.constant -1.45315206 : f32
    %169 = vector.broadcast %cst_74 : f32 to vector<10x128xf32>
    %170 = arith.addf %168, %169 : vector<10x128xf32>
    %171 = arith.mulf %170, %166 : vector<10x128xf32>
    %cst_75 = arith.constant 1.42141378 : f32
    %172 = vector.broadcast %cst_75 : f32 to vector<10x128xf32>
    %173 = arith.addf %171, %172 : vector<10x128xf32>
    %174 = arith.mulf %173, %166 : vector<10x128xf32>
    %cst_76 = arith.constant -0.284496725 : f32
    %175 = vector.broadcast %cst_76 : f32 to vector<10x128xf32>
    %176 = arith.addf %174, %175 : vector<10x128xf32>
    %177 = arith.mulf %176, %166 : vector<10x128xf32>
    %cst_77 = arith.constant 0.254829586 : f32
    %178 = vector.broadcast %cst_77 : f32 to vector<10x128xf32>
    %179 = arith.addf %177, %178 : vector<10x128xf32>
    %180 = arith.mulf %179, %166 : vector<10x128xf32>
    %cst_78 = arith.constant 0.000000e+00 : f32
    %181 = vector.broadcast %cst_78 : f32 to vector<10x128xf32>
    %182 = arith.subf %181, %160 : vector<10x128xf32>
    %183 = arith.mulf %182, %160 : vector<10x128xf32>
    %184 = math.exp %183 : vector<10x128xf32>
    %185 = arith.mulf %180, %184 : vector<10x128xf32>
    %cst_79 = arith.constant 1.000000e+00 : f32
    %186 = vector.broadcast %cst_79 : f32 to vector<10x128xf32>
    %187 = arith.subf %186, %185 : vector<10x128xf32>
    %188 = arith.mulf %159, %187 : vector<10x128xf32>
    %cst_80 = arith.constant 1.000000e+00 : f32
    %189 = vector.broadcast %cst_80 : f32 to vector<10x128xf32>
    %190 = arith.addf %189, %188 : vector<10x128xf32>
    %191 = arith.mulf %152, %190 : vector<10x128xf32>
    %c0_81 = arith.constant 0 : index
    %c0_82 = arith.constant 0 : index
    %192 = vector.load %arg15[%c0_81, %c0_82] : memref<128x32xf32, #tpu.memory_space<vmem>>, vector<128x32xf32>
    %cst_83 = arith.constant dense<0.000000e+00> : vector<10x32xf32>
    %193 = tpu.matmul %191, %192, %cst_83 {dimension_numbers = #tpu.dot_dimension_numbers<[1], [0], [0], [1], [0, 0, 1, 1], [], []>} : vector<10x128xf32>, vector<128x32xf32>, vector<10x32xf32> -> vector<10x32xf32>
    %194 = arith.addf %121, %193 : vector<10x32xf32>
    %c0_84 = arith.constant 0 : index
    %c0_85 = arith.constant 0 : index
    %195 = vector.load %arg16[%c0_84, %c0_85] : memref<1x32xf32, #tpu.memory_space<vmem>>, vector<1x32xf32>
    %196 = vector.broadcast %195 : vector<1x32xf32> to vector<10x32xf32>
    %197 = arith.addf %194, %196 : vector<10x32xf32>
    %c0_86 = arith.constant 0 : index
    %c0_87 = arith.constant 0 : index
    %198 = vector.load %arg20[%c0_86, %c0_87] : memref<32x32xf32, #tpu.memory_space<vmem>>, vector<32x32xf32>
    %199 = arith.mulf %1, %197 : vector<10x32xf32>
    %200 = arith.addf %0, %199 : vector<10x32xf32>
    %c0_88 = arith.constant 0 : index
    %c0_89 = arith.constant 0 : index
    %201 = vector.load %arg17[%c0_88, %c0_89] : memref<1x32xf32, #tpu.memory_space<vmem>>, vector<1x32xf32>
    %c0_90 = arith.constant 0 : index
    %c0_91 = arith.constant 0 : index
    %202 = vector.load %arg18[%c0_90, %c0_91] : memref<1x32xf32, #tpu.memory_space<vmem>>, vector<1x32xf32>
    %cst_92 = arith.constant dense<0.000000e+00> : vector<10xf32>
    %203 = vector.multi_reduction <add>, %200, %cst_92 [1] : vector<10x32xf32> to vector<10xf32>
    %204 = vector.shape_cast %203 : vector<10xf32> to vector<10x1xf32>
    %cst_93 = arith.constant 3.200000e+01 : f32
    %205 = vector.broadcast %cst_93 : f32 to vector<10x1xf32>
    %206 = arith.divf %204, %205 : vector<10x1xf32>
    %207 = vector.broadcast %206 : vector<10x1xf32> to vector<10x32xf32>
    %208 = arith.subf %200, %207 : vector<10x32xf32>
    %209 = arith.mulf %208, %208 : vector<10x32xf32>
    %cst_94 = arith.constant dense<0.000000e+00> : vector<10xf32>
    %210 = vector.multi_reduction <add>, %209, %cst_94 [1] : vector<10x32xf32> to vector<10xf32>
    %211 = vector.shape_cast %210 : vector<10xf32> to vector<10x1xf32>
    %cst_95 = arith.constant 3.200000e+01 : f32
    %212 = vector.broadcast %cst_95 : f32 to vector<10x1xf32>
    %213 = arith.divf %211, %212 : vector<10x1xf32>
    %214 = vector.broadcast %206 : vector<10x1xf32> to vector<10x32xf32>
    %215 = arith.subf %200, %214 : vector<10x32xf32>
    %cst_96 = arith.constant 9.99999974E-6 : f32
    %216 = vector.broadcast %cst_96 : f32 to vector<10x1xf32>
    %217 = arith.addf %213, %216 : vector<10x1xf32>
    %218 = math.rsqrt %217 : vector<10x1xf32>
    %219 = vector.broadcast %218 : vector<10x1xf32> to vector<10x32xf32>
    %220 = arith.mulf %215, %219 : vector<10x32xf32>
    %221 = vector.broadcast %201 : vector<1x32xf32> to vector<10x32xf32>
    %222 = arith.mulf %220, %221 : vector<10x32xf32>
    %223 = vector.broadcast %202 : vector<1x32xf32> to vector<10x32xf32>
    %224 = arith.addf %222, %223 : vector<10x32xf32>
    %c0_97 = arith.constant 0 : index
    %c0_98 = arith.constant 0 : index
    %225 = vector.load %arg19[%c0_97, %c0_98] : memref<32x96xf32, #tpu.memory_space<vmem>>, vector<32x96xf32>
    %cst_99 = arith.constant dense<0.000000e+00> : vector<10x96xf32>
    %226 = tpu.matmul %224, %225, %cst_99 {dimension_numbers = #tpu.dot_dimension_numbers<[1], [0], [0], [1], [0, 0, 1, 1], [], []>} : vector<10x32xf32>, vector<32x96xf32>, vector<10x96xf32> -> vector<10x96xf32>
    %cst_100 = arith.constant 0.000000e+00 : f32
    %227 = vector.broadcast %cst_100 : f32 to vector<10x32xf32>
    %228 = vector.extract_strided_slice %226 {offsets = [0, 0], sizes = [10, 8], strides = [1, 1]} : vector<10x96xf32> to vector<10x8xf32>
    %cst_101 = arith.constant 0.353553385 : f32
    %229 = vector.broadcast %cst_101 : f32 to vector<10x8xf32>
    %230 = arith.mulf %228, %229 : vector<10x8xf32>
    %231 = vector.extract_strided_slice %226 {offsets = [0, 32], sizes = [10, 8], strides = [1, 1]} : vector<10x96xf32> to vector<10x8xf32>
    %232 = vector.extract_strided_slice %226 {offsets = [0, 64], sizes = [10, 8], strides = [1, 1]} : vector<10x96xf32> to vector<10x8xf32>
    %cst_102 = arith.constant dense<0.000000e+00> : vector<10x10xf32>
    %233 = tpu.matmul %230, %231, %cst_102 {dimension_numbers = #tpu.dot_dimension_numbers<[1], [1], [0], [0], [0, 0, 1, 0], [], []>} : vector<10x8xf32>, vector<10x8xf32>, vector<10x10xf32> -> vector<10x10xf32>
    %cst_103 = arith.constant dense<0xFF800000> : vector<10xf32>
    %234 = vector.multi_reduction <maximumf>, %233, %cst_103 [1] : vector<10x10xf32> to vector<10xf32>
    %235 = vector.shape_cast %234 : vector<10xf32> to vector<10x1xf32>
    %236 = vector.broadcast %235 : vector<10x1xf32> to vector<10x10xf32>
    %237 = arith.subf %233, %236 : vector<10x10xf32>
    %238 = math.exp %237 : vector<10x10xf32>
    %cst_104 = arith.constant dense<0.000000e+00> : vector<10xf32>
    %239 = vector.multi_reduction <add>, %238, %cst_104 [1] : vector<10x10xf32> to vector<10xf32>
    %240 = vector.shape_cast %239 : vector<10xf32> to vector<10x1xf32>
    %241 = tpu.reciprocal %240 {approx = true} : vector<10x1xf32> -> vector<10x1xf32>
    %242 = vector.broadcast %241 : vector<10x1xf32> to vector<10x10xf32>
    %243 = arith.mulf %238, %242 : vector<10x10xf32>
    %cst_105 = arith.constant dense<0.000000e+00> : vector<10x8xf32>
    %244 = tpu.matmul %243, %232, %cst_105 {dimension_numbers = #tpu.dot_dimension_numbers<[1], [0], [0], [1], [0, 0, 1, 1], [], []>} : vector<10x10xf32>, vector<10x8xf32>, vector<10x8xf32> -> vector<10x8xf32>
    %245 = vector.extract_strided_slice %198 {offsets = [0, 0], sizes = [8, 32], strides = [1, 1]} : vector<32x32xf32> to vector<8x32xf32>
    %cst_106 = arith.constant dense<0.000000e+00> : vector<10x32xf32>
    %246 = tpu.matmul %244, %245, %cst_106 {dimension_numbers = #tpu.dot_dimension_numbers<[1], [0], [0], [1], [0, 0, 1, 1], [], []>} : vector<10x8xf32>, vector<8x32xf32>, vector<10x32xf32> -> vector<10x32xf32>
    %247 = arith.addf %227, %246 : vector<10x32xf32>
    %248 = vector.extract_strided_slice %226 {offsets = [0, 8], sizes = [10, 8], strides = [1, 1]} : vector<10x96xf32> to vector<10x8xf32>
    %cst_107 = arith.constant 0.353553385 : f32
    %249 = vector.broadcast %cst_107 : f32 to vector<10x8xf32>
    %250 = arith.mulf %248, %249 : vector<10x8xf32>
    %251 = vector.extract_strided_slice %226 {offsets = [0, 40], sizes = [10, 8], strides = [1, 1]} : vector<10x96xf32> to vector<10x8xf32>
    %252 = vector.extract_strided_slice %226 {offsets = [0, 72], sizes = [10, 8], strides = [1, 1]} : vector<10x96xf32> to vector<10x8xf32>
    %cst_108 = arith.constant dense<0.000000e+00> : vector<10x10xf32>
    %253 = tpu.matmul %250, %251, %cst_108 {dimension_numbers = #tpu.dot_dimension_numbers<[1], [1], [0], [0], [0, 0, 1, 0], [], []>} : vector<10x8xf32>, vector<10x8xf32>, vector<10x10xf32> -> vector<10x10xf32>
    %cst_109 = arith.constant dense<0xFF800000> : vector<10xf32>
    %254 = vector.multi_reduction <maximumf>, %253, %cst_109 [1] : vector<10x10xf32> to vector<10xf32>
    %255 = vector.shape_cast %254 : vector<10xf32> to vector<10x1xf32>
    %256 = vector.broadcast %255 : vector<10x1xf32> to vector<10x10xf32>
    %257 = arith.subf %253, %256 : vector<10x10xf32>
    %258 = math.exp %257 : vector<10x10xf32>
    %cst_110 = arith.constant dense<0.000000e+00> : vector<10xf32>
    %259 = vector.multi_reduction <add>, %258, %cst_110 [1] : vector<10x10xf32> to vector<10xf32>
    %260 = vector.shape_cast %259 : vector<10xf32> to vector<10x1xf32>
    %261 = tpu.reciprocal %260 {approx = true} : vector<10x1xf32> -> vector<10x1xf32>
    %262 = vector.broadcast %261 : vector<10x1xf32> to vector<10x10xf32>
    %263 = arith.mulf %258, %262 : vector<10x10xf32>
    %cst_111 = arith.constant dense<0.000000e+00> : vector<10x8xf32>
    %264 = tpu.matmul %263, %252, %cst_111 {dimension_numbers = #tpu.dot_dimension_numbers<[1], [0], [0], [1], [0, 0, 1, 1], [], []>} : vector<10x10xf32>, vector<10x8xf32>, vector<10x8xf32> -> vector<10x8xf32>
    %265 = vector.extract_strided_slice %198 {offsets = [8, 0], sizes = [8, 32], strides = [1, 1]} : vector<32x32xf32> to vector<8x32xf32>
    %cst_112 = arith.constant dense<0.000000e+00> : vector<10x32xf32>
    %266 = tpu.matmul %264, %265, %cst_112 {dimension_numbers = #tpu.dot_dimension_numbers<[1], [0], [0], [1], [0, 0, 1, 1], [], []>} : vector<10x8xf32>, vector<8x32xf32>, vector<10x32xf32> -> vector<10x32xf32>
    %267 = arith.addf %247, %266 : vector<10x32xf32>
    %268 = vector.extract_strided_slice %226 {offsets = [0, 16], sizes = [10, 8], strides = [1, 1]} : vector<10x96xf32> to vector<10x8xf32>
    %cst_113 = arith.constant 0.353553385 : f32
    %269 = vector.broadcast %cst_113 : f32 to vector<10x8xf32>
    %270 = arith.mulf %268, %269 : vector<10x8xf32>
    %271 = vector.extract_strided_slice %226 {offsets = [0, 48], sizes = [10, 8], strides = [1, 1]} : vector<10x96xf32> to vector<10x8xf32>
    %272 = vector.extract_strided_slice %226 {offsets = [0, 80], sizes = [10, 8], strides = [1, 1]} : vector<10x96xf32> to vector<10x8xf32>
    %cst_114 = arith.constant dense<0.000000e+00> : vector<10x10xf32>
    %273 = tpu.matmul %270, %271, %cst_114 {dimension_numbers = #tpu.dot_dimension_numbers<[1], [1], [0], [0], [0, 0, 1, 0], [], []>} : vector<10x8xf32>, vector<10x8xf32>, vector<10x10xf32> -> vector<10x10xf32>
    %cst_115 = arith.constant dense<0xFF800000> : vector<10xf32>
    %274 = vector.multi_reduction <maximumf>, %273, %cst_115 [1] : vector<10x10xf32> to vector<10xf32>
    %275 = vector.shape_cast %274 : vector<10xf32> to vector<10x1xf32>
    %276 = vector.broadcast %275 : vector<10x1xf32> to vector<10x10xf32>
    %277 = arith.subf %273, %276 : vector<10x10xf32>
    %278 = math.exp %277 : vector<10x10xf32>
    %cst_116 = arith.constant dense<0.000000e+00> : vector<10xf32>
    %279 = vector.multi_reduction <add>, %278, %cst_116 [1] : vector<10x10xf32> to vector<10xf32>
    %280 = vector.shape_cast %279 : vector<10xf32> to vector<10x1xf32>
    %281 = tpu.reciprocal %280 {approx = true} : vector<10x1xf32> -> vector<10x1xf32>
    %282 = vector.broadcast %281 : vector<10x1xf32> to vector<10x10xf32>
    %283 = arith.mulf %278, %282 : vector<10x10xf32>
    %cst_117 = arith.constant dense<0.000000e+00> : vector<10x8xf32>
    %284 = tpu.matmul %283, %272, %cst_117 {dimension_numbers = #tpu.dot_dimension_numbers<[1], [0], [0], [1], [0, 0, 1, 1], [], []>} : vector<10x10xf32>, vector<10x8xf32>, vector<10x8xf32> -> vector<10x8xf32>
    %285 = vector.extract_strided_slice %198 {offsets = [16, 0], sizes = [8, 32], strides = [1, 1]} : vector<32x32xf32> to vector<8x32xf32>
    %cst_118 = arith.constant dense<0.000000e+00> : vector<10x32xf32>
    %286 = tpu.matmul %284, %285, %cst_118 {dimension_numbers = #tpu.dot_dimension_numbers<[1], [0], [0], [1], [0, 0, 1, 1], [], []>} : vector<10x8xf32>, vector<8x32xf32>, vector<10x32xf32> -> vector<10x32xf32>
    %287 = arith.addf %267, %286 : vector<10x32xf32>
    %288 = vector.extract_strided_slice %226 {offsets = [0, 24], sizes = [10, 8], strides = [1, 1]} : vector<10x96xf32> to vector<10x8xf32>
    %cst_119 = arith.constant 0.353553385 : f32
    %289 = vector.broadcast %cst_119 : f32 to vector<10x8xf32>
    %290 = arith.mulf %288, %289 : vector<10x8xf32>
    %291 = vector.extract_strided_slice %226 {offsets = [0, 56], sizes = [10, 8], strides = [1, 1]} : vector<10x96xf32> to vector<10x8xf32>
    %292 = vector.extract_strided_slice %226 {offsets = [0, 88], sizes = [10, 8], strides = [1, 1]} : vector<10x96xf32> to vector<10x8xf32>
    %cst_120 = arith.constant dense<0.000000e+00> : vector<10x10xf32>
    %293 = tpu.matmul %290, %291, %cst_120 {dimension_numbers = #tpu.dot_dimension_numbers<[1], [1], [0], [0], [0, 0, 1, 0], [], []>} : vector<10x8xf32>, vector<10x8xf32>, vector<10x10xf32> -> vector<10x10xf32>
    %cst_121 = arith.constant dense<0xFF800000> : vector<10xf32>
    %294 = vector.multi_reduction <maximumf>, %293, %cst_121 [1] : vector<10x10xf32> to vector<10xf32>
    %295 = vector.shape_cast %294 : vector<10xf32> to vector<10x1xf32>
    %296 = vector.broadcast %295 : vector<10x1xf32> to vector<10x10xf32>
    %297 = arith.subf %293, %296 : vector<10x10xf32>
    %298 = math.exp %297 : vector<10x10xf32>
    %cst_122 = arith.constant dense<0.000000e+00> : vector<10xf32>
    %299 = vector.multi_reduction <add>, %298, %cst_122 [1] : vector<10x10xf32> to vector<10xf32>
    %300 = vector.shape_cast %299 : vector<10xf32> to vector<10x1xf32>
    %301 = tpu.reciprocal %300 {approx = true} : vector<10x1xf32> -> vector<10x1xf32>
    %302 = vector.broadcast %301 : vector<10x1xf32> to vector<10x10xf32>
    %303 = arith.mulf %298, %302 : vector<10x10xf32>
    %cst_123 = arith.constant dense<0.000000e+00> : vector<10x8xf32>
    %304 = tpu.matmul %303, %292, %cst_123 {dimension_numbers = #tpu.dot_dimension_numbers<[1], [0], [0], [1], [0, 0, 1, 1], [], []>} : vector<10x10xf32>, vector<10x8xf32>, vector<10x8xf32> -> vector<10x8xf32>
    %305 = vector.extract_strided_slice %198 {offsets = [24, 0], sizes = [8, 32], strides = [1, 1]} : vector<32x32xf32> to vector<8x32xf32>
    %cst_124 = arith.constant dense<0.000000e+00> : vector<10x32xf32>
    %306 = tpu.matmul %304, %305, %cst_124 {dimension_numbers = #tpu.dot_dimension_numbers<[1], [0], [0], [1], [0, 0, 1, 1], [], []>} : vector<10x8xf32>, vector<8x32xf32>, vector<10x32xf32> -> vector<10x32xf32>
    %307 = arith.addf %287, %306 : vector<10x32xf32>
    %308 = arith.addf %200, %307 : vector<10x32xf32>
    %c0_125 = arith.constant 0 : index
    %c0_126 = arith.constant 0 : index
    %309 = vector.load %arg21[%c0_125, %c0_126] : memref<1x32xf32, #tpu.memory_space<vmem>>, vector<1x32xf32>
    %310 = vector.broadcast %309 : vector<1x32xf32> to vector<10x32xf32>
    %311 = arith.addf %308, %310 : vector<10x32xf32>
    %c0_127 = arith.constant 0 : index
    %c0_128 = arith.constant 0 : index
    %312 = vector.load %arg22[%c0_127, %c0_128] : memref<1x32xf32, #tpu.memory_space<vmem>>, vector<1x32xf32>
    %c0_129 = arith.constant 0 : index
    %c0_130 = arith.constant 0 : index
    %313 = vector.load %arg23[%c0_129, %c0_130] : memref<1x32xf32, #tpu.memory_space<vmem>>, vector<1x32xf32>
    %cst_131 = arith.constant dense<0.000000e+00> : vector<10xf32>
    %314 = vector.multi_reduction <add>, %311, %cst_131 [1] : vector<10x32xf32> to vector<10xf32>
    %315 = vector.shape_cast %314 : vector<10xf32> to vector<10x1xf32>
    %cst_132 = arith.constant 3.200000e+01 : f32
    %316 = vector.broadcast %cst_132 : f32 to vector<10x1xf32>
    %317 = arith.divf %315, %316 : vector<10x1xf32>
    %318 = vector.broadcast %317 : vector<10x1xf32> to vector<10x32xf32>
    %319 = arith.subf %311, %318 : vector<10x32xf32>
    %320 = arith.mulf %319, %319 : vector<10x32xf32>
    %cst_133 = arith.constant dense<0.000000e+00> : vector<10xf32>
    %321 = vector.multi_reduction <add>, %320, %cst_133 [1] : vector<10x32xf32> to vector<10xf32>
    %322 = vector.shape_cast %321 : vector<10xf32> to vector<10x1xf32>
    %cst_134 = arith.constant 3.200000e+01 : f32
    %323 = vector.broadcast %cst_134 : f32 to vector<10x1xf32>
    %324 = arith.divf %322, %323 : vector<10x1xf32>
    %325 = vector.broadcast %317 : vector<10x1xf32> to vector<10x32xf32>
    %326 = arith.subf %311, %325 : vector<10x32xf32>
    %cst_135 = arith.constant 9.99999974E-6 : f32
    %327 = vector.broadcast %cst_135 : f32 to vector<10x1xf32>
    %328 = arith.addf %324, %327 : vector<10x1xf32>
    %329 = math.rsqrt %328 : vector<10x1xf32>
    %330 = vector.broadcast %329 : vector<10x1xf32> to vector<10x32xf32>
    %331 = arith.mulf %326, %330 : vector<10x32xf32>
    %332 = vector.broadcast %312 : vector<1x32xf32> to vector<10x32xf32>
    %333 = arith.mulf %331, %332 : vector<10x32xf32>
    %334 = vector.broadcast %313 : vector<1x32xf32> to vector<10x32xf32>
    %335 = arith.addf %333, %334 : vector<10x32xf32>
    %c0_136 = arith.constant 0 : index
    %c0_137 = arith.constant 0 : index
    %336 = vector.load %arg24[%c0_136, %c0_137] : memref<32x128xf32, #tpu.memory_space<vmem>>, vector<32x128xf32>
    %cst_138 = arith.constant dense<0.000000e+00> : vector<10x128xf32>
    %337 = tpu.matmul %335, %336, %cst_138 {dimension_numbers = #tpu.dot_dimension_numbers<[1], [0], [0], [1], [0, 0, 1, 1], [], []>} : vector<10x32xf32>, vector<32x128xf32>, vector<10x128xf32> -> vector<10x128xf32>
    %c0_139 = arith.constant 0 : index
    %c0_140 = arith.constant 0 : index
    %338 = vector.load %arg25[%c0_139, %c0_140] : memref<1x128xf32, #tpu.memory_space<vmem>>, vector<1x128xf32>
    %339 = vector.broadcast %338 : vector<1x128xf32> to vector<10x128xf32>
    %340 = arith.addf %337, %339 : vector<10x128xf32>
    %cst_141 = arith.constant 5.000000e-01 : f32
    %341 = vector.broadcast %cst_141 : f32 to vector<10x128xf32>
    %342 = arith.mulf %341, %340 : vector<10x128xf32>
    %cst_142 = arith.constant 0.707106769 : f32
    %343 = vector.broadcast %cst_142 : f32 to vector<10x128xf32>
    %344 = arith.mulf %340, %343 : vector<10x128xf32>
    %cst_143 = arith.constant 0.000000e+00 : f32
    %345 = vector.broadcast %cst_143 : f32 to vector<10x128xf32>
    %346 = arith.cmpf oge, %344, %345 : vector<10x128xf32>
    %cst_144 = arith.constant 1.000000e+00 : f32
    %cst_145 = arith.constant -1.000000e+00 : f32
    %347 = vector.broadcast %cst_144 : f32 to vector<10x128xf32>
    %348 = vector.broadcast %cst_145 : f32 to vector<10x128xf32>
    %349 = arith.select %346, %347, %348 : vector<10x128xi1>, vector<10x128xf32>
    %350 = math.absf %344 : vector<10x128xf32>
    %cst_146 = arith.constant 0.327591091 : f32
    %351 = vector.broadcast %cst_146 : f32 to vector<10x128xf32>
    %352 = arith.mulf %351, %350 : vector<10x128xf32>
    %cst_147 = arith.constant 1.000000e+00 : f32
    %353 = vector.broadcast %cst_147 : f32 to vector<10x128xf32>
    %354 = arith.addf %353, %352 : vector<10x128xf32>
    %cst_148 = arith.constant 1.000000e+00 : f32
    %355 = vector.broadcast %cst_148 : f32 to vector<10x128xf32>
    %356 = arith.divf %355, %354 : vector<10x128xf32>
    %cst_149 = arith.constant 1.06140542 : f32
    %357 = vector.broadcast %cst_149 : f32 to vector<10x128xf32>
    %358 = arith.mulf %357, %356 : vector<10x128xf32>
    %cst_150 = arith.constant -1.45315206 : f32
    %359 = vector.broadcast %cst_150 : f32 to vector<10x128xf32>
    %360 = arith.addf %358, %359 : vector<10x128xf32>
    %361 = arith.mulf %360, %356 : vector<10x128xf32>
    %cst_151 = arith.constant 1.42141378 : f32
    %362 = vector.broadcast %cst_151 : f32 to vector<10x128xf32>
    %363 = arith.addf %361, %362 : vector<10x128xf32>
    %364 = arith.mulf %363, %356 : vector<10x128xf32>
    %cst_152 = arith.constant -0.284496725 : f32
    %365 = vector.broadcast %cst_152 : f32 to vector<10x128xf32>
    %366 = arith.addf %364, %365 : vector<10x128xf32>
    %367 = arith.mulf %366, %356 : vector<10x128xf32>
    %cst_153 = arith.constant 0.254829586 : f32
    %368 = vector.broadcast %cst_153 : f32 to vector<10x128xf32>
    %369 = arith.addf %367, %368 : vector<10x128xf32>
    %370 = arith.mulf %369, %356 : vector<10x128xf32>
    %cst_154 = arith.constant 0.000000e+00 : f32
    %371 = vector.broadcast %cst_154 : f32 to vector<10x128xf32>
    %372 = arith.subf %371, %350 : vector<10x128xf32>
    %373 = arith.mulf %372, %350 : vector<10x128xf32>
    %374 = math.exp %373 : vector<10x128xf32>
    %375 = arith.mulf %370, %374 : vector<10x128xf32>
    %cst_155 = arith.constant 1.000000e+00 : f32
    %376 = vector.broadcast %cst_155 : f32 to vector<10x128xf32>
    %377 = arith.subf %376, %375 : vector<10x128xf32>
    %378 = arith.mulf %349, %377 : vector<10x128xf32>
    %cst_156 = arith.constant 1.000000e+00 : f32
    %379 = vector.broadcast %cst_156 : f32 to vector<10x128xf32>
    %380 = arith.addf %379, %378 : vector<10x128xf32>
    %381 = arith.mulf %342, %380 : vector<10x128xf32>
    %c0_157 = arith.constant 0 : index
    %c0_158 = arith.constant 0 : index
    %382 = vector.load %arg26[%c0_157, %c0_158] : memref<128x32xf32, #tpu.memory_space<vmem>>, vector<128x32xf32>
    %cst_159 = arith.constant dense<0.000000e+00> : vector<10x32xf32>
    %383 = tpu.matmul %381, %382, %cst_159 {dimension_numbers = #tpu.dot_dimension_numbers<[1], [0], [0], [1], [0, 0, 1, 1], [], []>} : vector<10x128xf32>, vector<128x32xf32>, vector<10x32xf32> -> vector<10x32xf32>
    %384 = arith.addf %311, %383 : vector<10x32xf32>
    %c0_160 = arith.constant 0 : index
    %c0_161 = arith.constant 0 : index
    %385 = vector.load %arg27[%c0_160, %c0_161] : memref<1x32xf32, #tpu.memory_space<vmem>>, vector<1x32xf32>
    %386 = vector.broadcast %385 : vector<1x32xf32> to vector<10x32xf32>
    %387 = arith.addf %384, %386 : vector<10x32xf32>
    %388 = arith.mulf %1, %387 : vector<10x32xf32>
    %cst_162 = arith.constant dense<0.000000e+00> : vector<32xf32>
    %389 = vector.multi_reduction <add>, %388, %cst_162 [0] : vector<10x32xf32> to vector<32xf32>
    %390 = vector.shape_cast %389 : vector<32xf32> to vector<1x32xf32>
    %cst_163 = arith.constant 1.250000e-01 : f32
    %391 = vector.broadcast %cst_163 : f32 to vector<1x32xf32>
    %392 = arith.mulf %390, %391 : vector<1x32xf32>
    %c0_164 = arith.constant 0 : index
    %c0_165 = arith.constant 0 : index
    %393 = vector.load %arg28[%c0_164, %c0_165] : memref<1x32xf32, #tpu.memory_space<vmem>>, vector<1x32xf32>
    %c0_166 = arith.constant 0 : index
    %c0_167 = arith.constant 0 : index
    %394 = vector.load %arg29[%c0_166, %c0_167] : memref<1x32xf32, #tpu.memory_space<vmem>>, vector<1x32xf32>
    %cst_168 = arith.constant dense<0.000000e+00> : vector<1xf32>
    %395 = vector.multi_reduction <add>, %392, %cst_168 [1] : vector<1x32xf32> to vector<1xf32>
    %396 = vector.shape_cast %395 : vector<1xf32> to vector<1x1xf32>
    %cst_169 = arith.constant 3.200000e+01 : f32
    %397 = vector.broadcast %cst_169 : f32 to vector<1x1xf32>
    %398 = arith.divf %396, %397 : vector<1x1xf32>
    %399 = vector.broadcast %398 : vector<1x1xf32> to vector<1x32xf32>
    %400 = arith.subf %392, %399 : vector<1x32xf32>
    %401 = arith.mulf %400, %400 : vector<1x32xf32>
    %cst_170 = arith.constant dense<0.000000e+00> : vector<1xf32>
    %402 = vector.multi_reduction <add>, %401, %cst_170 [1] : vector<1x32xf32> to vector<1xf32>
    %403 = vector.shape_cast %402 : vector<1xf32> to vector<1x1xf32>
    %cst_171 = arith.constant 3.200000e+01 : f32
    %404 = vector.broadcast %cst_171 : f32 to vector<1x1xf32>
    %405 = arith.divf %403, %404 : vector<1x1xf32>
    %406 = vector.broadcast %398 : vector<1x1xf32> to vector<1x32xf32>
    %407 = arith.subf %392, %406 : vector<1x32xf32>
    %cst_172 = arith.constant 9.99999974E-6 : f32
    %408 = vector.broadcast %cst_172 : f32 to vector<1x1xf32>
    %409 = arith.addf %405, %408 : vector<1x1xf32>
    %410 = math.rsqrt %409 : vector<1x1xf32>
    %411 = vector.broadcast %410 : vector<1x1xf32> to vector<1x32xf32>
    %412 = arith.mulf %407, %411 : vector<1x32xf32>
    %413 = arith.mulf %412, %393 : vector<1x32xf32>
    %414 = arith.addf %413, %394 : vector<1x32xf32>
    %c0_173 = arith.constant 0 : index
    %c0_174 = arith.constant 0 : index
    %415 = vector.load %arg30[%c0_173, %c0_174] : memref<32x128xf32, #tpu.memory_space<vmem>>, vector<32x128xf32>
    %cst_175 = arith.constant dense<0.000000e+00> : vector<1x128xf32>
    %416 = tpu.matmul %414, %415, %cst_175 {dimension_numbers = #tpu.dot_dimension_numbers<[1], [0], [0], [1], [0, 0, 1, 1], [], []>} : vector<1x32xf32>, vector<32x128xf32>, vector<1x128xf32> -> vector<1x128xf32>
    %c0_176 = arith.constant 0 : index
    %c0_177 = arith.constant 0 : index
    %417 = vector.load %arg31[%c0_176, %c0_177] : memref<1x128xf32, #tpu.memory_space<vmem>>, vector<1x128xf32>
    %418 = arith.addf %416, %417 : vector<1x128xf32>
    %c0_178 = arith.constant 0 : index
    %c0_179 = arith.constant 0 : index
    %c0_180 = arith.constant 0 : index
    %419 = vector.load %arg32[%c0_178, %c0_179, %c0_180] : memref<1x1x128xf32, #tpu.memory_space<vmem>>, vector<1x1x128xf32>
    %420 = vector.shape_cast %419 : vector<1x1x128xf32> to vector<1x128xf32>
    %421 = vector.shape_cast %418 : vector<1x128xf32> to vector<1x1x128xf32>
    tpu.vector_store %arg32[%c0_178, %c0_179, %c0_180], %421 {strides = array<i32>} : memref<1x1x128xf32, #tpu.memory_space<vmem>>, vector<1x1x128xf32>,
    return
  }
  func.func @transform_0(%arg0: i32) -> (i32, i32, i32) {
    %c0_i32 = arith.constant 0 : i32
    %c0_i32_0 = arith.constant 0 : i32
    %c0_i32_1 = arith.constant 0 : i32
    return %arg0, %c0_i32, %c0_i32_0 : i32, i32, i32
  }
  func.func @transform_1(%arg0: i32) -> (i32, i32) {
    %c0_i32 = arith.constant 0 : i32
    %c0_i32_0 = arith.constant 0 : i32
    %c0_i32_1 = arith.constant 0 : i32
    return %c0_i32, %c0_i32_0 : i32, i32
  }
  func.func @transform_2(%arg0: i32) -> (i32, i32) {
    %c0_i32 = arith.constant 0 : i32
    %c0_i32_0 = arith.constant 0 : i32
    %c0_i32_1 = arith.constant 0 : i32
    return %c0_i32, %c0_i32_0 : i32, i32
  }
  func.func @transform_3(%arg0: i32) -> (i32, i32) {
    %c0_i32 = arith.constant 0 : i32
    %c0_i32_0 = arith.constant 0 : i32
    %c0_i32_1 = arith.constant 0 : i32
    return %c0_i32, %c0_i32_0 : i32, i32
  }
  func.func @transform_4(%arg0: i32) -> (i32, i32) {
    %c0_i32 = arith.constant 0 : i32
    %c0_i32_0 = arith.constant 0 : i32
    %c0_i32_1 = arith.constant 0 : i32
    return %c0_i32, %c0_i32_0 : i32, i32
  }
  func.func @transform_5(%arg0: i32) -> (i32, i32) {
    %c0_i32 = arith.constant 0 : i32
    %c0_i32_0 = arith.constant 0 : i32
    %c0_i32_1 = arith.constant 0 : i32
    return %c0_i32, %c0_i32_0 : i32, i32
  }
  func.func @transform_6(%arg0: i32) -> (i32, i32) {
    %c0_i32 = arith.constant 0 : i32
    %c0_i32_0 = arith.constant 0 : i32
    %c0_i32_1 = arith.constant 0 : i32
    return %c0_i32, %c0_i32_0 : i32, i32
  }
  func.func @transform_7(%arg0: i32) -> (i32, i32) {
    %c0_i32 = arith.constant 0 : i32
    %c0_i32_0 = arith.constant 0 : i32
    %c0_i32_1 = arith.constant 0 : i32
    return %c0_i32, %c0_i32_0 : i32, i32
  }
  func.func @transform_8(%arg0: i32) -> (i32, i32) {
    %c0_i32 = arith.constant 0 : i32
    %c0_i32_0 = arith.constant 0 : i32
    %c0_i32_1 = arith.constant 0 : i32
    return %c0_i32, %c0_i32_0 : i32, i32
  }
  func.func @transform_9(%arg0: i32) -> (i32, i32) {
    %c0_i32 = arith.constant 0 : i32
    %c0_i32_0 = arith.constant 0 : i32
    %c0_i32_1 = arith.constant 0 : i32
    return %c0_i32, %c0_i32_0 : i32, i32
  }
  func.func @transform_10(%arg0: i32) -> (i32, i32) {
    %c0_i32 = arith.constant 0 : i32
    %c0_i32_0 = arith.constant 0 : i32
    %c0_i32_1 = arith.constant 0 : i32
    return %c0_i32, %c0_i32_0 : i32, i32
  }
  func.func @transform_11(%arg0: i32) -> (i32, i32) {
    %c0_i32 = arith.constant 0 : i32
    %c0_i32_0 = arith.constant 0 : i32
    %c0_i32_1 = arith.constant 0 : i32
    return %c0_i32, %c0_i32_0 : i32, i32
  }
  func.func @transform_12(%arg0: i32) -> (i32, i32) {
    %c0_i32 = arith.constant 0 : i32
    %c0_i32_0 = arith.constant 0 : i32
    %c0_i32_1 = arith.constant 0 : i32
    return %c0_i32, %c0_i32_0 : i32, i32
  }
  func.func @transform_13(%arg0: i32) -> (i32, i32) {
    %c0_i32 = arith.constant 0 : i32
    %c0_i32_0 = arith.constant 0 : i32
    %c0_i32_1 = arith.constant 0 : i32
    return %c0_i32, %c0_i32_0 : i32, i32
  }
  func.func @transform_14(%arg0: i32) -> (i32, i32) {
    %c0_i32 = arith.constant 0 : i32
    %c0_i32_0 = arith.constant 0 : i32
    %c0_i32_1 = arith.constant 0 : i32
    return %c0_i32, %c0_i32_0 : i32, i32
  }
  func.func @transform_15(%arg0: i32) -> (i32, i32) {
    %c0_i32 = arith.constant 0 : i32
    %c0_i32_0 = arith.constant 0 : i32
    %c0_i32_1 = arith.constant 0 : i32
    return %c0_i32, %c0_i32_0 : i32, i32
  }
  func.func @transform_16(%arg0: i32) -> (i32, i32) {
    %c0_i32 = arith.constant 0 : i32
    %c0_i32_0 = arith.constant 0 : i32
    %c0_i32_1 = arith.constant 0 : i32
    return %c0_i32, %c0_i32_0 : i32, i32
  }
  func.func @transform_17(%arg0: i32) -> (i32, i32) {
    %c0_i32 = arith.constant 0 : i32
    %c0_i32_0 = arith.constant 0 : i32
    %c0_i32_1 = arith.constant 0 : i32
    return %c0_i32, %c0_i32_0 : i32, i32
  }
  func.func @transform_18(%arg0: i32) -> (i32, i32) {
    %c0_i32 = arith.constant 0 : i32
    %c0_i32_0 = arith.constant 0 : i32
    %c0_i32_1 = arith.constant 0 : i32
    return %c0_i32, %c0_i32_0 : i32, i32
  }
  func.func @transform_19(%arg0: i32) -> (i32, i32) {
    %c0_i32 = arith.constant 0 : i32
    %c0_i32_0 = arith.constant 0 : i32
    %c0_i32_1 = arith.constant 0 : i32
    return %c0_i32, %c0_i32_0 : i32, i32
  }
  func.func @transform_20(%arg0: i32) -> (i32, i32) {
    %c0_i32 = arith.constant 0 : i32
    %c0_i32_0 = arith.constant 0 : i32
    %c0_i32_1 = arith.constant 0 : i32
    return %c0_i32, %c0_i32_0 : i32, i32
  }
  func.func @transform_21(%arg0: i32) -> (i32, i32) {
    %c0_i32 = arith.constant 0 : i32
    %c0_i32_0 = arith.constant 0 : i32
    %c0_i32_1 = arith.constant 0 : i32
    return %c0_i32, %c0_i32_0 : i32, i32
  }
  func.func @transform_22(%arg0: i32) -> (i32, i32) {
    %c0_i32 = arith.constant 0 : i32
    %c0_i32_0 = arith.constant 0 : i32
    %c0_i32_1 = arith.constant 0 : i32
    return %c0_i32, %c0_i32_0 : i32, i32
  }
  func.func @transform_23(%arg0: i32) -> (i32, i32) {
    %c0_i32 = arith.constant 0 : i32
    %c0_i32_0 = arith.constant 0 : i32
    %c0_i32_1 = arith.constant 0 : i32
    return %c0_i32, %c0_i32_0 : i32, i32
  }
  func.func @transform_24(%arg0: i32) -> (i32, i32) {
    %c0_i32 = arith.constant 0 : i32
    %c0_i32_0 = arith.constant 0 : i32
    %c0_i32_1 = arith.constant 0 : i32
    return %c0_i32, %c0_i32_0 : i32, i32
  }
  func.func @transform_25(%arg0: i32) -> (i32, i32) {
    %c0_i32 = arith.constant 0 : i32
    %c0_i32_0 = arith.constant 0 : i32
    %c0_i32_1 = arith.constant 0 : i32
    return %c0_i32, %c0_i32_0 : i32, i32
  }
  func.func @transform_26(%arg0: i32) -> (i32, i32) {
    %c0_i32 = arith.constant 0 : i32
    %c0_i32_0 = arith.constant 0 : i32
    %c0_i32_1 = arith.constant 0 : i32
    return %c0_i32, %c0_i32_0 : i32, i32
  }
  func.func @transform_27(%arg0: i32) -> (i32, i32) {
    %c0_i32 = arith.constant 0 : i32
    %c0_i32_0 = arith.constant 0 : i32
    %c0_i32_1 = arith.constant 0 : i32
    return %c0_i32, %c0_i32_0 : i32, i32
  }
  func.func @transform_28(%arg0: i32) -> (i32, i32) {
    %c0_i32 = arith.constant 0 : i32
    %c0_i32_0 = arith.constant 0 : i32
    %c0_i32_1 = arith.constant 0 : i32
    return %c0_i32, %c0_i32_0 : i32, i32
  }
  func.func @transform_29(%arg0: i32) -> (i32, i32) {
    %c0_i32 = arith.constant 0 : i32
    %c0_i32_0 = arith.constant 0 : i32
    %c0_i32_1 = arith.constant 0 : i32
    return %c0_i32, %c0_i32_0 : i32, i32
  }
  func.func @transform_30(%arg0: i32) -> (i32, i32) {
    %c0_i32 = arith.constant 0 : i32
    %c0_i32_0 = arith.constant 0 : i32
    %c0_i32_1 = arith.constant 0 : i32
    return %c0_i32, %c0_i32_0 : i32, i32
  }
  func.func @transform_31(%arg0: i32) -> (i32, i32, i32) {
    %c0_i32 = arith.constant 0 : i32
    %c0_i32_0 = arith.constant 0 : i32
    %c0_i32_1 = arith.constant 0 : i32
    return %arg0, %c0_i32, %c0_i32_0 : i32, i32, i32
  }
}

</mosaic_0001>

<bundles_post_ra>
// kernel: vision_transformer_forward.1
= control target key start
LH: loop header
LB: loop body
LE: loop exit
PB: predicated region body
PF: predicated region fallthrough
CT: control target
= control target key end

     0   :  { %s5757_s6 = smov 1   ;;  %s5758_s10 = smov 2   ;;  %s6539_s0 = inlined_call_operand.smem [shape: u32[32], index: -1, kind: input, shape index: {}] }
   0x1   :  { %s5813_s5 = sld [smem:[%s6539_s0]]   ;;  %s5759_s14 = smov 3  }
   0x2   :  { %s5818_s9 = sld [smem:[%s6539_s0 + %s5757_s6]]   ;;  %s5760_s18 = smov 4  }
   0x3   :  { %s5823_s13 = sld [smem:[%s6539_s0 + %s5758_s10]]   ;;  %s5761_s22 = smov 5  }
   0x4   :  { %s5828_s17 = sld [smem:[%s6539_s0 + %s5759_s14]]   ;;  %s5762_s26 = smov 6  }
   0x5   :  { %s5833_s21 = sld [smem:[%s6539_s0 + %s5760_s18]]   ;;  %s5763_s30 = smov 7  }
   0x6   :  { %s5838_s25 = sld [smem:[%s6539_s0 + %s5761_s22]]   ;;  %s5764_s4 = smov 8  }
   0x7   :  { %6564 = sst [smem:[#allocation5_spill]] %s5813_s5  ;;  %s5765_s10 = smov 9  }
   0x8   :  { %6565 = sst [smem:[#allocation6_spill]] %s5818_s9  ;;  %s5766_s15 = smov 10  }
   0x9   :  { %s5843_s29 = sld [smem:[%s6539_s0 + %s5762_s26]]   ;;  %s5767_s20 = smov 11  }
   0xa   :  { %s5848_s3 = sld [smem:[%s6539_s0 + %s5763_s30]]   ;;  %s5768_s26 = smov 12  }
   0xb   :  { %s5853_s8 = sld [smem:[%s6539_s0 + %s5764_s4]]   ;;  %s5769_s1 = smov 13  }
   0xc   :  { %s5858_s14 = sld [smem:[%s6539_s0 + %s5765_s10]]   ;;  %s5770_s7 = smov 14  }
   0xd   :  { %s5863_s19 = sld [smem:[%s6539_s0 + %s5766_s15]]   ;;  %s5771_s15 = smov 15  }
   0xe   :  { %s5868_s24 = sld [smem:[%s6539_s0 + %s5767_s20]]   ;;  %s5772_s22 = smov 16  }
   0xf   :  { %s5873_s30 = sld [smem:[%s6539_s0 + %s5768_s26]]   ;;  %s5773_s28 = smov 17  }
  0x10   :  { %6566 = sst [smem:[#allocation7_spill]] %s5848_s3 }
  0x11   :  { %6567 = sst [smem:[#allocation8_spill]] %s5853_s8 }
  0x12   :  { %s5878_s6 = sld [smem:[%s6539_s0 + %s5769_s1]]  }
  0x13   :  { %s5883_s12 = sld [smem:[%s6539_s0 + %s5770_s7]]   ;;  %s5774_s7 = smov 18  }
  0x14   :  { %s5888_s20 = sld [smem:[%s6539_s0 + %s5771_s15]]   ;;  %s5775_s15 = smov 19  }
  0x15   :  { %s5893_s27 = sld [smem:[%s6539_s0 + %s5772_s22]]   ;;  %s5776_s22 = smov 20  }
  0x16   :  { %s5898_s4 = sld [smem:[%s6539_s0 + %s5773_s28]]   ;;  %s5777_s28 = smov 21  }
  0x18   :  { %6568 = sst [smem:[#allocation9_spill]] %s5878_s6 }
  0x19   :  { %s5903_s6 = sld [smem:[%s6539_s0 + %s5774_s7]]   ;;  %s5778_s7 = smov 22  }
  0x1a   :  { %6569 = sst [smem:[#allocation10_spill]] %s5888_s20 }
  0x1b   :  { %6570 = sst [smem:[#allocation11_spill]] %s5893_s27 }
  0x1c   :  { %6571 = sst [smem:[#allocation12_spill]] %s5898_s4 }
  0x1d   :  { %s5908_s20 = sld [smem:[%s6539_s0 + %s5775_s15]]   ;;  %s5779_s15 = smov 23  }
  0x1e   :  { %s5913_s27 = sld [smem:[%s6539_s0 + %s5776_s22]]   ;;  %s5780_s22 = smov 24  }
  0x1f   :  { %6572 = sst [smem:[#allocation13_spill]] %s5903_s6 }
  0x20   :  { %s5918_s4 = sld [smem:[%s6539_s0 + %s5777_s28]]   ;;  %s5781_s28 = smov 25  }
  0x21   :  { %s5923_s6 = sld [smem:[%s6539_s0 + %s5778_s7]]   ;;  %s5782_s7 = smov 26  }
  0x23   :  { %6573 = sst [smem:[#allocation14_spill]] %s5908_s20 }
  0x24   :  { %6574 = sst [smem:[#allocation15_spill]] %s5913_s27 }
  0x25   :  { %s5928_s20 = sld [smem:[%s6539_s0 + %s5779_s15]]   ;;  %s5783_s15 = smov 27  }
  0x26   :  { %6575 = sst [smem:[#allocation16_spill]] %s5918_s4 }
  0x27   :  { %6576 = sst [smem:[#allocation17_spill]] %s5923_s6 }
  0x28   :  { %s5933_s27 = sld [smem:[%s6539_s0 + %s5780_s22]]   ;;  %s5784_s22 = smov 28  }
  0x29   :  { %s5938_s4 = sld [smem:[%s6539_s0 + %s5781_s28]]   ;;  %s5785_s28 = smov 29  }
  0x2a   :  { %s5943_s6 = sld [smem:[%s6539_s0 + %s5782_s7]]   ;;  %s5786_s7 = smov 30  }
  0x2b   :  { %6577 = sst [smem:[#allocation18_spill]] %s5928_s20 }
  0x2c   :  { %s5948_s20 = sld [smem:[%s6539_s0 + %s5783_s15]]   ;;  %s5787_s15 = smov 31  }
  0x2e   :  { %6578 = sst [smem:[#allocation19_spill]] %s5933_s27 }
  0x2f   :  { %6579 = sst [smem:[#allocation20_spill]] %s5938_s4 }
  0x30   :  { %6580 = sst [smem:[#allocation21_spill]] %s5943_s6 }
  0x31   :  { %s5953_s27 = sld [smem:[%s6539_s0 + %s5784_s22]]  }
  0x32   :  { %6581 = sst [smem:[#allocation22_spill]] %s5948_s20 }
  0x33   :  { %s5958_s4 = sld [smem:[%s6539_s0 + %s5785_s28]]  }
  0x34   :  { %s5963_s6 = sld [smem:[%s6539_s0 + %s5786_s7]]  }
  0x35   :  { %s5968_s20 = sld [smem:[%s6539_s0 + %s5787_s15]]  }
  0x39   :  { %6582 = sst [smem:[#allocation23_spill]] %s5958_s4 }
  0x3a   :  { %6583 = sst [smem:[#allocation24_spill]] %s5963_s6 }
  0x3b   :  { %68 = vsyncpa [#allocation3], 0 }
  0x3c   :  { %70 = vsyncpa [#allocation3 + $0x1], 0  ;;  %s5970_s22 = smov 0   ;;  %s5972_s23 = smov 0  }
  0x3d   :  { %s5974_s26 = smov 0   ;;  %s5976_s28 = smov 0  }
  0x3e LB: > { %s6584_s9 = sld [smem:[#allocation6_spill]]  ;;  %s6585_s8 = sld [smem:[#allocation8_spill]]  ;;  %s5755_s28 = sphi %s5976_s28, %s6623_s28   ;;  %s5751_s26 = sphi %s5974_s26, %s6622_s26   ;;  %s5747_s23 = sphi %s5972_s23, %s6621_s23   ;;  %s5743_s22 = sphi %s5970_s22, %s6620_s22  }
  0x3f   : > { %s6586_s4 = sld [smem:[#allocation23_spill]]  ;;  %s5991_s0 = sadd.s32 4294967295, %s5755_s28  }
  0x40   : > { %s6587_s3 = sld [smem:[#allocation7_spill]]  ;;  %s4528_s1 = sadd.s32 4294967294, %s5755_s28  }
  0x41   : > { %s5995_s2 = sadd.s32 1, %s5755_s28   ;;  %s739_s7 = sadd.s32 1, %s5751_s26 }
  0x42   : > { %s736_s10 = ssub.s32 %s5755_s28, %s5995_s2  ;;  %p749_p0 = scmp.ne.s32.totalorder %s5751_s26, %s5747_s23 }
  0x43   : > { %p737_p1 = scmp.eq.s32.totalorder %s736_s10, 0  ;;  %p750_p2 = scmp.eq.s32.totalorder %s5991_s0, 1 }
  0x44   : > { %p755_p3 = scmp.ne.s32.totalorder %s5747_s23, %s5743_s22  ;;  %p756_p4 = scmp.eq.s32.totalorder %s4528_s1, 1 }
  0x45   : > { %s6006_s11 = scalar_select %p737_p1, %s5751_s26, %s739_s7  }
  0x46   : > { %p6008_p5 = por %p750_p2, %p749_p0  ;;  %p6012_p6 = por %p756_p4, %p755_p3 }
  0x47   : > { %p4531_p7 = scmp.ge.s32.totalorder %s5755_s28, 1  ;;  %p872_p8 = scmp.lt.s32.totalorder %s5755_s28, 3 }
  0x49   : > { %p873_p9 = pnand %p4531_p7, %p872_p8 }
  0x4a   : > { %v982_v0 = vld [vmem:[%s5828_s17 + $0x80] sm:$0xff] (!%p873_p9)  ;;  %v983_v1 = vld [vmem:[%s5828_s17 + $0x88] sm:$0xff] (!%p873_p9)  ;;  %p951_p10 = scmp.lt.s32.totalorder (!%p873_p9), %s5991_s0, 1  ;;  %v984_v9 = vld [vmem:[%s5828_s17 + $0x90] sm:$0xff] (!%p873_p9)  ;;  %s6590_s5 = sld [smem:[#allocation5_spill]] (!%p873_p9)  ;;  %vm1176_vm0 = vcmask (!%p873_p9), 261120  }
  0x4b   : > { %876 = sbr.rel (%p873_p9) target bundleno = 8027 (0x1f5b), region = 144  ;;  %v966_v2 = vld [vmem:[%s5828_s17] sm:$0xff] (!%p873_p9)  ;;  %v5152_v3 = vpack.c.bf16 (!%p873_p9), %v983_v1, %v982_v0  ;;  %v967_v4 = vld [vmem:[%s5828_s17 + $0x8] sm:$0xff] (!%p873_p9)  ;;  %v985_v10 = vld [vmem:[%s5828_s17 + $0x98] sm:$0xff] (!%p873_p9)  ;;  %vm1180_vm1 = vcmask (!%p873_p9), 254976   ;;  %vm1314_vm2 = vcmask (!%p873_p9), 64512  }
  0x4c   : > { %v998_v5 = vld [vmem:[%s5828_s17 + $0x100] sm:$0xff] (!%p873_p9)  ;;  %v999_v6 = vld [vmem:[%s5828_s17 + $0x108] sm:$0xff] (!%p873_p9)  ;;  %v5154_v7 = vpack.c.bf16 (!%p873_p9), %v967_v4, %v966_v2  ;;  %v968_v11 = vld [vmem:[%s5828_s17 + $0x10] sm:$0xff] (!%p873_p9)  ;;  %v5156_v12 = vpack.c.bf16 (!%p873_p9), %v985_v10, %v984_v9  ;;  %s5788_s10 = smov (!%p873_p9), 96   ;;  %vm1400_vm4 = vcmask (!%p873_p9), 80896   ;;  %vm1404_vm5 = vcmask (!%p873_p9), 74752  }
  0x4d   : > { %v5184_v8 = vpack.c.bf16 (!%p873_p9), %v999_v6, %v998_v5  ;;  %5153 = vmatprep.subr.bf16.mxu0 (!%p873_p9), %v5152_v3  ;;  %v969_v13 = vld [vmem:[%s5828_s17 + $0x18] sm:$0xff] (!%p873_p9)  ;;  %v1000_v14 = vld [vmem:[%s5828_s17 + $0x110] sm:$0xff] (!%p873_p9)  ;;  %v986_v18 = vld [vmem:[%s5828_s17 + $0xa0] sm:$0xff] (!%p873_p9)  ;;  %vm1435_vm6 = vcmask (!%p873_p9), 1041408   ;;  %vm5794_vm7 = vmmov (!%p873_p9), 1   ;;  %vm5802_vm13 = vmmov (!%p873_p9), 0  }
  0x4e   : > { %v1001_v15 = vld [vmem:[%s5828_s17 + $0x118] sm:$0xff] (!%p873_p9)  ;;  %5155 = vmatpush3.bf16.msra.mxu0 (!%p873_p9), %v5154_v7  ;;  %v5158_v16 = vpack.c.bf16 (!%p873_p9), %v969_v13, %v968_v11  ;;  %v987_v19 = vld [vmem:[%s5828_s17 + $0xa8] sm:$0xff] (!%p873_p9)  ;;  %v970_v20 = vld [vmem:[%s5828_s17 + $0x20] sm:$0xff] (!%p873_p9)  ;;  %s6619_s6 = sld [smem:[#allocation24_spill]] (!%p873_p9) }
  0x4f   : > { %5185 = vmatprep.subr.bf16.mxu1 (!%p873_p9), %v5184_v8  ;;  %v5188_v17 = vpack.c.bf16 (!%p873_p9), %v1001_v15, %v1000_v14  ;;  %5157 = vmatprep.subr.bf16.mxu0 (!%p873_p9), %v5156_v12  ;;  %v5160_v21 = vpack.c.bf16 (!%p873_p9), %v987_v19, %v986_v18  ;;  %v971_v22 = vld [vmem:[%s5828_s17 + $0x28] sm:$0xff] (!%p873_p9)  ;;  %v1002_v23 = vld [vmem:[%s5828_s17 + $0x120] sm:$0xff] (!%p873_p9)  ;;  %v988_v26 = vld [vmem:[%s5828_s17 + $0xb0] sm:$0xff] (!%p873_p9) }
  0x50   : > { %5187 = vmatpush3.bf16.msra.mxu1 (!%p873_p9), %v5184_v8  ;;  %v1003_v24 = vld [vmem:[%s5828_s17 + $0x128] sm:$0xff] (!%p873_p9)  ;;  %v989_v27 = vld [vmem:[%s5828_s17 + $0xb8] sm:$0xff] (!%p873_p9)  ;;  %v1004_v28 = vld [vmem:[%s5828_s17 + $0x130] sm:$0xff] (!%p873_p9)  ;;  %v5162_v30 = vpack.c.bf16 (!%p873_p9), %v971_v22, %v970_v20 }
  0x51   : > { %5189 = vmatprep.subr.bf16.mxu1 (!%p873_p9), %v5188_v17  ;;  %v5192_v25 = vpack.c.bf16 (!%p873_p9), %v1003_v24, %v1002_v23  ;;  %v1005_v29 = vld [vmem:[%s5828_s17 + $0x138] sm:$0xff] (!%p873_p9)  ;;  %v5164_v31 = vpack.c.bf16 (!%p873_p9), %v989_v27, %v988_v26  ;;  %v972_v32 = vld [vmem:[%s5828_s17 + $0x30] sm:$0xff] (!%p873_p9)  ;;  %v990_v35 = vld [vmem:[%s5828_s17 + $0xc0] sm:$0xff] (!%p873_p9) }
  0x52   : > { %s6037_s18 = scalar_select %p951_p10, %s5991_s0, 1  ;;  %5159 = vmatpush3.bf16.msra.mxu0 %v5158_v16  ;;  %v973_v33 = vld [vmem:[%s5828_s17 + $0x38] sm:$0xff]  ;;  %v5196_v34 = vpack.c.bf16 %v1005_v29, %v1004_v28  ;;  %v991_v36 = vld [vmem:[%s5828_s17 + $0xc8] sm:$0xff]  ;;  %v1006_v37 = vld [vmem:[%s5828_s17 + $0x140] sm:$0xff] }
  0x53   : > { %5161 = vmatprep.subr.bf16.mxu0 %v5160_v21  ;;  %v1007_v38 = vld [vmem:[%s5828_s17 + $0x148] sm:$0xff]  ;;  %v5166_v39 = vpack.c.bf16 %v973_v33, %v972_v32  ;;  %v5168_v40 = vpack.c.bf16 %v991_v36, %v990_v35  ;;  %v974_v41 = vld [vmem:[%s5828_s17 + $0x40] sm:$0xff]  ;;  %v992_v44 = vld [vmem:[%s5828_s17 + $0xd0] sm:$0xff] }
  0x54   : > { %s5426_s1 = smul.u32 48, %s6037_s18  ;;  %5191 = vmatpush3.bf16.msra.mxu1 %v5188_v17  ;;  %v975_v42 = vld [vmem:[%s5828_s17 + $0x48] sm:$0xff]  ;;  %v5200_v43 = vpack.c.bf16 %v1007_v38, %v1006_v37  ;;  %v993_v45 = vld [vmem:[%s5828_s17 + $0xd8] sm:$0xff]  ;;  %v1008_v46 = vld [vmem:[%s5828_s17 + $0x150] sm:$0xff]  ;;  %s6546_s18 = smov 88  }
  0x55   : > { %5193 = vmatprep.subr.bf16.mxu1 %v5192_v25  ;;  %v1009_v47 = vld [vmem:[%s5828_s17 + $0x158] sm:$0xff]  ;;  %v5170_v49 = vpack.c.bf16 %v975_v42, %v974_v41  ;;  %v5172_v51 = vpack.c.bf16 %v993_v45, %v992_v44  ;;  %v976_v52 = vld [vmem:[%s5828_s17 + $0x50] sm:$0xff]  ;;  %v994_v55 = vld [vmem:[%s5828_s17 + $0xe0] sm:$0xff] }
  0x56   : > { %5163 = vmatpush3.bf16.msra.mxu0 %v5162_v30  ;;  %s6054_s7 = scalar_lea.vmem %s6590_s5, %s5426_s1  ;;  %v977_v53 = vld [vmem:[%s5828_s17 + $0x58] sm:$0xff]  ;;  %v5204_v54 = vpack.c.bf16 %v1009_v47, %v1008_v46  ;;  %v995_v56 = vld [vmem:[%s5828_s17 + $0xe8] sm:$0xff]  ;;  %v1010_v57 = vld [vmem:[%s5828_s17 + $0x160] sm:$0xff]  ;;  %s6544_s1 = smov 120  }
  0x57   : > { %5165 = vmatprep.subr.bf16.mxu0 %v5164_v31  ;;  %v961_v48 = vld [vmem:[%s6054_s7 + $0x8] sm:$0xff]  ;;  %v962_v50 = vld [vmem:[%s6054_s7 + $0x10] sm:$0xff]  ;;  %v5174_v59 = vpack.c.bf16 %v977_v53, %v976_v52  ;;  %v5176_v60 = vpack.c.bf16 %v995_v56, %v994_v55  ;;  %v978_v61 = vld [vmem:[%s5828_s17 + $0x60] sm:$0xff]  ;;  %s6615_s5 = sld [smem:[#allocation20_spill]] }
  0x58   : > { %5195 = vmatpush3.bf16.msra.mxu1 %v5192_v25  ;;  %1080 = vmatprep.mubr.f32.mxu0 %v961_v48  ;;  %v1011_v58 = vld [vmem:[%s5828_s17 + $0x168] sm:$0xff]  ;;  %v996_v0 = vld [vmem:[%s5828_s17 + $0xf0] sm:$0xff]  ;;  %v997_v1 = vld [vmem:[%s5828_s17 + $0xf8] sm:$0xff] }
  0x59   : > { %5197 = vmatprep.subr.bf16.mxu1 %v5196_v34  ;;  %4872 = vmatprep.mubr.f32.mxu1 %v962_v50  ;;  %v979_v62 = vld [vmem:[%s5828_s17 + $0x68] sm:$0xff]  ;;  %v5208_v63 = vpack.c.bf16 %v1011_v58, %v1010_v57  ;;  %v1012_v2 = vld [vmem:[%s5828_s17 + $0x170] sm:$0xff]  ;;  %v1013_v3 = vld [vmem:[%s5828_s17 + $0x178] sm:$0xff]  ;;  %v5180_v5 = vpack.c.bf16 %v997_v1, %v996_v0 }
  0x5a   : > { %5167 = vmatpush3.bf16.msra.mxu0 %v5166_v39  ;;  %v5178_v4 = vpack.c.bf16 %v979_v62, %v978_v61  ;;  %v980_v6 = vld [vmem:[%s5828_s17 + $0x70] sm:$0xff]  ;;  %v981_v7 = vld [vmem:[%s5828_s17 + $0x78] sm:$0xff]  ;;  %v5212_v8 = vpack.c.bf16 %v1013_v3, %v1012_v2  ;;  %v960_v10 = vld [vmem:[%s6054_s7] sm:$0xff] }
  0x5b   : > { %5169 = vmatprep.subr.bf16.mxu0 %v5168_v40  ;;  %v5182_v9 = vpack.c.bf16 %v981_v7, %v980_v6  ;;  %v964_v11 = vld [vmem:[%s6054_s7 + $0x20] sm:$0x3]  ;;  %v965_v12 = vld [vmem:[%s6054_s7 + $0x28] sm:$0x3]  ;;  %v963_v13 = vld [vmem:[%s6054_s7 + $0x18] sm:$0x3] }
  0x5c   : > { %5199 = vmatpush3.bf16.msra.mxu1 %v5196_v34  ;;  %v1014_v17 = vld [vmem:[%s5833_s21] sm:$0xff]  ;;  %v1015_v23 = vld [vmem:[%s5833_s21 + $0x8] sm:$0x3]  ;;  %v1224_v52 = vld [vmem:[%s6587_s3 + $0x18] sm:$0xff]  ;;  %s6548_s7 = smov 112  }
  0x5d   : > { %5201 = vmatprep.subr.bf16.mxu1 %v5200_v43  ;;  %v6084_v22 = vld [vmem:[%s5823_s13] sm:$0xff]  ;;  %v6092_v30 = vld [vmem:[%s5823_s13 + $0x8] sm:$0x3]  ;;  %vm6140_vm3 = vmpackc.low %vm1314_vm2, %vm1314_vm2 }
  0x5e   : > { %5171 = vmatpush3.bf16.msra.mxu0 %v5170_v49  ;;  %v6088_v27 = vld [vmem:[%s6584_s9] sm:$0xff]  ;;  %v6098_v33 = vld [vmem:[%s6584_s9 + $0x8] sm:$0x3]  ;;  %vm6160_vm8 = vmpackc.low %vm1435_vm6, %vm5794_vm7 }
  0x5f   : > { %5173 = vmatprep.subr.bf16.mxu0 %v5172_v51  ;;  %v1221_v48 = vld [vmem:[%s6587_s3] sm:$0xff]  ;;  %v1222_v49 = vld [vmem:[%s6587_s3 + $0x8] sm:$0xff]  ;;  %v1223_v51 = vld [vmem:[%s6587_s3 + $0x10] sm:$0xff]  ;;  %s6606_s3 = smov 104  }
  0x60   : > { %5203 = vmatpush3.bf16.msra.mxu1 %v5200_v43  ;;  %v5216_v50 = vpack.c.bf16 %v1222_v49, %v1221_v48  ;;  %v5220_v53 = vpack.c.bf16 %v1224_v52, %v1223_v51  ;;  %v4533_v61 = vld [vmem:[%s5838_s25] ss:$0 sm:$0xff] }
  0x61   : > { %5205 = vmatprep.subr.bf16.mxu1 %v5204_v54 }
  0x62   : > { %5175 = vmatpush3.bf16.msra.mxu0 %v5174_v59 }
  0x63   : > { %5177 = vmatprep.subr.bf16.mxu0 %v5176_v60 }
  0x64   : > { %5207 = vmatpush3.bf16.msra.mxu1 %v5204_v54 }
  0x65   : > { %5209 = vmatprep.subr.bf16.mxu1 %v5208_v63 }
  0x66   : > { %5179 = vmatpush3.bf16.msra.mxu0 %v5178_v4 }
  0x67   : > { %5181 = vmatprep.subr.bf16.mxu0 %v5180_v5 }
  0x68   : > { %5211 = vmatpush3.bf16.msra.mxu1 %v5208_v63  ;;  %v4534_v63 = vld [vmem:[%s5843_s29] ss:$0 sm:$0xff] }
  0x69   : > { %5213 = vmatprep.subr.bf16.mxu1 %v5212_v8 }
  0x6a   : > { %5183 = vmatpush3.bf16.msra.mxu0 %v5182_v9 }
  0x6c   : > { %5215 = vmatpush3.bf16.msra.mxu1 %v5212_v8 }
  0x6d   : > { %1081 = vmatmul.mubr.f32.vlgmr.msra.gmra.mrb[0].mxu0 %v960_v10  ;;  %5217 = vmatprep.subr.bf16.mxu1 %v5216_v50 }
  0x6e   : > { %1085 = vmatprep.mubr.f32.mxu0 %v964_v11 }
  0x6f   : > { %4873 = vmatmul.mubr.f32.vlgmr.msra.gmra.mrb[0].mxu1 %v965_v12 }
  0x70   : > { %5219 = vmatpush3.bf16.msra.mxu1 %v5216_v50 }
  0x71   : > { %1086 = vmatmul.mubr.f32.gmra.mrb[2].mxu0 %v963_v13  ;;  %5221 = vmatprep.subr.bf16.mxu1 %v5220_v53 }
  0x74   : > { %5223 = vmatpush3.bf16.msra.mxu1 %v5220_v53 }
 0x140   : > { %v4663_v14 = vpop.f32.mrb[0].mxu0 }
 0x141   : > { %v4664_v15 = vpop.f32.mrb[1].mxu0 }
 0x142   : > { %v4874_v16 = vpop.f32.mrb[0].mxu1  ;;  %v4665_v18 = vadd.f32 %v4664_v15, %v4663_v14 }
 0x143   : > { %v1157_v19 = vpop.f32.mrb[1].mxu1 }
 0x144   : > { %v4666_v20 = vpop.f32.mrb[2].mxu0  ;;  %v1083_v21 = vadd.f32 %v4665_v18, %v1014_v17 }
 0x145   : > { %v4667_v24 = vpop.f32.mrb[3].mxu0 }
 0x146   : > { %v1158_v25 = vadd.f32 %v1157_v19, %v1083_v21  ;;  %v4668_v26 = vadd.f32 %v4667_v24, %v4666_v20 }
 0x148   : > { %v1170_v28 = vmul.f32 %v1158_v25, %v6084_v22  ;;  %v1088_v29 = vadd.f32 %v4668_v26, %v1015_v23 }
 0x14a   : > { %v1163_v31 = vadd.f32 %v4874_v16, %v1088_v29  ;;  %v6095_v32 = vadd.f32 %v1170_v28, %v6088_v27 }
 0x14c   : > { %v1171_v34 = vmul.f32 %v1163_v31, %v6092_v30  ;;  %v1177_v35 = vsel %vm1176_vm0, %v6095_v32, 0.0 }
 0x14d   : > { %1178 = vadd.xlane.f32.xlu0 %v1177_v35 }
 0x14e   : > { %v6104_v36 = vadd.f32 %v1171_v34, %v6098_v33 }
 0x150   : > { %v1181_v37 = vsel %vm1180_vm1, %v6104_v36, 0.0 }
 0x151   : > { %1182 = vadd.xlane.f32.xlu0 %v1181_v37 }
 0x1da   : > { %v1179_v38 = vpop.xlane.xlu0 %1178 }
 0x1db   : > { %v1185_v39 = vmul.f32 0.03125, %v1179_v38 }
 0x1dd   : > { %v1187_v40 = vsub.f32 %v6095_v32, %v1185_v39 }
 0x1de   : > { %v1183_v41 = vpop.xlane.xlu0 %1182 }
 0x1df   : > { %v1186_v42 = vmul.f32 0.03125, %v1183_v41  ;;  %v1189_v43 = vmul.f32 %v1187_v40, %v1187_v40 }
 0x1e1   : > { %v1188_v44 = vsub.f32 %v6104_v36, %v1186_v42  ;;  %v1191_v45 = vsel %vm1176_vm0, %v1189_v43, 0.0 }
 0x1e2   : > { %1192 = vadd.xlane.f32.xlu1 %v1191_v45 }
 0x1e3   : > { %v1190_v46 = vmul.f32 %v1188_v44, %v1188_v44 }
 0x1e5   : > { %v1194_v47 = vsel %vm1180_vm1, %v1190_v46, 0.0 }
 0x1e6   : > { %1195 = vadd.xlane.f32.xlu1 %v1194_v47 }
 0x26f   : > { %v1193_v54 = vpop.xlane.xlu1 %1192 }
 0x270   : > { %v1197_v55 = vmul.f32 0.03125, %v1193_v54 }
 0x272   : > { %v1199_v56 = vadd.f32 1e-05, %v1197_v55 }
 0x273   : > { %v1196_v57 = vpop.xlane.xlu1 %1195 }
 0x274   : > { %5593 = vrsqrt.f32 %v1199_v56  ;;  %v1198_v58 = vmul.f32 0.03125, %v1196_v57 }
 0x276   : > { %v1200_v59 = vadd.f32 1e-05, %v1198_v58 }
 0x278   : > { %5595 = vrsqrt.f32 %v1200_v59 }
 0x27e   : > { %v5594_v60 = vpop.eup %5593 }
 0x27f   : > { %v1203_v62 = vmul.f32 %v5594_v60, %v1187_v40 }
 0x281   : > { %v1211_v0 = vmul.f32 %v4533_v61, %v1203_v62 }
 0x282   : > { %v5596_v1 = vpop.eup %5595 }
 0x283   : > { %v1204_v2 = vmul.f32 %v5596_v1, %v1188_v44  ;;  %v1219_v3 = vadd.f32 %v4534_v63, %v1211_v0 }
 0x285   : > { %v1212_v4 = vmul.f32 %v4533_v61, %v1204_v2  ;;  %4883 = vmatprep.mubr.msk.f32.mxu1 %vm1176_vm0, %v1219_v3 }
 0x287   : > { %v1220_v5 = vadd.f32 %v4534_v63, %v1212_v4 }
 0x289   : > { %4884 = vmatmul.mubr.msk.f32.vlgmr.msra.gmra.mrb[2].mxu1 %vm1176_vm0, %v1220_v5 }
 0x35c   : > { %v4885_v6 = vpop.f32.mrb[2].mxu1 }
 0x35d   : > { %v1297_v7 = vpop.f32.mrb[3].mxu1  ;;  %v6132_v10 = vmul.f32 0.35355338, %v4885_v6 }
 0x35e   : > { %v6120_v8 = vpack.i.bf16 %v4885_v6, %v1297_v7  ;;  %v6122_v9 = vmul.f32 0.35355338, %v1297_v7 }
 0x360   : > { %5514 = vrot.lane.b32.xlu0 %v6120_v8, %s5788_s10  ;;  %4890 = vmatprep.mubr.msk.f32.mxu1 %vm1314_vm2, %v6122_v9 }
 0x364   : > { %5524 = vrot.lane.b32.xlu0 %v6120_v8, %s6546_s18  ;;  %s6547_s18 = smov 80  }
 0x368   : > { %1513 = vrot.lane.b32.xlu0 %v6122_v9, %s6544_s1 }
 0x36c   : > { %1515 = vrot.lane.b32.xlu0 %v6132_v10, %s6544_s1  ;;  %s6556_s1 = smov 64  }
 0x370   : > { %1876 = vrot.lane.b32.xlu0 %v6122_v9, %s6548_s7 }
 0x3d2   : > { %v5515_v11 = vpop.permute.xlu0 %5514 }
 0x3d3   : > { %v5517_v12 = vunpack.i.h.bf16 %v5515_v11  ;;  %v5516_v13 = vunpack.i.l.bf16 %v5515_v11 }
 0x3d5   : > { %v5224_v15 = vpack.c.bf16 %v5517_v12, %v5516_v13 }
 0x3d6   : > { %v5525_v38 = vpop.permute.xlu0 %5524 }
 0x3d7   : > { %5226 = vmatprep.subr.msk.bf16.mxu1 %vm6140_vm3, %v5224_v15  ;;  %v5527_v40 = vunpack.i.h.bf16 %v5525_v38  ;;  %v5526_v41 = vunpack.i.l.bf16 %v5525_v38 }
 0x3d8   : > { %5229 = vmatpush3.bf16.xpose.msk.msra.mxu1 %vm6140_vm3, %v5224_v15 }
 0x3d9   : > { %v5236_v46 = vpack.c.bf16 %v5527_v40, %v5526_v41 }
 0x3da   : > { %v1514_v52 = vpop.permute.xlu0 %1513 }
 0x3de   : > { %v1516_v56 = vpop.permute.xlu0 %1515 }
 0x3df   : > { %4891 = vmatmul.mubr.msk.f32.vlgmr.msra.gmra.mrb[4].mxu1 %vm1314_vm2, %v6132_v10 }
 0x3e2   : > { %v1877_v57 = vpop.permute.xlu0 %1876 }
 0x4b2   : > { %v4892_v16 = vpop.f32.mrb[4].mxu1 }
 0x4b3   : > { %v1391_v17 = vpop.f32.mrb[5].mxu1  ;;  %v1405_v19 = vsel %vm1404_vm5, %v4892_v16, -inf }
 0x4b4   : > { %v1401_v18 = vsel %vm1400_vm4, %v1391_v17, -inf }
 0x4b5   : > { %1402 = vmax.xlane.f32.xlu1 %v1401_v18 }
 0x4b9   : > { %1406 = vmax.xlane.f32.xlu1 %v1405_v19 }
 0x542   : > { %v1403_v20 = vpop.xlane.xlu1 %1402 }
 0x543   : > { %v1408_v21 = vsub.f32 %v1391_v17, %v1403_v20 }
 0x545   : > { %v1410_v25 = vmul.f32 1.442695, %v1408_v21 }
 0x546   : > { %v1407_v23 = vpop.xlane.xlu1 %1406 }
 0x547   : > { %v1409_v24 = vsub.f32 %v4892_v16, %v1407_v23 }
 0x549   : > { %v1412_v26 = vmul.f32 1.442695, %v1409_v24 }
 0x54b   : > { %5597 = vpow2.f32 %v1412_v26 }
 0x54c   : > { %5599 = vpow2.f32 %v1410_v25 }
 0x555   : > { %v5598_v28 = vpop.eup %5597 }
 0x556   : > { %v1417_v29 = vsel %vm1404_vm5, %v5598_v28, 0.0  ;;  %v5600_v31 = vpop.eup %5599 }
 0x557   : > { %1418 = vadd.xlane.f32.xlu1 %v1417_v29  ;;  %v1414_v34 = vsel %vm1400_vm4, %v5600_v31, 0.0 }
 0x55b   : > { %1415 = vadd.xlane.f32.xlu1 %v1414_v34 }
 0x56c   : > { %5519 = vrot.lane.b32.xlu1 %v6120_v8, %s6556_s1  ;;  %s6599_s1 = sld [smem:[#allocation12_spill]] }
 0x570   : > { %5529 = vrot.lane.b32.xlu1 %v6120_v8, %s6547_s18  ;;  %s6552_s18 = smov 72  }
 0x574   : > { %1878 = vrot.lane.b32.xlu1 %v6132_v10, %s6548_s7  ;;  %s6550_s7 = smov 104  }
 0x5e4   : > { %v1419_v35 = vpop.xlane.xlu1 %1418 }
 0x5e5   : > { %5601 = vrcp.f32 %v1419_v35 }
 0x5e8   : > { %v1416_v37 = vpop.xlane.xlu1 %1415 }
 0x5e9   : > { %5603 = vrcp.f32 %v1416_v37 }
 0x5ec   : > { %v5520_v39 = vpop.permute.xlu1 %5519 }
 0x5ed   : > { %v5522_v42 = vunpack.i.h.bf16 %v5520_v39  ;;  %v5521_v43 = vunpack.i.l.bf16 %v5520_v39 }
 0x5ef   : > { %v5230_v45 = vpack.c.bf16 %v5522_v42, %v5521_v43  ;;  %v5602_v47 = vpop.eup %5601 }
 0x5f0   : > { %v5530_v49 = vpop.permute.xlu1 %5529  ;;  %v1423_v51 = vmul.f32 %v5602_v47, %v5598_v28 }
 0x5f1   : > { %5232 = vmatprep.subr.msk.bf16.mxu1 %vm6160_vm8, %v5230_v45  ;;  %v5532_v53 = vunpack.i.h.bf16 %v5530_v49  ;;  %v5531_v54 = vunpack.i.l.bf16 %v5530_v49 }
 0x5f2   : > { %5235 = vmatpush3.bf16.msk.msra.mxu1 %vm6160_vm8, %v5230_v45 }
 0x5f3   : > { %v5604_v48 = vpop.eup %5603  ;;  %5238 = vmatprep.subr.msk.bf16.mxu1 %vm6140_vm3, %v5236_v46  ;;  %v5248_v55 = vpack.c.bf16 %v5532_v53, %v5531_v54  ;;  %v1167_v54 = vld [vmem:[%s6585_s8 + $0x8] sm:$0xff] }
 0x5f4   : > { %v1422_v50 = vmul.f32 %v5604_v48, %v5600_v31  ;;  %v1879_v58 = vpop.permute.xlu1 %1878 }
 0x5f6   : > { %4897 = vmatprep.mubr.msk.f32.mxu1 %vm1400_vm4, %v1422_v50 }
 0x5f7   : > { %4898 = vmatmul.mubr.msk.f32.vlgmr.msra.gmra.mrb[6].mxu1 %vm1400_vm4, %v1423_v51 }
 0x5f8   : > { %4904 = vmatprep.mubr.msk.f32.mxu1 %vm1314_vm2, %v1514_v52 }
 0x5fb   : > { %5241 = vmatpush3.bf16.xpose.msk.msra.mxu1 %vm6140_vm3, %v5236_v46 }
 0x5fc   : > { %5250 = vmatprep.subr.msk.bf16.mxu1 %vm6140_vm3, %v5248_v55 }
 0x602   : > { %4905 = vmatmul.mubr.msk.f32.vlgmr.msra.gmra.mrb[8].mxu1 %vm1314_vm2, %v1516_v56 }
 0x603   : > { %5253 = vmatpush3.bf16.xpose.msk.msra.mxu1 %vm6140_vm3, %v5248_v55  ;;  %4928 = vmatprep.mubr.msk.f32.mxu1 %vm1314_vm2, %v1877_v57  ;;  %v1166_v55 = vld [vmem:[%s6585_s8] sm:$0xff] }
 0x60a   : > { %4929 = vmatmul.mubr.msk.f32.vlgmr.msra.gmra.mrb[10].mxu1 %vm1314_vm2, %v1879_v58 }
 0x6ca   : > { %v6182_v59 = vpop.f32.mrb[6].mxu1 }
 0x6cb   : > { %v6184_v60 = vpop.f32.mrb[7].mxu1 }
 0x6d5   : > { %v4906_v61 = vpop.f32.mrb[8].mxu1 }
 0x6d6   : > { %v1595_v62 = vpop.f32.mrb[9].mxu1  ;;  %v1607_v63 = vsel %vm1404_vm5, %v4906_v61, -inf }
 0x6d7   : > { %1608 = vmax.xlane.f32.xlu1 %v1607_v63  ;;  %v1604_v0 = vsel %vm1400_vm4, %v1595_v62, -inf }
 0x6d8   : > { %1605 = vmax.xlane.f32.xlu0 %v1604_v0 }
 0x6dd   : > { %v4930_v1 = vpop.f32.mrb[10].mxu1 }
 0x6de   : > { %v1958_v2 = vpop.f32.mrb[11].mxu1  ;;  %v1970_v3 = vsel %vm1404_vm5, %v4930_v1, -inf }
 0x6df   : > { %v1967_v26 = vsel %vm1400_vm4, %v1958_v2, -inf }
 0x6e8   : > { %5539 = vrot.lane.b32.xlu1 %v6120_v8, %s6552_s18  ;;  %s6553_s18 = smov 48  }
 0x6ec   : > { %2160 = vrot.lane.b32.xlu1 %v6122_v9, %s6550_s7 }
 0x6f0   : > { %2162 = vrot.lane.b32.xlu1 %v6132_v10, %s6550_s7  ;;  %s6555_s7 = smov 56  }
 0x714   : > { %1971 = vmax.xlane.f32.xlu1 %v1970_v3 }
 0x764   : > { %v1609_v4 = vpop.xlane.xlu1 %1608 }
 0x765   : > { %v1611_v5 = vsub.f32 %v4906_v61, %v1609_v4  ;;  %v1606_v6 = vpop.xlane.xlu0 %1605 }
 0x766   : > { %v1610_v7 = vsub.f32 %v1595_v62, %v1606_v6 }
 0x767   : > { %v1614_v11 = vmul.f32 1.442695, %v1611_v5 }
 0x768   : > { %v1612_v12 = vmul.f32 1.442695, %v1610_v7  ;;  %v5540_v13 = vpop.permute.xlu1 %5539 }
 0x769   : > { %5605 = vpow2.f32 %v1614_v11  ;;  %v5542_v15 = vunpack.i.h.bf16 %v5540_v13  ;;  %v5541_v16 = vunpack.i.l.bf16 %v5540_v13 }
 0x76a   : > { %5607 = vpow2.f32 %v1612_v12 }
 0x76b   : > { %v5260_v17 = vpack.c.bf16 %v5542_v15, %v5541_v16 }
 0x76c   : > { %v2161_v18 = vpop.permute.xlu1 %2160 }
 0x76d   : > { %5262 = vmatprep.subr.msk.bf16.mxu1 %vm6140_vm3, %v5260_v17  ;;  %4947 = vmatprep.mubr.msk.f32.mxu1 %vm1314_vm2, %v2161_v18 }
 0x76e   : > { %5265 = vmatpush3.bf16.xpose.msk.msra.mxu1 %vm6140_vm3, %v5260_v17 }
 0x770   : > { %v2163_v10 = vpop.permute.xlu1 %2162 }
 0x773   : > { %v5606_v9 = vpop.eup %5605 }
 0x774   : > { %v1619_v19 = vsel %vm1404_vm5, %v5606_v9, 0.0  ;;  %v5608_v20 = vpop.eup %5607 }
 0x775   : > { %4948 = vmatmul.mubr.msk.f32.vlgmr.msra.gmra.mrb[12].mxu1 %vm1314_vm2, %v2163_v10  ;;  %1620 = vadd.xlane.f32.xlu0 %v1619_v19  ;;  %v1616_v21 = vsel %vm1400_vm4, %v5608_v20, 0.0 }
 0x779   : > { %1617 = vadd.xlane.f32.xlu0 %v1616_v21 }
 0x78f   : > { %5534 = vrot.lane.b32.xlu0 %v6120_v8, %s6555_s7  ;;  %s6598_s7 = sld [smem:[#allocation11_spill]] }
 0x7a1   : > { %v1972_v23 = vpop.xlane.xlu1 %1971 }
 0x7a2   : > { %v1974_v24 = vsub.f32 %v4930_v1, %v1972_v23 }
 0x7a4   : > { %v1977_v25 = vmul.f32 1.442695, %v1974_v24 }
 0x7a6   : > { %5609 = vpow2.f32 %v1977_v25 }
 0x7ae   : > { %1968 = vmax.xlane.f32.xlu0 %v1967_v26 }
 0x7b0   : > { %v6206_v28 = vpop.eup %5609 }
 0x7b1   : > { %v1982_v29 = vsel %vm1404_vm5, %v6206_v28, 0.0 }
 0x7b2   : > { %1983 = vadd.xlane.f32.xlu0 %v1982_v29 }
 0x802   : > { %v1621_v31 = vpop.xlane.xlu0 %1620 }
 0x803   : > { %5611 = vrcp.f32 %v1621_v31  ;;  %v1169_v31 = vld [vmem:[%s6585_s8 + $0x18] sm:$0xff] }
 0x806   : > { %v1618_v34 = vpop.xlane.xlu0 %1617 }
 0x807   : > { %5613 = vrcp.f32 %v1618_v34 }
 0x80a   : > { %v5535_v35 = vpop.permute.xlu0 %5534 }
 0x80b   : > { %v5537_v37 = vunpack.i.h.bf16 %v5535_v35  ;;  %v5536_v38 = vunpack.i.l.bf16 %v5535_v35 }
 0x80d   : > { %v5242_v39 = vpack.c.bf16 %v5537_v37, %v5536_v38  ;;  %v5612_v40 = vpop.eup %5611  ;;  %v4573_v38 = vld [vmem:[%s5858_s14] ss:$0 sm:$0xff] }
 0x80e   : > { %v1625_v43 = vmul.f32 %v5612_v40, %v5606_v9  ;;  %v1168_v9 = vld [vmem:[%s6585_s8 + $0x10] sm:$0xff] }
 0x80f   : > { %5244 = vmatprep.subr.msk.bf16.mxu0 %vm6160_vm8, %v5242_v39 }
 0x810   : > { %5247 = vmatpush3.bf16.msk.msra.mxu0 %vm6160_vm8, %v5242_v39 }
 0x811   : > { %v5614_v41 = vpop.eup %5613  ;;  %4914 = vmatprep.subr.mxu0 %v1167_v54 }
 0x812   : > { %v1624_v42 = vmul.f32 %v5614_v41, %v5608_v20 }
 0x814   : > { %4911 = vmatprep.mubr.msk.f32.mxu0 %vm1400_vm4, %v1624_v42 }
 0x815   : > { %4912 = vmatmul.mubr.msk.f32.vlgmr.msra.gmra.mrb[4].mxu0 %vm1400_vm4, %v1625_v43 }
 0x816   : > { %4915 = vmatpush3.msra.mxu0 %v1167_v54 }
 0x817   : > { %4919 = vmatprep.subr.mxu0 %v1166_v55 }
 0x83b   : > { %v1969_v45 = vpop.xlane.xlu0 %1968 }
 0x83c   : > { %v1973_v46 = vsub.f32 %v1958_v2, %v1969_v45 }
 0x83e   : > { %v1975_v47 = vmul.f32 1.442695, %v1973_v46 }
 0x83f   : > { %v1984_v57 = vpop.xlane.xlu0 %1983 }
 0x840   : > { %5615 = vpow2.f32 %v1975_v47 }
 0x848   : > { %v4949_v48 = vpop.f32.mrb[12].mxu1 }
 0x849   : > { %v2242_v49 = vpop.f32.mrb[13].mxu1  ;;  %v2254_v53 = vsel %vm1404_vm5, %v4949_v48, -inf }
 0x84a   : > { %v5616_v50 = vpop.eup %5615  ;;  %v2251_v51 = vsel %vm1400_vm4, %v2242_v49, -inf }
 0x84b   : > { %2252 = vmax.xlane.f32.xlu1 %v2251_v51  ;;  %v1979_v52 = vsel %vm1400_vm4, %v5616_v50, 0.0 }
 0x84c   : > { %1980 = vadd.xlane.f32.xlu0 %v1979_v52 }
 0x84f   : > { %2255 = vmax.xlane.f32.xlu1 %v2254_v53 }
 0x862   : > { %5544 = vrot.lane.b32.xlu0 %v6120_v8, %s6553_s18  ;;  %s6554_s18 = smov 40  }
 0x8d8   : > { %v2253_v56 = vpop.xlane.xlu1 %2252 }
 0x8d9   : > { %v2257_v58 = vsub.f32 %v2242_v49, %v2253_v56  ;;  %v1981_v63 = vpop.xlane.xlu0 %1980  ;;  %v2500_v56 = vld [vmem:[%s5873_s30 + $0x8] sm:$0xff] }
 0x8db   : > { %v2259_v0 = vmul.f32 1.442695, %v2257_v58  ;;  %v2501_v58 = vld [vmem:[%s5873_s30 + $0x10] sm:$0xff] }
 0x8dc   : > { %v2256_v61 = vpop.xlane.xlu1 %2255 }
 0x8dd   : > { %v2258_v62 = vsub.f32 %v4949_v48, %v2256_v61  ;;  %v5545_v2 = vpop.permute.xlu0 %5544  ;;  %v2502_v61 = vld [vmem:[%s5873_s30 + $0x18] sm:$0xff] }
 0x8de   : > { %v5547_v3 = vunpack.i.h.bf16 %v5545_v2  ;;  %v5546_v4 = vunpack.i.l.bf16 %v5545_v2 }
 0x8df   : > { %v2261_v1 = vmul.f32 1.442695, %v2258_v62  ;;  %v5276_v62 = vpack.c.bf16 %v2502_v61, %v2501_v58 }
 0x8e0   : > { %v5254_v11 = vpack.c.bf16 %v5547_v3, %v5546_v4 }
 0x8e1   : > { %5617 = vpow2.f32 %v2261_v1 }
 0x8e2   : > { %5619 = vpow2.f32 %v2259_v0 }
 0x8e3   : > { %5621 = vrcp.f32 %v1981_v63 }
 0x8e4   : > { %5623 = vrcp.f32 %v1984_v57 }
 0x8e8   : > { %v4913_v5 = vpop.f32.mrb[4].mxu0 }
 0x8e9   : > { %v1705_v6 = vpop.f32.mrb[5].mxu0 }
 0x8ea   : > { %4916 = vmatprep.mubr.msk.f32.mxu0 %vm1314_vm2, %v1705_v6  ;;  %v4574_v6 = vld [vmem:[%s5863_s19] ss:$0 sm:$0xff] }
 0x8eb   : > { %v5618_v7 = vpop.eup %5617  ;;  %4917 = vmatmul.mubr.msk.f32.vlgmr.msra.gmra.mrb[6].mxu0 %vm1314_vm2, %v4913_v5 }
 0x8ec   : > { %4920 = vmatpush3.msra.mxu0 %v1166_v55  ;;  %4921 = vmatprep.mubr.msk.f32.mxu0 %vm1314_vm2, %v6184_v60  ;;  %v2266_v12 = vsel %vm1404_vm5, %v5618_v7, 0.0  ;;  %v5620_v13 = vpop.eup %5619  ;;  %v2499_v55 = vld [vmem:[%s5873_s30] sm:$0xff] }
 0x8ed   : > { %5256 = vmatprep.subr.msk.bf16.mxu0 %vm6160_vm8, %v5254_v11  ;;  %2267 = vadd.xlane.f32.xlu1 %v2266_v12  ;;  %v5622_v15 = vpop.eup %5621  ;;  %v2263_v16 = vsel %vm1400_vm4, %v5620_v13, 0.0  ;;  %v5272_v57 = vpack.c.bf16 %v2500_v56, %v2499_v55 }
 0x8ee   : > { %v5624_v17 = vpop.eup %5623  ;;  %v1987_v18 = vmul.f32 %v5622_v15, %v5616_v50 }
 0x8ef   : > { %v1988_v60 = vmul.f32 %v5624_v17, %v6206_v28  ;;  %5273 = vmatprep.subr.bf16.mxu1 %v5272_v57 }
 0x8f0   : > { %5275 = vmatpush3.bf16.msra.mxu1 %v5272_v57 }
 0x8f1   : > { %2264 = vadd.xlane.f32.xlu1 %v2263_v16  ;;  %5277 = vmatprep.subr.bf16.mxu1 %v5276_v62 }
 0x8f3   : > { %4922 = vmatmul.mubr.msk.f32.vlgmr.msra.gmra.mrb[6].mxu0 %vm1314_vm2, %v6182_v59 }
 0x8f4   : > { %5259 = vmatpush3.bf16.msk.msra.mxu0 %vm6160_vm8, %v5254_v11  ;;  %4935 = vmatprep.mubr.msk.f32.mxu0 %vm1400_vm4, %v1987_v18  ;;  %v4575_v11 = vld [vmem:[%s5868_s24] ss:$0 sm:$0xff] }
 0x8f5   : > { %4938 = vmatprep.subr.mxu0 %v1168_v9  ;;  %5279 = vmatpush3.bf16.msra.mxu1 %v5276_v62 }
 0x8f7   : > { %4936 = vmatmul.mubr.msk.f32.vlgmr.msra.gmra.mrb[8].mxu0 %vm1400_vm4, %v1988_v60  ;;  %v2645_v60 = vld [vmem:[%s5883_s12] sm:$0xff] }
 0x8f8   : > { %4939 = vmatpush3.msra.mxu0 %v1168_v9  ;;  %v2646_v9 = vld [vmem:[%s5883_s12 + $0x8] sm:$0xff] }
 0x902   : > { %5549 = vrot.lane.b32.xlu1 %v6120_v8, %s6554_s18  ;;  %s6595_s18 = sld [smem:[#allocation9_spill]] }
 0x97a   : > { %v2268_v10 = vpop.xlane.xlu1 %2267 }
 0x97e   : > { %v2265_v19 = vpop.xlane.xlu1 %2264 }
 0x97f   : > { %5625 = vrcp.f32 %v2265_v19  ;;  %v2647_v19 = vld [vmem:[%s5883_s12 + $0x10] sm:$0xff] }
 0x980   : > { %5627 = vrcp.f32 %v2268_v10  ;;  %v5280_v10 = vpack.c.bf16 %v2646_v9, %v2645_v60 }
 0x982   : > { %v5550_v20 = vpop.permute.xlu1 %5549 }
 0x983   : > { %v5552_v59 = vunpack.i.h.bf16 %v5550_v20  ;;  %v5551_v21 = vunpack.i.l.bf16 %v5550_v20  ;;  %v2648_v20 = vld [vmem:[%s5883_s12 + $0x18] sm:$0xff] }
 0x985   : > { %v5266_v23 = vpack.c.bf16 %v5552_v59, %v5551_v21  ;;  %v5284_v59 = vpack.c.bf16 %v2648_v20, %v2647_v19  ;;  %v2649_v21 = vld [vmem:[%s5883_s12 + $0x20] sm:$0xff] }
 0x987   : > { %5268 = vmatprep.subr.msk.bf16.mxu0 %vm6160_vm8, %v5266_v23 }
 0x989   : > { %v5626_v24 = vpop.eup %5625 }
 0x98a   : > { %v5628_v28 = vpop.eup %5627  ;;  %v2271_v8 = vmul.f32 %v5626_v24, %v5620_v13 }
 0x98b   : > { %v2272_v29 = vmul.f32 %v5628_v28, %v5618_v7 }
 0x9ca   : > { %v4937_v25 = vpop.f32.mrb[8].mxu0 }
 0x9cb   : > { %v2068_v26 = vpop.f32.mrb[9].mxu0 }
 0x9cc   : > { %4940 = vmatprep.mubr.msk.f32.mxu0 %vm1314_vm2, %v2068_v26  ;;  %v2652_v26 = vld [vmem:[%s5883_s12 + $0x38] sm:$0xff] }
 0x9cd   : > { %4941 = vmatmul.mubr.msk.f32.vlgmr.msra.gmra.mrb[6].mxu0 %vm1314_vm2, %v4937_v25  ;;  %v2651_v25 = vld [vmem:[%s5883_s12 + $0x30] sm:$0xff] }
 0x9ce   : > { %5271 = vmatpush3.bf16.msk.msra.mxu0 %vm6160_vm8, %v5266_v23  ;;  %4954 = vmatprep.mubr.msk.f32.mxu0 %vm1400_vm4, %v2271_v8  ;;  %v2650_v23 = vld [vmem:[%s5883_s12 + $0x28] sm:$0xff]  ;;  %v5292_v28 = vpack.c.bf16 %v2652_v26, %v2651_v25  ;;  %v2653_v8 = vld [vmem:[%s5883_s12 + $0x40] sm:$0xff] }
 0x9cf   : > { %4957 = vmatprep.subr.mxu0 %v1169_v31  ;;  %v5288_v24 = vpack.c.bf16 %v2650_v23, %v2649_v21 }
 0x9d1   : > { %4955 = vmatmul.mubr.msk.f32.vlgmr.msra.gmra.mrb[10].mxu0 %vm1400_vm4, %v2272_v29  ;;  %v2654_v29 = vld [vmem:[%s5883_s12 + $0x48] sm:$0xff] }
 0x9d2   : > { %4958 = vmatpush3.msra.mxu0 %v1169_v31  ;;  %v5296_v31 = vpack.c.bf16 %v2654_v29, %v2653_v8  ;;  %v5800_v8 = vmov -1.0  }
 0x9d3   : > { %5281 = vmatprep.subr.bf16.mxu0 %v5280_v10 }
 0xaa4   : > { %v4956_v34 = vpop.f32.mrb[10].mxu0 }
 0xaa5   : > { %v2352_v35 = vpop.f32.mrb[11].mxu0 }
 0xaa6   : > { %4959 = vmatprep.mubr.msk.f32.mxu0 %vm1314_vm2, %v2352_v35  ;;  %v2656_v35 = vld [vmem:[%s5883_s12 + $0x58] sm:$0xff] }
 0xaa7   : > { %4960 = vmatmul.mubr.msk.f32.vlgmr.msra.gmra.mrb[6].mxu0 %vm1314_vm2, %v4956_v34  ;;  %v2655_v34 = vld [vmem:[%s5883_s12 + $0x50] sm:$0xff] }
 0xaa8   : > { %5283 = vmatpush3.bf16.msra.mxu0 %v5280_v10 }
 0xaa9   : > { %5285 = vmatprep.subr.bf16.mxu0 %v5284_v59 }
 0xaac   : > { %5287 = vmatpush3.bf16.msra.mxu0 %v5284_v59 }
 0xaad   : > { %5289 = vmatprep.subr.bf16.mxu0 %v5288_v24 }
 0xab0   : > { %5291 = vmatpush3.bf16.msra.mxu0 %v5288_v24 }
 0xab1   : > { %5293 = vmatprep.subr.bf16.mxu0 %v5292_v28 }
 0xab4   : > { %5295 = vmatpush3.bf16.msra.mxu0 %v5292_v28 }
 0xab5   : > { %5297 = vmatprep.subr.bf16.mxu0 %v5296_v31 }
 0xab8   : > { %5299 = vmatpush3.bf16.msra.mxu0 %v5296_v31 }
 0xb7a   : > { %v4961_v37 = vpop.f32.mrb[6].mxu0 }
 0xb7b   : > { %v2445_v39 = vadd.f32 %v4961_v37, %v6104_v36  ;;  %v2433_v40 = vpop.f32.mrb[7].mxu0  ;;  %v5300_v37 = vpack.c.bf16 %v2656_v35, %v2655_v34 }
 0xb7c   : > { %v2444_v41 = vadd.f32 %v2433_v40, %v6095_v32 }
 0xb7d   : > { %v6255_v42 = vadd.f32 %v4573_v38, %v2445_v39  ;;  %5301 = vmatprep.subr.bf16.mxu0 %v5300_v37  ;;  %v2658_v39 = vld [vmem:[%s5883_s12 + $0x68] sm:$0xff] }
 0xb7e   : > { %v6257_v43 = vadd.f32 %v4573_v38, %v2444_v41  ;;  %5303 = vmatpush3.bf16.msra.mxu0 %v5300_v37  ;;  %v2657_v38 = vld [vmem:[%s5883_s12 + $0x60] sm:$0xff]  ;;  %v2659_v41 = vld [vmem:[%s5883_s12 + $0x70] sm:$0xff] }
 0xb7f   : > { %v2460_v45 = vsel %vm1180_vm1, %v6255_v42, 0.0  ;;  %v5304_v40 = vpack.c.bf16 %v2658_v39, %v2657_v38 }
 0xb80   : > { %2461 = vadd.xlane.f32.xlu1 %v2460_v45  ;;  %v2457_v46 = vsel %vm1176_vm0, %v6257_v43, 0.0  ;;  %v2660_v45 = vld [vmem:[%s5883_s12 + $0x78] sm:$0xff] }
 0xb81   : > { %2458 = vadd.xlane.f32.xlu0 %v2457_v46  ;;  %5305 = vmatprep.subr.bf16.mxu0 %v5304_v40  ;;  %v5308_v46 = vpack.c.bf16 %v2660_v45, %v2659_v41 }
 0xb82   : > { %5307 = vmatpush3.bf16.msra.mxu0 %v5304_v40 }
 0xb83   : > { %5309 = vmatprep.subr.bf16.mxu0 %v5308_v46 }
 0xb86   : > { %5311 = vmatpush3.bf16.msra.mxu0 %v5308_v46 }
 0xc0d   : > { %v2462_v47 = vpop.xlane.xlu1 %2461 }
 0xc0e   : > { %v2464_v36 = vmul.f32 0.03125, %v2462_v47  ;;  %v2459_v48 = vpop.xlane.xlu0 %2458  ;;  %v4576_v47 = vld [vmem:[%s6595_s18] ss:$0 sm:$0xff]  ;;  %s6596_s18 = sld [smem:[#allocation10_spill]] }
 0xc0f   : > { %v2463_v32 = vmul.f32 0.03125, %v2459_v48 }
 0xc10   : > { %v2466_v49 = vsub.f32 %v6255_v42, %v2464_v36 }
 0xc11   : > { %v2465_v50 = vsub.f32 %v6257_v43, %v2463_v32 }
 0xc12   : > { %v2468_v53 = vmul.f32 %v2466_v49, %v2466_v49 }
 0xc13   : > { %v2467_v51 = vmul.f32 %v2465_v50, %v2465_v50 }
 0xc14   : > { %v2472_v54 = vsel %vm1180_vm1, %v2468_v53, 0.0 }
 0xc15   : > { %v2469_v52 = vsel %vm1176_vm0, %v2467_v51, 0.0 }
 0xc16   : > { %2470 = vadd.xlane.f32.xlu0 %v2469_v52 }
 0xc1a   : > { %2473 = vadd.xlane.f32.xlu0 %v2472_v54 }
 0xca3   : > { %v2471_v63 = vpop.xlane.xlu0 %2470 }
 0xca4   : > { %v2475_v0 = vmul.f32 0.03125, %v2471_v63 }
 0xca6   : > { %v2477_v1 = vadd.f32 1e-05, %v2475_v0 }
 0xca7   : > { %v2474_v2 = vpop.xlane.xlu0 %2473 }
 0xca8   : > { %5629 = vrsqrt.f32 %v2477_v1  ;;  %v2476_v3 = vmul.f32 0.03125, %v2474_v2 }
 0xcaa   : > { %v2478_v4 = vadd.f32 1e-05, %v2476_v3 }
 0xcac   : > { %5631 = vrsqrt.f32 %v2478_v4 }
 0xcb2   : > { %v5630_v5 = vpop.eup %5629 }
 0xcb3   : > { %v2481_v7 = vmul.f32 %v5630_v5, %v2465_v50 }
 0xcb5   : > { %v2489_v12 = vmul.f32 %v4574_v6, %v2481_v7 }
 0xcb6   : > { %v5632_v13 = vpop.eup %5631 }
 0xcb7   : > { %v2482_v15 = vmul.f32 %v5632_v13, %v2466_v49  ;;  %v2497_v16 = vadd.f32 %v4575_v11, %v2489_v12 }
 0xcb9   : > { %v2490_v17 = vmul.f32 %v4574_v6, %v2482_v15  ;;  %4970 = vmatprep.mubr.msk.f32.mxu1 %vm1176_vm0, %v2497_v16 }
 0xcbb   : > { %v2498_v18 = vadd.f32 %v4575_v11, %v2490_v17 }
 0xcbd   : > { %4971 = vmatmul.mubr.msk.f32.vlgmr.msra.gmra.mrb[14].mxu1 %vm1176_vm0, %v2498_v18 }
 0xd90   : > { %v4972_v36 = vpop.f32.mrb[14].mxu1 }
 0xd91   : > { %v2588_v48 = vadd.f32 %v4972_v36, %v4576_v47  ;;  %v2582_v32 = vpop.f32.mrb[15].mxu1  ;;  %v4579_v36 = vld [vmem:[%s6596_s18] ss:$0 sm:$0xff]  ;;  %s6597_s18 = sld [smem:[#allocation13_spill]] }
 0xd92   : > { %v2583_v49 = vadd.f32 %v4576_v47, %v2582_v32 }
 0xd93   : > { %v2594_v50 = vmul.f32 0.70710677, %v2588_v48  ;;  %v2592_v41 = vmul.f32 0.5, %v2588_v48 }
 0xd94   : > { %v2593_v51 = vmul.f32 0.70710677, %v2583_v49  ;;  %v2591_v39 = vmul.f32 0.5, %v2583_v49 }
 0xd95   : > { %v2600_v52 = vand.u32 2147483647, %v2594_v50  ;;  %vm2596_vm9 = vcmp.ge.f32.partialorder %v2594_v50, 0.0 }
 0xd96   : > { %v2599_v53 = vand.u32 2147483647, %v2593_v51  ;;  %vm2595_vm10 = vcmp.ge.f32.partialorder %v2593_v51, 0.0  ;;  %v2598_v29 = vsel %vm2596_vm9, 1.0, %v5800_v8 }
 0xd97   : > { %v2602_v54 = vmul.f32 0.3275911, %v2600_v52  ;;  %v2628_v58 = vsub.f32 0.0, %v2600_v52  ;;  %v2597_v35 = vsel %vm2595_vm10, 1.0, %v5800_v8 }
 0xd98   : > { %v2601_v55 = vmul.f32 0.3275911, %v2599_v53  ;;  %v2627_v61 = vsub.f32 0.0, %v2599_v53 }
 0xd99   : > { %v2604_v56 = vadd.f32 1.0, %v2602_v54  ;;  %v2630_v63 = vmul.f32 %v2628_v58, %v2600_v52 }
 0xd9a   : > { %v2603_v57 = vadd.f32 1.0, %v2601_v55  ;;  %v2629_v2 = vmul.f32 %v2627_v61, %v2599_v53 }
 0xd9b   : > { %5633 = vrcp.f32 %v2604_v56  ;;  %v2633_v5 = vmul.f32 1.442695, %v2630_v63 }
 0xd9c   : > { %5635 = vrcp.f32 %v2603_v57  ;;  %v2631_v11 = vmul.f32 1.442695, %v2629_v2 }
 0xd9d   : > { %5637 = vpow2.f32 %v2633_v5 }
 0xd9e   : > { %5639 = vpow2.f32 %v2631_v11 }
 0xda5   : > { %v5634_v62 = vpop.eup %5633 }
 0xda6   : > { %v5636_v0 = vpop.eup %5635  ;;  %v2610_v1 = vmul.f32 1.0614054, %v5634_v62 }
 0xda7   : > { %v2609_v3 = vmul.f32 1.0614054, %v5636_v0  ;;  %v5638_v21 = vpop.eup %5637 }
 0xda8   : > { %v2612_v4 = vadd.f32 -1.4531521, %v2610_v1  ;;  %v5640_v24 = vpop.eup %5639  ;;  %v2800_v1 = vld [vmem:[%s6597_s18 + $0x8] sm:$0xff] }
 0xda9   : > { %v2611_v6 = vadd.f32 -1.4531521, %v2609_v3  ;;  %v2801_v3 = vld [vmem:[%s6597_s18 + $0x10] sm:$0xff] }
 0xdaa   : > { %v2614_v7 = vmul.f32 %v5634_v62, %v2612_v4  ;;  %v2802_v4 = vld [vmem:[%s6597_s18 + $0x18] sm:$0xff] }
 0xdab   : > { %v2613_v12 = vmul.f32 %v5636_v0, %v2611_v6  ;;  %v5316_v5 = vpack.c.bf16 %v2802_v4, %v2801_v3 }
 0xdac   : > { %v2616_v13 = vadd.f32 1.4214138, %v2614_v7 }
 0xdad   : > { %v2615_v15 = vadd.f32 1.4214138, %v2613_v12 }
 0xdae   : > { %v2618_v16 = vmul.f32 %v5634_v62, %v2616_v13 }
 0xdaf   : > { %v2617_v17 = vmul.f32 %v5636_v0, %v2615_v15 }
 0xdb0   : > { %v2620_v18 = vadd.f32 -0.28449672, %v2618_v16 }
 0xdb1   : > { %v2619_v60 = vadd.f32 -0.28449672, %v2617_v17  ;;  %v4580_v17 = vld [vmem:[%s6598_s7] ss:$0 sm:$0xff]  ;;  %s6601_s7 = smov 120  }
 0xdb2   : > { %v2622_v9 = vmul.f32 %v5634_v62, %v2620_v18 }
 0xdb3   : > { %v2621_v10 = vmul.f32 %v5636_v0, %v2619_v60  ;;  %v4581_v60 = vld [vmem:[%s6599_s1] ss:$0 sm:$0xff]  ;;  %s6600_s1 = smov 88  }
 0xdb4   : > { %v2624_v19 = vadd.f32 0.2548296, %v2622_v9 }
 0xdb5   : > { %v2623_v20 = vadd.f32 0.2548296, %v2621_v10 }
 0xdb6   : > { %v2626_v59 = vmul.f32 %v5634_v62, %v2624_v19 }
 0xdb7   : > { %v2625_v23 = vmul.f32 %v5636_v0, %v2623_v20  ;;  %v2799_v0 = vld [vmem:[%s6597_s18] sm:$0xff] }
 0xdb8   : > { %v2636_v25 = vmul.f32 %v5638_v21, %v2626_v59  ;;  %v5312_v2 = vpack.c.bf16 %v2800_v1, %v2799_v0 }
 0xdb9   : > { %v2635_v26 = vmul.f32 %v5640_v24, %v2625_v23 }
 0xdba   : > { %v2638_v28 = vsub.f32 1.0, %v2636_v25  ;;  %5313 = vmatprep.subr.bf16.mxu1 %v5312_v2 }
 0xdbb   : > { %v2637_v31 = vsub.f32 1.0, %v2635_v26  ;;  %5315 = vmatpush3.bf16.msra.mxu1 %v5312_v2 }
 0xdbc   : > { %v2640_v34 = vmul.f32 %v2638_v28, %v2598_v29  ;;  %5317 = vmatprep.subr.bf16.mxu1 %v5316_v5 }
 0xdbd   : > { %v2639_v37 = vmul.f32 %v2637_v31, %v2597_v35 }
 0xdbe   : > { %v2642_v38 = vadd.f32 1.0, %v2640_v34 }
 0xdbf   : > { %v2641_v40 = vadd.f32 1.0, %v2639_v37  ;;  %5319 = vmatpush3.bf16.msra.mxu1 %v5316_v5 }
 0xdc0   : > { %v2644_v46 = vmul.f32 %v2642_v38, %v2592_v41 }
 0xdc1   : > { %v2643_v45 = vmul.f32 %v2641_v40, %v2591_v39 }
 0xdc3   : > { %5005 = vmatprep.mubr.f32.mxu0 %v2643_v45 }
 0xdc4   : > { %5006 = vmatmul.mubr.f32.vlgmr.msra.gmra.mrb[12].mxu0 %v2644_v46 }
 0xe97   : > { %v5007_v47 = vpop.f32.mrb[12].mxu0 }
 0xe98   : > { %v2737_v32 = vadd.f32 %v5007_v47, %v6255_v42  ;;  %v2727_v50 = vpop.f32.mrb[13].mxu0 }
 0xe99   : > { %v2736_v51 = vadd.f32 %v2727_v50, %v6257_v43 }
 0xe9a   : > { %v2746_v52 = vadd.f32 %v4579_v36, %v2737_v32 }
 0xe9b   : > { %v2745_v53 = vadd.f32 %v4579_v36, %v2736_v51 }
 0xe9c   : > { %v2752_v54 = vmul.f32 %v2746_v52, %v6092_v30 }
 0xe9d   : > { %v2751_v55 = vmul.f32 %v2745_v53, %v6084_v22 }
 0xe9e   : > { %v6305_v56 = vadd.f32 %v2752_v54, %v6098_v33 }
 0xe9f   : > { %v6300_v49 = vadd.f32 %v2751_v55, %v6088_v27 }
 0xea0   : > { %v2760_v42 = vsel %vm1180_vm1, %v6305_v56, 0.0 }
 0xea1   : > { %v2757_v48 = vsel %vm1176_vm0, %v6300_v49, 0.0 }
 0xea2   : > { %2758 = vadd.xlane.f32.xlu0 %v2757_v48 }
 0xea6   : > { %2761 = vadd.xlane.f32.xlu0 %v2760_v42 }
 0xf2f   : > { %v2759_v43 = vpop.xlane.xlu0 %2758 }
 0xf30   : > { %v2763_v30 = vmul.f32 0.03125, %v2759_v43 }
 0xf32   : > { %v2765_v22 = vsub.f32 %v6300_v49, %v2763_v30 }
 0xf33   : > { %v2762_v27 = vpop.xlane.xlu0 %2761 }
 0xf34   : > { %v2764_v57 = vmul.f32 0.03125, %v2762_v27  ;;  %v2767_v58 = vmul.f32 %v2765_v22, %v2765_v22 }
 0xf36   : > { %v2766_v61 = vsub.f32 %v6305_v56, %v2764_v57  ;;  %v2769_v33 = vsel %vm1176_vm0, %v2767_v58, 0.0 }
 0xf37   : > { %2770 = vadd.xlane.f32.xlu0 %v2769_v33 }
 0xf38   : > { %v2768_v62 = vmul.f32 %v2766_v61, %v2766_v61 }
 0xf3a   : > { %v2772_v63 = vsel %vm1180_vm1, %v2768_v62, 0.0 }
 0xf3b   : > { %2773 = vadd.xlane.f32.xlu1 %v2772_v63 }
 0xfc4   : > { %v2771_v6 = vpop.xlane.xlu0 %2770 }
 0xfc5   : > { %v2775_v7 = vmul.f32 0.03125, %v2771_v6 }
 0xfc7   : > { %v2777_v11 = vadd.f32 1e-05, %v2775_v7 }
 0xfc8   : > { %v2774_v12 = vpop.xlane.xlu1 %2773 }
 0xfc9   : > { %5641 = vrsqrt.f32 %v2777_v11  ;;  %v2776_v13 = vmul.f32 0.03125, %v2774_v12 }
 0xfcb   : > { %v2778_v15 = vadd.f32 1e-05, %v2776_v13 }
 0xfcd   : > { %5643 = vrsqrt.f32 %v2778_v15 }
 0xfd3   : > { %v5642_v16 = vpop.eup %5641 }
 0xfd4   : > { %v2781_v18 = vmul.f32 %v5642_v16, %v2765_v22 }
 0xfd6   : > { %v2789_v9 = vmul.f32 %v4580_v17, %v2781_v18 }
 0xfd7   : > { %v5644_v10 = vpop.eup %5643 }
 0xfd8   : > { %v2782_v19 = vmul.f32 %v5644_v10, %v2766_v61  ;;  %v2797_v20 = vadd.f32 %v4581_v60, %v2789_v9 }
 0xfda   : > { %v2790_v59 = vmul.f32 %v4580_v17, %v2782_v19  ;;  %5016 = vmatprep.mubr.msk.f32.mxu1 %vm1176_vm0, %v2797_v20 }
 0xfdc   : > { %v2798_v21 = vadd.f32 %v4581_v60, %v2790_v59 }
 0xfde   : > { %5017 = vmatmul.mubr.msk.f32.vlgmr.msra.gmra.mrb[16].mxu1 %vm1176_vm0, %v2798_v21 }
0x10b1   : > { %v5018_v23 = vpop.f32.mrb[16].mxu1 }
0x10b2   : > { %v2875_v24 = vpop.f32.mrb[17].mxu1  ;;  %v6333_v28 = vmul.f32 0.35355338, %v5018_v23 }
0x10b3   : > { %v6321_v25 = vpack.i.bf16 %v5018_v23, %v2875_v24  ;;  %v6323_v26 = vmul.f32 0.35355338, %v2875_v24 }
0x10b5   : > { %5554 = vrot.lane.b32.xlu0 %v6321_v25, %s5788_s10  ;;  %5023 = vmatprep.mubr.msk.f32.mxu1 %vm1314_vm2, %v6323_v26  ;;  %s6602_s10 = smov 64  }
0x10b9   : > { %5564 = vrot.lane.b32.xlu0 %v6321_v25, %s6600_s1  ;;  %s6603_s1 = smov 56  }
0x10bd   : > { %3087 = vrot.lane.b32.xlu0 %v6323_v26, %s6601_s7 }
0x10c1   : > { %3089 = vrot.lane.b32.xlu0 %v6333_v28, %s6601_s7  ;;  %s6604_s7 = smov 112  }
0x1127   : > { %v5555_v29 = vpop.permute.xlu0 %5554 }
0x1128   : > { %v5557_v31 = vunpack.i.h.bf16 %v5555_v29  ;;  %v5556_v34 = vunpack.i.l.bf16 %v5555_v29 }
0x112a   : > { %v5320_v35 = vpack.c.bf16 %v5557_v31, %v5556_v34 }
0x112b   : > { %v5565_v48 = vpop.permute.xlu0 %5564 }
0x112c   : > { %5322 = vmatprep.subr.msk.bf16.mxu1 %vm6140_vm3, %v5320_v35  ;;  %v5567_v43 = vunpack.i.h.bf16 %v5565_v48  ;;  %v5566_v30 = vunpack.i.l.bf16 %v5565_v48 }
0x112d   : > { %5325 = vmatpush3.bf16.xpose.msk.msra.mxu1 %vm6140_vm3, %v5320_v35 }
0x112e   : > { %v5332_v58 = vpack.c.bf16 %v5567_v43, %v5566_v30 }
0x112f   : > { %v3088_v0 = vpop.permute.xlu0 %3087 }
0x1133   : > { %v3090_v1 = vpop.permute.xlu0 %3089 }
0x1134   : > { %5024 = vmatmul.mubr.msk.f32.vlgmr.msra.gmra.mrb[18].mxu1 %vm1314_vm2, %v6333_v28 }
0x1207   : > { %v5025_v37 = vpop.f32.mrb[18].mxu1 }
0x1208   : > { %v2968_v38 = vpop.f32.mrb[19].mxu1  ;;  %v2980_v40 = vsel %vm1404_vm5, %v5025_v37, -inf }
0x1209   : > { %v2977_v39 = vsel %vm1400_vm4, %v2968_v38, -inf }
0x120a   : > { %2978 = vmax.xlane.f32.xlu1 %v2977_v39 }
0x120e   : > { %2981 = vmax.xlane.f32.xlu1 %v2980_v40 }
0x1297   : > { %v2979_v41 = vpop.xlane.xlu1 %2978 }
0x1298   : > { %v2983_v45 = vsub.f32 %v2968_v38, %v2979_v41 }
0x129a   : > { %v2985_v36 = vmul.f32 1.442695, %v2983_v45 }
0x129b   : > { %v2982_v46 = vpop.xlane.xlu1 %2981 }
0x129c   : > { %v2984_v47 = vsub.f32 %v5025_v37, %v2982_v46 }
0x129e   : > { %v2987_v32 = vmul.f32 1.442695, %v2984_v47 }
0x12a0   : > { %5645 = vpow2.f32 %v2987_v32 }
0x12a1   : > { %5647 = vpow2.f32 %v2985_v36 }
0x12aa   : > { %v5646_v50 = vpop.eup %5645 }
0x12ab   : > { %v2992_v51 = vsel %vm1404_vm5, %v5646_v50, 0.0  ;;  %v5648_v52 = vpop.eup %5647 }
0x12ac   : > { %2993 = vadd.xlane.f32.xlu1 %v2992_v51  ;;  %v2989_v53 = vsel %vm1400_vm4, %v5648_v52, 0.0 }
0x12b0   : > { %2990 = vadd.xlane.f32.xlu1 %v2989_v53 }
0x12c1   : > { %5559 = vrot.lane.b32.xlu1 %v6321_v25, %s6602_s10  ;;  %s6605_s10 = smov 72  }
0x1339   : > { %v2994_v54 = vpop.xlane.xlu1 %2993 }
0x133a   : > { %5649 = vrcp.f32 %v2994_v54 }
0x133d   : > { %v2991_v55 = vpop.xlane.xlu1 %2990 }
0x133e   : > { %5651 = vrcp.f32 %v2991_v55 }
0x1341   : > { %v5560_v42 = vpop.permute.xlu1 %5559 }
0x1342   : > { %v5562_v22 = vunpack.i.h.bf16 %v5560_v42  ;;  %v5561_v27 = vunpack.i.l.bf16 %v5560_v42 }
0x1344   : > { %v5326_v57 = vpack.c.bf16 %v5562_v22, %v5561_v27  ;;  %v5650_v61 = vpop.eup %5649 }
0x1345   : > { %v2998_v63 = vmul.f32 %v5650_v61, %v5646_v50 }
0x1346   : > { %5328 = vmatprep.subr.msk.bf16.mxu1 %vm6160_vm8, %v5326_v57 }
0x1347   : > { %5331 = vmatpush3.bf16.msk.msra.mxu1 %vm6160_vm8, %v5326_v57 }
0x1348   : > { %v5652_v33 = vpop.eup %5651  ;;  %5334 = vmatprep.subr.msk.bf16.mxu1 %vm6140_vm3, %v5332_v58 }
0x1349   : > { %v2997_v62 = vmul.f32 %v5652_v33, %v5648_v52 }
0x134b   : > { %5030 = vmatprep.mubr.msk.f32.mxu1 %vm1400_vm4, %v2997_v62 }
0x134c   : > { %5031 = vmatmul.mubr.msk.f32.vlgmr.msra.gmra.mrb[20].mxu1 %vm1400_vm4, %v2998_v63 }
0x134d   : > { %5037 = vmatprep.mubr.msk.f32.mxu1 %vm1314_vm2, %v3088_v0 }
0x1350   : > { %5337 = vmatpush3.bf16.xpose.msk.msra.mxu1 %vm6140_vm3, %v5332_v58 }
0x1357   : > { %5038 = vmatmul.mubr.msk.f32.vlgmr.msra.gmra.mrb[22].mxu1 %vm1314_vm2, %v3090_v1 }
0x141f   : > { %v6361_v2 = vpop.f32.mrb[20].mxu1 }
0x1420   : > { %v6363_v3 = vpop.f32.mrb[21].mxu1 }
0x142a   : > { %v5039_v4 = vpop.f32.mrb[22].mxu1 }
0x142b   : > { %v3169_v5 = vpop.f32.mrb[23].mxu1  ;;  %v3181_v6 = vsel %vm1404_vm5, %v5039_v4, -inf }
0x142c   : > { %3182 = vmax.xlane.f32.xlu0 %v3181_v6  ;;  %v3178_v7 = vsel %vm1400_vm4, %v3169_v5, -inf }
0x142d   : > { %3179 = vmax.xlane.f32.xlu1 %v3178_v7 }
0x143e   : > { %5569 = vrot.lane.b32.xlu1 %v6321_v25, %s6603_s1  ;;  %s6607_s1 = smov 80  }
0x1442   : > { %3450 = vrot.lane.b32.xlu1 %v6323_v26, %s6604_s7 }
0x1446   : > { %3452 = vrot.lane.b32.xlu1 %v6333_v28, %s6604_s7  ;;  %s6608_s7 = sld [smem:[#allocation14_spill]] }
0x144a   : > { %5579 = vrot.lane.b32.xlu1 %v6321_v25, %s6605_s10  ;;  %s6610_s10 = smov 40  }
0x144c   : > { %v2748_v50 = vld [vmem:[%s6608_s7 + $0x8] sm:$0xff]  ;;  %v2747_v51 = vld [vmem:[%s6608_s7] sm:$0xff] }
0x144d   : > { %5047 = vmatprep.subr.mxu0 %v2748_v50 }
0x144e   : > { %3736 = vrot.lane.b32.xlu1 %v6333_v28, %s6606_s3  ;;  %5048 = vmatpush3.msra.mxu0 %v2748_v50 }
0x144f   : > { %5052 = vmatprep.subr.mxu0 %v2747_v51 }
0x14b9   : > { %v3183_v11 = vpop.xlane.xlu0 %3182 }
0x14ba   : > { %v3185_v12 = vsub.f32 %v5039_v4, %v3183_v11  ;;  %v3180_v13 = vpop.xlane.xlu1 %3179 }
0x14bb   : > { %v3184_v15 = vsub.f32 %v3169_v5, %v3180_v13 }
0x14bc   : > { %v3188_v16 = vmul.f32 1.442695, %v3185_v12 }
0x14bd   : > { %v3186_v17 = vmul.f32 1.442695, %v3184_v15 }
0x14be   : > { %5653 = vpow2.f32 %v3188_v16  ;;  %v5570_v18 = vpop.permute.xlu1 %5569 }
0x14bf   : > { %v5572_v60 = vunpack.i.h.bf16 %v5570_v18  ;;  %v5571_v9 = vunpack.i.l.bf16 %v5570_v18  ;;  %5655 = vpow2.f32 %v3186_v17 }
0x14c1   : > { %v5338_v10 = vpack.c.bf16 %v5572_v60, %v5571_v9 }
0x14c2   : > { %v3451_v23 = vpop.permute.xlu1 %3450 }
0x14c3   : > { %5340 = vmatprep.subr.msk.bf16.mxu1 %vm6160_vm8, %v5338_v10 }
0x14c4   : > { %5343 = vmatpush3.bf16.msk.msra.mxu1 %vm6160_vm8, %v5338_v10 }
0x14c6   : > { %v3453_v29 = vpop.permute.xlu1 %3452 }
0x14c8   : > { %v5654_v19 = vpop.eup %5653 }
0x14c9   : > { %v3193_v20 = vsel %vm1404_vm5, %v5654_v19, 0.0  ;;  %v5656_v59 = vpop.eup %5655 }
0x14ca   : > { %3194 = vadd.xlane.f32.xlu0 %v3193_v20  ;;  %v3190_v21 = vsel %vm1400_vm4, %v5656_v59, 0.0  ;;  %v5580_v38 = vpop.permute.xlu1 %5579  ;;  %v2749_v20 = vld [vmem:[%s6608_s7 + $0x10] sm:$0xff] }
0x14cb   : > { %v5582_v41 = vunpack.i.h.bf16 %v5580_v38  ;;  %v5581_v45 = vunpack.i.l.bf16 %v5580_v38 }
0x14cd   : > { %v5356_v47 = vpack.c.bf16 %v5582_v41, %v5581_v45 }
0x14ce   : > { %3191 = vadd.xlane.f32.xlu0 %v3190_v21  ;;  %v3737_v32 = vpop.permute.xlu1 %3736 }
0x14e4   : > { %5574 = vrot.lane.b32.xlu0 %v6321_v25, %s6607_s1  ;;  %s6611_s1 = sld [smem:[#allocation15_spill]] }
0x14e8   : > { %3734 = vrot.lane.b32.xlu0 %v6323_v26, %s6606_s3  ;;  %s6609_s3 = smov 48  }
0x1557   : > { %v3195_v24 = vpop.xlane.xlu0 %3194 }
0x1558   : > { %5657 = vrcp.f32 %v3195_v24 }
0x155b   : > { %v3192_v28 = vpop.xlane.xlu0 %3191 }
0x155c   : > { %5659 = vrcp.f32 %v3192_v28 }
0x155f   : > { %v5575_v31 = vpop.permute.xlu0 %5574 }
0x1560   : > { %v5577_v34 = vunpack.i.h.bf16 %v5575_v31  ;;  %v5576_v35 = vunpack.i.l.bf16 %v5575_v31 }
0x1562   : > { %v5344_v37 = vpack.c.bf16 %v5577_v34, %v5576_v35  ;;  %v5658_v39 = vpop.eup %5657 }
0x1563   : > { %v3199_v46 = vmul.f32 %v5658_v39, %v5654_v19  ;;  %v3735_v36 = vpop.permute.xlu0 %3734 }
0x1564   : > { %5346 = vmatprep.subr.msk.bf16.mxu1 %vm6140_vm3, %v5344_v37 }
0x1566   : > { %v5660_v40 = vpop.eup %5659 }
0x1567   : > { %v3198_v26 = vmul.f32 %v5660_v40, %v5656_v59 }
0x1569   : > { %5044 = vmatprep.mubr.msk.f32.mxu1 %vm1400_vm4, %v3198_v26  ;;  %v2750_v26 = vld [vmem:[%s6608_s7 + $0x18] sm:$0xff] }
0x156a   : > { %5045 = vmatmul.mubr.msk.f32.vlgmr.msra.gmra.mrb[24].mxu1 %vm1400_vm4, %v3199_v46 }
0x156b   : > { %5349 = vmatpush3.bf16.xpose.msk.msra.mxu1 %vm6140_vm3, %v5344_v37  ;;  %5061 = vmatprep.mubr.msk.f32.mxu1 %vm1314_vm2, %v3451_v23 }
0x156c   : > { %5358 = vmatprep.subr.msk.bf16.mxu1 %vm6140_vm3, %v5356_v47 }
0x1572   : > { %5062 = vmatmul.mubr.msk.f32.vlgmr.msra.gmra.mrb[26].mxu1 %vm1314_vm2, %v3453_v29 }
0x1573   : > { %5361 = vmatpush3.bf16.xpose.msk.msra.mxu1 %vm6140_vm3, %v5356_v47  ;;  %5080 = vmatprep.mubr.msk.f32.mxu1 %vm1314_vm2, %v3735_v36 }
0x157a   : > { %5081 = vmatmul.mubr.msk.f32.vlgmr.msra.gmra.mrb[28].mxu1 %vm1314_vm2, %v3737_v32  ;;  %v4620_v32 = vld [vmem:[%s6611_s1] ss:$0 sm:$0xff]  ;;  %s6614_s1 = sld [smem:[#allocation17_spill]] }
0x163d   : > { %v5046_v52 = vpop.f32.mrb[24].mxu1 }
0x163e   : > { %v3279_v53 = vpop.f32.mrb[25].mxu1 }
0x163f   : > { %5049 = vmatprep.mubr.msk.f32.mxu0 %vm1314_vm2, %v3279_v53 }
0x1640   : > { %5050 = vmatmul.mubr.msk.f32.vlgmr.msra.gmra.mrb[14].mxu0 %vm1314_vm2, %v5046_v52 }
0x1641   : > { %5054 = vmatprep.mubr.msk.f32.mxu0 %vm1314_vm2, %v6363_v3  ;;  %5053 = vmatpush3.msra.mxu0 %v2747_v51 }
0x1645   : > { %v5063_v14 = vpop.f32.mrb[26].mxu1 }
0x1646   : > { %v3532_v54 = vpop.f32.mrb[27].mxu1  ;;  %v3544_v55 = vsel %vm1404_vm5, %v5063_v14, -inf }
0x1647   : > { %3545 = vmax.xlane.f32.xlu1 %v3544_v55  ;;  %v3541_v48 = vsel %vm1400_vm4, %v3532_v54, -inf }
0x1648   : > { %3542 = vmax.xlane.f32.xlu0 %v3541_v48  ;;  %5055 = vmatmul.mubr.msk.f32.vlgmr.msra.gmra.mrb[14].mxu0 %vm1314_vm2, %v6361_v2 }
0x164d   : > { %v5082_v42 = vpop.f32.mrb[28].mxu1 }
0x164e   : > { %v3816_v43 = vpop.f32.mrb[29].mxu1  ;;  %v3828_v22 = vsel %vm1404_vm5, %v5082_v42, -inf }
0x164f   : > { %v3825_v30 = vsel %vm1400_vm4, %v3816_v43, -inf }
0x1650   : > { %3826 = vmax.xlane.f32.xlu1 %v3825_v30 }
0x1654   : > { %3829 = vmax.xlane.f32.xlu1 %v3828_v22 }
0x16d4   : > { %v3546_v27 = vpop.xlane.xlu1 %3545 }
0x16d5   : > { %v3548_v57 = vsub.f32 %v5063_v14, %v3546_v27  ;;  %v3543_v58 = vpop.xlane.xlu0 %3542 }
0x16d6   : > { %v3547_v61 = vsub.f32 %v3532_v54, %v3543_v58 }
0x16d7   : > { %v3551_v33 = vmul.f32 1.442695, %v3548_v57 }
0x16d8   : > { %v3549_v62 = vmul.f32 1.442695, %v3547_v61 }
0x16d9   : > { %5661 = vpow2.f32 %v3551_v33 }
0x16da   : > { %5663 = vpow2.f32 %v3549_v62 }
0x16dd   : > { %v3827_v63 = vpop.xlane.xlu1 %3826 }
0x16de   : > { %v3831_v0 = vsub.f32 %v3816_v43, %v3827_v63 }
0x16e0   : > { %v3833_v4 = vmul.f32 1.442695, %v3831_v0 }
0x16e1   : > { %v3830_v1 = vpop.xlane.xlu1 %3829 }
0x16e2   : > { %v3832_v2 = vsub.f32 %v5082_v42, %v3830_v1 }
0x16e3   : > { %v5662_v3 = vpop.eup %5661 }
0x16e4   : > { %v3835_v5 = vmul.f32 1.442695, %v3832_v2  ;;  %v3556_v6 = vsel %vm1404_vm5, %v5662_v3, 0.0  ;;  %v5664_v7 = vpop.eup %5663 }
0x16e5   : > { %3557 = vadd.xlane.f32.xlu0 %v3556_v6  ;;  %v3553_v11 = vsel %vm1400_vm4, %v5664_v7, 0.0 }
0x16e6   : > { %5665 = vpow2.f32 %v3835_v5 }
0x16e7   : > { %5667 = vpow2.f32 %v3833_v4 }
0x16e9   : > { %3554 = vadd.xlane.f32.xlu0 %v3553_v11 }
0x16f0   : > { %v5666_v12 = vpop.eup %5665 }
0x16f1   : > { %v3840_v13 = vsel %vm1404_vm5, %v5666_v12, 0.0  ;;  %v5668_v15 = vpop.eup %5667 }
0x16f2   : > { %3841 = vadd.xlane.f32.xlu1 %v3840_v13  ;;  %v3837_v16 = vsel %vm1400_vm4, %v5668_v15, 0.0  ;;  %v4622_v13 = vld [vmem:[%s6614_s1] ss:$0 sm:$0xff]  ;;  %s6617_s1 = sld [smem:[#allocation21_spill]] }
0x16f6   : > { %3838 = vadd.xlane.f32.xlu1 %v3837_v16 }
0x16ff   : > { %5584 = vrot.lane.b32.xlu0 %v6321_v25, %s6609_s3  ;;  %s6612_s3 = sld [smem:[#allocation18_spill]] }
0x1705   : > { %v4073_v58 = vld [vmem:[%s6612_s3] sm:$0xff]  ;;  %v4074_v61 = vld [vmem:[%s6612_s3 + $0x8] sm:$0xff]  ;;  %v4075_v62 = vld [vmem:[%s6612_s3 + $0x10] sm:$0xff] }
0x1706   : > { %v5368_v33 = vpack.c.bf16 %v4074_v61, %v4073_v58  ;;  %v4076_v63 = vld [vmem:[%s6612_s3 + $0x18] sm:$0xff]  ;;  %s4628_s3 = sshll.u32 %s5991_s0, 4  ;;  %s5804_s0 = smov [#allocation2]  }
0x1707   : > { %5589 = vrot.lane.b32.xlu1 %v6321_v25, %s6610_s10  ;;  %s6613_s10 = sld [smem:[#allocation16_spill]]  ;;  %v5372_v0 = vpack.c.bf16 %v4076_v63, %v4075_v62  ;;  %s6501_s7 = scalar_lea.hbm %s5968_s20, %s4628_s3 }
0x1708   : > { %5369 = vmatprep.subr.bf16.mxu1 %v5368_v33 }
0x1709   : > { %5371 = vmatpush3.bf16.msra.mxu1 %v5368_v33 }
0x170a   : > { %5373 = vmatprep.subr.bf16.mxu1 %v5372_v0 }
0x170d   : > { %5375 = vmatpush3.bf16.msra.mxu1 %v5372_v0  ;;  %v4621_v11 = vld [vmem:[%s6613_s10] ss:$0 sm:$0xff]  ;;  %s6616_s10 = sld [smem:[#allocation19_spill]] }
0x1772   : > { %v3558_v17 = vpop.xlane.xlu0 %3557 }
0x1773   : > { %5669 = vrcp.f32 %v3558_v17 }
0x1776   : > { %v3555_v18 = vpop.xlane.xlu0 %3554 }
0x1777   : > { %5671 = vrcp.f32 %v3555_v18 }
0x177a   : > { %v5585_v60 = vpop.permute.xlu0 %5584 }
0x177b   : > { %v5587_v9 = vunpack.i.h.bf16 %v5585_v60  ;;  %v5586_v10 = vunpack.i.l.bf16 %v5585_v60 }
0x177d   : > { %v5350_v19 = vpack.c.bf16 %v5587_v9, %v5586_v10  ;;  %v5670_v21 = vpop.eup %5669  ;;  %v4219_v10 = vld [vmem:[%s6615_s5] sm:$0xff] }
0x177e   : > { %v3562_v24 = vmul.f32 %v5670_v21, %v5662_v3  ;;  %v4222_v21 = vld [vmem:[%s6615_s5 + $0x18] sm:$0xff] }
0x177f   : > { %v3842_v59 = vpop.xlane.xlu1 %3841  ;;  %5352 = vmatprep.subr.msk.bf16.mxu0 %vm6160_vm8, %v5350_v19 }
0x1780   : > { %5355 = vmatpush3.bf16.msk.msra.mxu0 %vm6160_vm8, %v5350_v19  ;;  %v4220_v19 = vld [vmem:[%s6615_s5 + $0x8] sm:$0xff] }
0x1781   : > { %v5672_v23 = vpop.eup %5671  ;;  %5071 = vmatprep.subr.mxu0 %v2749_v20 }
0x1782   : > { %v3561_v25 = vmul.f32 %v5672_v23, %v5664_v7 }
0x1783   : > { %v3839_v28 = vpop.xlane.xlu1 %3838 }
0x1784   : > { %5068 = vmatprep.mubr.msk.f32.mxu0 %vm1400_vm4, %v3561_v25  ;;  %5673 = vrcp.f32 %v3839_v28  ;;  %v4223_v25 = vld [vmem:[%s6615_s5 + $0x20] sm:$0xff] }
0x1785   : > { %5069 = vmatmul.mubr.msk.f32.vlgmr.msra.gmra.mrb[16].mxu0 %vm1400_vm4, %v3562_v24  ;;  %5675 = vrcp.f32 %v3842_v59  ;;  %v4221_v59 = vld [vmem:[%s6615_s5 + $0x10] sm:$0xff]  ;;  %v4224_v24 = vld [vmem:[%s6615_s5 + $0x28] sm:$0xff] }
0x1786   : > { %5072 = vmatpush3.msra.mxu0 %v2749_v20  ;;  %v5376_v20 = vpack.c.bf16 %v4220_v19, %v4219_v10  ;;  %v5380_v23 = vpack.c.bf16 %v4222_v21, %v4221_v59  ;;  %v5384_v28 = vpack.c.bf16 %v4224_v24, %v4223_v25 }
0x1787   : > { %v5590_v29 = vpop.permute.xlu1 %5589 }
0x1788   : > { %v5592_v31 = vunpack.i.h.bf16 %v5590_v29  ;;  %v5591_v34 = vunpack.i.l.bf16 %v5590_v29  ;;  %v4225_v29 = vld [vmem:[%s6615_s5 + $0x30] sm:$0xff] }
0x178a   : > { %v5362_v35 = vpack.c.bf16 %v5592_v31, %v5591_v34  ;;  %v4226_v31 = vld [vmem:[%s6615_s5 + $0x38] sm:$0xff] }
0x178b   : > { %v5388_v34 = vpack.c.bf16 %v4226_v31, %v4225_v29 }
0x178c   : > { %5364 = vmatprep.subr.msk.bf16.mxu0 %vm6160_vm8, %v5362_v35 }
0x178e   : > { %v5674_v37 = vpop.eup %5673 }
0x178f   : > { %v5676_v40 = vpop.eup %5675  ;;  %v3845_v41 = vmul.f32 %v5674_v37, %v5668_v15  ;;  %v4228_v37 = vld [vmem:[%s6615_s5 + $0x48] sm:$0xff] }
0x1790   : > { %v3846_v45 = vmul.f32 %v5676_v40, %v5666_v12  ;;  %v4230_v40 = vld [vmem:[%s6615_s5 + $0x58] sm:$0xff] }
0x1858   : > { %v5070_v38 = vpop.f32.mrb[16].mxu0 }
0x1859   : > { %v3642_v39 = vpop.f32.mrb[17].mxu0 }
0x185a   : > { %5073 = vmatprep.mubr.msk.f32.mxu0 %vm1314_vm2, %v3642_v39  ;;  %v4229_v39 = vld [vmem:[%s6615_s5 + $0x50] sm:$0xff] }
0x185b   : > { %5074 = vmatmul.mubr.msk.f32.vlgmr.msra.gmra.mrb[14].mxu0 %vm1314_vm2, %v5070_v38 }
0x185c   : > { %5367 = vmatpush3.bf16.msk.msra.mxu0 %vm6160_vm8, %v5362_v35  ;;  %5087 = vmatprep.mubr.msk.f32.mxu0 %vm1400_vm4, %v3845_v41  ;;  %v4227_v35 = vld [vmem:[%s6615_s5 + $0x40] sm:$0xff]  ;;  %v5396_v41 = vpack.c.bf16 %v4230_v40, %v4229_v39 }
0x185d   : > { %5090 = vmatprep.subr.mxu0 %v2750_v26  ;;  %v5392_v38 = vpack.c.bf16 %v4228_v37, %v4227_v35 }
0x185f   : > { %5088 = vmatmul.mubr.msk.f32.vlgmr.msra.gmra.mrb[18].mxu0 %vm1400_vm4, %v3846_v45  ;;  %v4231_v45 = vld [vmem:[%s6615_s5 + $0x60] sm:$0xff] }
0x1860   : > { %5091 = vmatpush3.msra.mxu0 %v2750_v26  ;;  %v4232_v26 = vld [vmem:[%s6615_s5 + $0x68] sm:$0xff] }
0x1861   : > { %5377 = vmatprep.subr.bf16.mxu0 %v5376_v20 }
0x1932   : > { %v5089_v46 = vpop.f32.mrb[18].mxu0 }
0x1933   : > { %v3926_v47 = vpop.f32.mrb[19].mxu0 }
0x1934   : > { %5092 = vmatprep.mubr.msk.f32.mxu0 %vm1314_vm2, %v3926_v47  ;;  %v4233_v47 = vld [vmem:[%s6615_s5 + $0x70] sm:$0xff] }
0x1935   : > { %5093 = vmatmul.mubr.msk.f32.vlgmr.msra.gmra.mrb[14].mxu0 %vm1314_vm2, %v5089_v46  ;;  %v5400_v46 = vpack.c.bf16 %v4232_v26, %v4231_v45  ;;  %v4626_v26 = vld [vmem:[%s6617_s1] ss:$0 sm:$0xff]  ;;  %s949_s1 = sand.u32 1, %s5747_s23  }
0x1936   : > { %5379 = vmatpush3.bf16.msra.mxu0 %v5376_v20 }
0x1937   : > { %5381 = vmatprep.subr.bf16.mxu0 %v5380_v23 }
0x193a   : > { %5383 = vmatpush3.bf16.msra.mxu0 %v5380_v23 }
0x193b   : > { %5385 = vmatprep.subr.bf16.mxu0 %v5384_v28 }
0x193e   : > { %5387 = vmatpush3.bf16.msra.mxu0 %v5384_v28 }
0x193f   : > { %5389 = vmatprep.subr.bf16.mxu0 %v5388_v34 }
0x1942   : > { %5391 = vmatpush3.bf16.msra.mxu0 %v5388_v34 }
0x1943   : > { %5393 = vmatprep.subr.bf16.mxu0 %v5392_v38 }
0x1946   : > { %5395 = vmatpush3.bf16.msra.mxu0 %v5392_v38 }
0x1947   : > { %5397 = vmatprep.subr.bf16.mxu0 %v5396_v41 }
0x194a   : > { %5399 = vmatpush3.bf16.msra.mxu0 %v5396_v41 }
0x194b   : > { %5401 = vmatprep.subr.bf16.mxu0 %v5400_v46 }
0x194e   : > { %5403 = vmatpush3.bf16.msra.mxu0 %v5400_v46 }
0x1a08   : > { %v5094_v36 = vpop.f32.mrb[14].mxu0 }
0x1a09   : > { %v4019_v50 = vadd.f32 %v5094_v36, %v6305_v56  ;;  %v4007_v44 = vpop.f32.mrb[15].mxu0  ;;  %v4234_v36 = vld [vmem:[%s6615_s5 + $0x78] sm:$0xff] }
0x1a0a   : > { %v4018_v51 = vadd.f32 %v4007_v44, %v6300_v49 }
0x1a0b   : > { %v6442_v52 = vadd.f32 %v4620_v32, %v4019_v50  ;;  %v4623_v50 = vld [vmem:[%s6616_s10] ss:$0 sm:$0xff]  ;;  %s6618_s10 = sld [smem:[#allocation22_spill]] }
0x1a0c   : > { %v6444_v53 = vadd.f32 %v4620_v32, %v4018_v51  ;;  %v5404_v32 = vpack.c.bf16 %v4234_v36, %v4233_v47 }
0x1a0d   : > { %v4034_v14 = vsel %vm1180_vm1, %v6442_v52, 0.0 }
0x1a0e   : > { %4035 = vadd.xlane.f32.xlu1 %v4034_v14  ;;  %v4031_v54 = vsel %vm1176_vm0, %v6444_v53, 0.0  ;;  %5405 = vmatprep.subr.bf16.mxu0 %v5404_v32 }
0x1a0f   : > { %4032 = vadd.xlane.f32.xlu0 %v4031_v54  ;;  %5407 = vmatpush3.bf16.msra.mxu0 %v5404_v32 }
0x1a9b   : > { %v4036_v55 = vpop.xlane.xlu1 %4035 }
0x1a9c   : > { %v4038_v48 = vmul.f32 0.03125, %v4036_v55  ;;  %v4033_v56 = vpop.xlane.xlu0 %4032 }
0x1a9d   : > { %v4037_v49 = vmul.f32 0.03125, %v4033_v56 }
0x1a9e   : > { %v4040_v42 = vsub.f32 %v6442_v52, %v4038_v48 }
0x1a9f   : > { %v4039_v43 = vsub.f32 %v6444_v53, %v4037_v49 }
0x1aa0   : > { %v4042_v27 = vmul.f32 %v4040_v42, %v4040_v42 }
0x1aa1   : > { %v4041_v30 = vmul.f32 %v4039_v43, %v4039_v43 }
0x1aa2   : > { %v4046_v57 = vsel %vm1180_vm1, %v4042_v27, 0.0 }
0x1aa3   : > { %v4043_v22 = vsel %vm1176_vm0, %v4041_v30, 0.0 }
0x1aa4   : > { %4044 = vadd.xlane.f32.xlu0 %v4043_v22 }
0x1aa8   : > { %4047 = vadd.xlane.f32.xlu0 %v4046_v57 }
0x1b31   : > { %v4045_v1 = vpop.xlane.xlu0 %4044 }
0x1b32   : > { %v4049_v2 = vmul.f32 0.03125, %v4045_v1 }
0x1b34   : > { %v4051_v3 = vadd.f32 1e-05, %v4049_v2 }
0x1b35   : > { %v4048_v4 = vpop.xlane.xlu0 %4047 }
0x1b36   : > { %5677 = vrsqrt.f32 %v4051_v3  ;;  %v4050_v5 = vmul.f32 0.03125, %v4048_v4 }
0x1b38   : > { %v4052_v6 = vadd.f32 1e-05, %v4050_v5 }
0x1b3a   : > { %5679 = vrsqrt.f32 %v4052_v6 }
0x1b40   : > { %v5678_v7 = vpop.eup %5677 }
0x1b41   : > { %v4055_v12 = vmul.f32 %v5678_v7, %v4039_v43 }
0x1b43   : > { %v4063_v15 = vmul.f32 %v4621_v11, %v4055_v12 }
0x1b44   : > { %v5680_v16 = vpop.eup %5679 }
0x1b45   : > { %v4056_v17 = vmul.f32 %v5680_v16, %v4040_v42  ;;  %v4071_v18 = vadd.f32 %v4622_v13, %v4063_v15 }
0x1b47   : > { %v4064_v60 = vmul.f32 %v4621_v11, %v4056_v17  ;;  %5103 = vmatprep.mubr.msk.f32.mxu1 %vm1176_vm0, %v4071_v18 }
0x1b49   : > { %v4072_v9 = vadd.f32 %v4622_v13, %v4064_v60 }
0x1b4b   : > { %5104 = vmatmul.mubr.msk.f32.vlgmr.msra.gmra.mrb[30].mxu1 %vm1176_vm0, %v4072_v9 }
0x1c1e   : > { %v5105_v44 = vpop.f32.mrb[30].mxu1 }
0x1c1f   : > { %v4162_v51 = vadd.f32 %v5105_v44, %v4623_v50  ;;  %v4156_v14 = vpop.f32.mrb[31].mxu1 }
0x1c20   : > { %v4157_v54 = vadd.f32 %v4623_v50, %v4156_v14  ;;  %v5691_v50 = vld [vmem:[%s5823_s13 + $0x8] sm:$0x3]  ;;  %v5692_v14 = vld [vmem:[%s5823_s13] sm:$0xff] }
0x1c21   : > { %v4168_v55 = vmul.f32 0.70710677, %v4162_v51  ;;  %v4166_v39 = vmul.f32 0.5, %v4162_v51 }
0x1c22   : > { %v4167_v48 = vmul.f32 0.70710677, %v4157_v54  ;;  %v4165_v37 = vmul.f32 0.5, %v4157_v54 }
0x1c23   : > { %v4174_v56 = vand.u32 2147483647, %v4168_v55  ;;  %vm4170_vm11 = vcmp.ge.f32.partialorder %v4168_v55, 0.0 }
0x1c24   : > { %v4173_v49 = vand.u32 2147483647, %v4167_v48  ;;  %vm4169_vm12 = vcmp.ge.f32.partialorder %v4167_v48, 0.0  ;;  %v4172_v24 = vsel %vm4170_vm11, 1.0, %v5800_v8 }
0x1c25   : > { %v4176_v42 = vmul.f32 0.3275911, %v4174_v56  ;;  %v4202_v27 = vsub.f32 0.0, %v4174_v56  ;;  %v4171_v31 = vsel %vm4169_vm12, 1.0, %v5800_v8 }
0x1c26   : > { %v4175_v43 = vmul.f32 0.3275911, %v4173_v49  ;;  %v4201_v57 = vsub.f32 0.0, %v4173_v49 }
0x1c27   : > { %v4178_v30 = vadd.f32 1.0, %v4176_v42  ;;  %v4204_v61 = vmul.f32 %v4202_v27, %v4174_v56 }
0x1c28   : > { %v4177_v22 = vadd.f32 1.0, %v4175_v43  ;;  %v4203_v63 = vmul.f32 %v4201_v57, %v4173_v49 }
0x1c29   : > { %5681 = vrcp.f32 %v4178_v30  ;;  %v4207_v2 = vmul.f32 1.442695, %v4204_v61 }
0x1c2a   : > { %5683 = vrcp.f32 %v4177_v22  ;;  %v4205_v5 = vmul.f32 1.442695, %v4203_v63  ;;  %v4351_v63 = vld [vmem:[%s6586_s4 + $0x8] sm:$0xff] }
0x1c2b   : > { %5685 = vpow2.f32 %v4207_v2  ;;  %v4352_v2 = vld [vmem:[%s6586_s4 + $0x10] sm:$0xff] }
0x1c2c   : > { %5687 = vpow2.f32 %v4205_v5  ;;  %v5803_v5 = vmov 0.0  }
0x1c2d   : > { %5149 = vmatprep.mubr.msk.f32.mxu1 %vm5802_vm13, %v5803_v5 }
0x1c33   : > { %v5682_v58 = vpop.eup %5681 }
0x1c34   : > { %v5684_v33 = vpop.eup %5683  ;;  %v4184_v62 = vmul.f32 1.0614054, %v5682_v58 }
0x1c35   : > { %v4183_v0 = vmul.f32 1.0614054, %v5684_v33  ;;  %v5686_v19 = vpop.eup %5685 }
0x1c36   : > { %v4186_v1 = vadd.f32 -1.4531521, %v4184_v62  ;;  %v5688_v59 = vpop.eup %5687  ;;  %v4350_v62 = vld [vmem:[%s6586_s4] sm:$0xff] }
0x1c37   : > { %v4185_v3 = vadd.f32 -1.4531521, %v4183_v0  ;;  %v5409_v0 = vpack.c.bf16 %v4351_v63, %v4350_v62 }
0x1c38   : > { %v4188_v4 = vmul.f32 %v5682_v58, %v4186_v1  ;;  %v5801_v1 = vmov 0.0|0.0  }
0x1c39   : > { %v4187_v6 = vmul.f32 %v5684_v33, %v4185_v3  ;;  %5408 = vmatprep.subr.bf16.mxu1 %v5801_v1  ;;  %v4353_v3 = vld [vmem:[%s6586_s4 + $0x18] sm:$0xff]  ;;  %s950_s4 = scalar_lea.vmem [#allocation2], %s949_s1 }
0x1c3a   : > { %v4190_v7 = vadd.f32 1.4214138, %v4188_v4  ;;  %5410 = vmatpush3.bf16.msra.mxu1 %v5409_v0  ;;  %v5412_v4 = vpack.c.bf16 %v4353_v3, %v4352_v2  ;;  %s4442_s5 = sshll.u32 %s950_s4, 4  ;;  %s6503_s5 = int_to_ptr.vmem [resolvable:$true] %s4442_s5 }
0x1c3b   : > { %v4189_v11 = vadd.f32 1.4214138, %v4187_v6  ;;  %5411 = vmatprep.subr.bf16.mxu1 %v5801_v1  ;;  %s5693_s8 = scalar_lea.vmem %s6503_s5, 16 }
0x1c3c   : > { %v4192_v12 = vmul.f32 %v5682_v58, %v4190_v7  ;;  %p5694_p11 = scmp.ne.s32.totalorder %s6503_s5, %s5693_s8 }
0x1c3d   : > { %v4191_v13 = vmul.f32 %v5684_v33, %v4189_v11 }
0x1c3e   : > { %v4194_v15 = vadd.f32 -0.28449672, %v4192_v12  ;;  %5413 = vmatpush3.bf16.msra.mxu1 %v5412_v4  ;;  %p5695_p12 = pnand %p5694_p11, %p6008_p5 }
0x1c3f   : > { %v4193_v16 = vadd.f32 -0.28449672, %v4191_v13  ;;  %v4333_v13 = vld [vmem:[%s6618_s10] sm:$0x1]  ;;  %s4430_s10 = scalar_lea.sflag [#allocation3], %s949_s1 }
0x1c40   : > { %v4196_v17 = vmul.f32 %v5682_v58, %v4194_v15  ;;  %p5696_p13 = pneg %p5695_p12 }
0x1c41   : > { %v4195_v18 = vmul.f32 %v5684_v33, %v4193_v16  ;;  %v4334_v16 = vld [vmem:[%s5953_s27] sm:$0x1] }
0x1c42   : > { %v4198_v60 = vadd.f32 0.2548296, %v4196_v17 }
0x1c43   : > { %v4197_v9 = vadd.f32 0.2548296, %v4195_v18 }
0x1c44   : > { %v4200_v10 = vmul.f32 %v5682_v58, %v4198_v60  ;;  %v4354_v60 = vld [vmem:[%s6619_s6] sm:$0x1]  ;;  %s5697_s6 = sshll.u32 %s5804_s0, 4  ;;  %s5698_s6 = int_to_ptr.vmem [resolvable:$false] %s5697_s6 }
0x1c45   : > { %v4199_v20 = vmul.f32 %v5684_v33, %v4197_v9  ;;  %s5699_s9 = scalar_lea.vmem %s5698_s6, 32  ;;  %p5700_p0 = scmp.lt.s32.totalorder %s6503_s5, %s5698_s6 }
0x1c46   : > { %v4210_v21 = vmul.f32 %v5686_v19, %v4200_v10  ;;  %p5701_p1 = scmp.lt.s32.totalorder %s5699_s9, %s5693_s8 }
0x1c47   : > { %v4209_v23 = vmul.f32 %v5688_v59, %v4199_v20 }
0x1c48   : > { %v4212_v25 = vsub.f32 1.0, %v4210_v21  ;;  %p5702_p2 = por %p5701_p1, %p5700_p0 }
0x1c49   : > { %v4211_v28 = vsub.f32 1.0, %v4209_v23 }
0x1c4a   : > { %v4214_v29 = vmul.f32 %v4212_v25, %v4172_v24  ;;  %p5703_p3 = pnand %p5702_p2, %p5696_p13 }
0x1c4b   : > { %v4213_v34 = vmul.f32 %v4211_v28, %v4171_v31 }
0x1c4c   : > { %v4216_v35 = vadd.f32 1.0, %v4214_v29 }
0x1c4d   : > { %v4215_v38 = vadd.f32 1.0, %v4213_v34 }
0x1c4e   : > { %v4218_v41 = vmul.f32 %v4216_v35, %v4166_v39 }
0x1c4f   : > { %v4217_v40 = vmul.f32 %v4215_v38, %v4165_v37 }
0x1c51   : > { %5138 = vmatprep.mubr.f32.mxu0 %v4217_v40 }
0x1c52   : > { %5139 = vmatmul.mubr.f32.vlgmr.msra.gmra.mrb[20].mxu0 %v4218_v41 }
0x1d25   : > { %v5140_v45 = vpop.f32.mrb[20].mxu0 }
0x1d26   : > { %v4311_v46 = vadd.f32 %v5140_v45, %v6442_v52  ;;  %v4301_v47 = vpop.f32.mrb[21].mxu0 }
0x1d27   : > { %v4310_v36 = vadd.f32 %v4301_v47, %v6444_v53 }
0x1d28   : > { %v4320_v32 = vadd.f32 %v4626_v26, %v4311_v46 }
0x1d29   : > { %v4319_v8 = vadd.f32 %v4626_v26, %v4310_v36 }
0x1d2a   : > { %v4322_v44 = vmul.f32 %v5691_v50, %v4320_v32 }
0x1d2b   : > { %v4321_v54 = vmul.f32 %v5692_v14, %v4319_v8 }
0x1d2c   : > { %v4324_v55 = vsel %vm1180_vm1, %v4322_v44, 0.0 }
0x1d2d   : > { %v4323_v51 = vsel %vm1176_vm0, %v4321_v54, 0.0 }
0x1d2e   : > { %v4325_v48 = vadd.f32 %v4324_v55, %v4323_v51 }
0x1d30   : > { %v4326_v56 = vrot.slane %v4325_v48, 4 }
0x1d32   : > { %v4327_v49 = vadd.f32 %v4326_v56, %v4325_v48 }
0x1d34   : > { %v4328_v42 = vrot.slane %v4327_v49, 2 }
0x1d36   : > { %v4329_v52 = vadd.f32 %v4328_v42, %v4327_v49 }
0x1d38   : > { %v4330_v43 = vrot.slane %v4329_v52, 1 }
0x1d3a   : > { %v4331_v30 = vadd.f32 %v4330_v43, %v4329_v52 }
0x1d3c   : > { %v4332_v53 = vmul.f32 0.125, %v4331_v30 }
0x1d3e   : > { %v4335_v22 = vsel %vm1176_vm0, %v4332_v53, 0.0 }
0x1d3f   : > { %4336 = vadd.xlane.f32.xlu0 %v4335_v22 }
0x1dcc   : > { %v4337_v27 = vpop.xlane.xlu0 %4336 }
0x1dcd   : > { %v4338_v57 = vmul.f32 0.03125, %v4337_v27 }
0x1dcf   : > { %v4339_v58 = vsub.f32 %v4332_v53, %v4338_v57 }
0x1dd1   : > { %v4340_v61 = vmul.f32 %v4339_v58, %v4339_v58 }
0x1dd3   : > { %v4341_v33 = vsel %vm1176_vm0, %v4340_v61, 0.0 }
0x1dd4   : > { %4342 = vadd.xlane.f32.xlu0 %v4341_v33 }
0x1e61   : > { %v4343_v6 = vpop.xlane.xlu0 %4342 }
0x1e62   : > { %v4344_v7 = vmul.f32 0.03125, %v4343_v6 }
0x1e64   : > { %v4345_v11 = vadd.f32 1e-05, %v4344_v7 }
0x1e66   : > { %5689 = vrsqrt.f32 %v4345_v11 }
0x1e70   : > { %v5690_v12 = vpop.eup %5689 }
0x1e71   : > { %v4347_v15 = vmul.f32 %v5690_v12, %v4339_v58 }
0x1e73   : > { %v4348_v17 = vmul.f32 %v4347_v15, %v4333_v13 }
0x1e75   : > { %v4349_v18 = vadd.f32 %v4348_v17, %v4334_v16 }
0x1e77   : > { %5150 = vmatmul.mubr.msk.f32.vlgmr.msra.gmra.mrb[32].mxu1 %vm1176_vm0, %v4349_v18 }
0x1f4a   : > { %v4424_v9 = vpop.f32.mrb[32].mxu1 }
0x1f4b   : > { %v4425_v10 = vadd.f32 %v4424_v9, %v4354_v60  ;;  %v5151_v19 = vpop.f32.mrb[33].mxu1 }
0x1f4d   : > { %4428 = vst [vmem:[%s950_s4] sm:$0x1] %v4425_v10 }
0x1f4e   : > { %5706 = shalt.err (!%p5703_p3)
}
0x1f4f   : > { %s5707_s4 = scalar_lea.hbm %s6501_s7, 16  ;;  %s5711_s3 = scalar_lea.hbm %s5968_s20, 32 }
0x1f50   : > { %p5708_p4 = scmp.ne.s32.totalorder %s6501_s7, %s5707_s4  ;;  %p5712_p9 = scmp.lt.u32.totalorder %s6501_s7, %s5968_s20 }
0x1f51   : > { %p5713_p10 = scmp.lt.u32.totalorder %s5711_s3, %s5707_s4  ;;  %p5715_p12 = scmp.lt.u32.totalorder %s5707_s4, %s6501_s7 }
0x1f52   : > { %p5709_p7 = pnand %p5708_p4, %p6008_p5 }
0x1f53   : > { %p5714_p11 = por %p5713_p10, %p5712_p9 }
0x1f54   : > { %p5710_p8 = pneg %p5709_p7 }
0x1f55   : > { %p5716_p0 = por %p5715_p12, %p5714_p11 }
0x1f57   : > { %p5717_p13 = pnand %p5716_p0, %p5710_p8 }
0x1f59   : > { %5720 = shalt.err (!%p5717_p13)
}
0x1f5a   : > { %5427 = dma.vmem_to_hbm [thread:$0]  (%p6008_p5), %s6503_s5, 16, %s6501_s7, %s4430_s10  }
0x1f5b PF: > { %p5433_p1 = scmp.ge.s32.totalorder %s5755_s28, 2  ;;  %s4454_s9 = sand.u32 1, %s5743_s22  }
0x1f5c   : > { %s4455_s8 = scalar_lea.sflag [#allocation3], %s4454_s9 }
0x1f5d   : > { %p5430_p2 = pnand %p5433_p1, %p6012_p6 }
0x1f5f   : > { %5738 = dma.done.wait (!%p5430_p2), %s4455_s8, 16  }
0x1f60   : > { %5740 = vsyncadd (!%p5430_p2), %s4455_s8, 4294967280  ;;  %p73_p3 = scmp.ge.s32.totalorder %s5995_s2, 4   ;;  %s6620_s22 = smov %s5747_s23 }
0x1f61   : > { %s6621_s23 = smov %s5751_s26  ;;  %s6622_s26 = smov %s6006_s11 }
0x1f62   : > { %s6623_s28 = smov %s5995_s2  ;;  %75 = sbr.rel (!%p73_p3) target bundleno = 62 (0x3e), region = 210 }
0x1f69   :  { %4459 = vsyncpa [#allocation3], 1 }
0x1f6a   :  { %4461 = vsyncpa [#allocation3 + $0x1], 1 }

</bundles_post_ra>
